<compile_context>
chip_gen: v6e
topology: v6e:2x2x1
jax: 0.10.0
libtpu: 0.0.40
codegen_flags: <defaults>
</compile_context>

<pallas_src>
import jax
import jax.numpy as jnp
from jax.experimental import pallas as pl
from jax.experimental.pallas import tpu as pltpu


# ---------------------------------------------------------------------------
# Spec helpers
# ---------------------------------------------------------------------------
def _resident(shape):
    """Full-array VMEM block with a constant index map -> resident across grid."""
    zeros = (0,) * len(shape)
    return pl.BlockSpec(shape, lambda b: zeros)


# ---------------------------------------------------------------------------
# In-kernel building blocks (all value-space, no VMEM accumulators)
# ---------------------------------------------------------------------------
def _bias_relu_pool(y, bias, n, h, w):
    """bias + ReLU + 2x2/stride-2 max-pool on the flat conv result.

    y    : (n*h*w, C) f32, rows ordered (n, h, w) row-major
    bias : (1, C) f32
    ret  : (n, h//2, w//2, C) f32
    """
    c = y.shape[-1]
    y = jnp.maximum(y + bias, 0.0)                       # f32 epilogue
    y = y.reshape(n * h * (w // 2), 2, c)                # adjacent rows = w-pairs
    y = jnp.maximum(y[:, 0, :], y[:, 1, :])
    y = y.reshape(n * (h // 2), 2, w // 2, c)            # consecutive h rows
    y = jnp.maximum(y[:, 0], y[:, 1])
    return y.reshape(n, h // 2, w // 2, c)


def _pad_into(dst_ref, val, pad):
    """Write `val` into dst_ref's interior; zero only the four halo strips."""
    _, hp, wp, c = dst_ref.shape
    _, h, w, _ = val.shape
    dt = dst_ref.dtype
    dst_ref[:, :pad, :, :] = jnp.zeros((1, pad, wp, c), dt)
    dst_ref[:, pad + h:, :, :] = jnp.zeros((1, hp - pad - h, wp, c), dt)
    dst_ref[:, pad:pad + h, :pad, :] = jnp.zeros((1, h, pad, c), dt)
    dst_ref[:, pad:pad + h, pad + w:, :] = jnp.zeros((1, h, wp - pad - w, c), dt)
    dst_ref[:, pad:pad + h, pad:pad + w, :] = val


def _conv_stage(x, xp_ref, w_ref, b_ref, h, w, K):
    """'same' conv (stride 1) + bias + ReLU + 2x2 maxpool as ONE im2col matmul.

    x      : (1, h, w, Cin) f32 pooled activation from previous layer
    xp_ref : (1, h+2p, w+2p, Cin) bf16 VMEM scratch (padded input)
    w_ref  : (K*K*Cin, Cout) bf16
    b_ref  : (1, Cout) f32
    """
    cin = x.shape[-1]
    pad = (K - 1) // 2
    _pad_into(xp_ref, x.astype(jnp.bfloat16), pad)
    cols = [xp_ref[:, kh:kh + h, kw:kw + w, :]
            for kh in range(K) for kw in range(K)]
    patch = jnp.concatenate(cols, axis=-1).reshape(h * w, K * K * cin)
    y = jnp.dot(patch, w_ref[...], preferred_element_type=jnp.float32)
    return _bias_relu_pool(y, b_ref[...], 1, h, w)


# ---------------------------------------------------------------------------
# Fused kernel: conv1(im2col precomputed) + 3x conv stages + flatten + Linear
# ---------------------------------------------------------------------------
def _make_kernel(layer_dims):
    h1, w1, _ = layer_dims[0]

    def kernel(p1_ref, w1_ref, b1_ref, w2_ref, b2_ref, w3_ref, b3_ref,
               w4_ref, b4_ref, fcw_ref, fcb_ref, o_ref, xp2, xp3, xp4):
        # Layer 1: lane-dense im2col patch built by XLA -> one matmul.
        y = jnp.dot(p1_ref[0], w1_ref[...], preferred_element_type=jnp.float32)
        x = _bias_relu_pool(y, b1_ref[...], 1, h1, w1)
        # Layers 2..4: pad -> im2col -> single matmul -> bias/ReLU/pool.
        for xp_ref, w_ref, b_ref, (h, w, K) in zip(
                (xp2, xp3, xp4), (w2_ref, w3_ref, w4_ref),
                (b2_ref, b3_ref, b4_ref), layer_dims[1:]):
            x = _conv_stage(x, xp_ref, w_ref, b_ref, h, w, K)
        # torch.flatten(x, 1): final spatial map is 1x1 here, so NCHW and NHWC
        # flatten orders coincide.
        # TODO(synk): general input_size (>16x downsample remainder) would need
        # an NHWC->NCHW transpose before the FC flatten to match torch.flatten.
        feat = x.reshape(1, x.shape[-1]).astype(jnp.bfloat16)
        o = jnp.dot(feat, fcw_ref[...], preferred_element_type=jnp.float32)
        o_ref[...] = (o + fcb_ref[...]).reshape(o_ref.shape)

    return kernel


# ---------------------------------------------------------------------------
# Wrapper
# ---------------------------------------------------------------------------
def _im2col_xla(x_nhwc, K):
    """(N, H, W, C) -> (N, H*W, K*K*C) 'same'-conv patch matrix (runs in XLA)."""
    pad = (K - 1) // 2
    N, H, W, C = x_nhwc.shape
    xp = jnp.pad(x_nhwc, ((0, 0), (pad, pad), (pad, pad), (0, 0)))
    cols = [xp[:, kh:kh + H, kw:kw + W, :] for kh in range(K) for kw in range(K)]
    return jnp.concatenate(cols, axis=-1).reshape(N, H * W, K * K * C)


def denoise_encoder_forward(x_nchw, params):
    convs = params["convs"]
    assert len(convs) == 4, "module has exactly 4 conv stages"

    x = jnp.transpose(x_nchw, (0, 2, 3, 1))               # NCHW -> NHWC (f32)
    N, H, W, _ = x.shape

    # Static per-layer geometry: (input h, input w, kernel size).
    layer_dims, h, w = [], H, W
    for cw, _cb in convs:
        layer_dims.append((h, w, cw.shape[0]))
        h, w = h // 2, w // 2
    assert h == 1 and w == 1, "flatten/FC path assumes a 1x1 final spatial map"

    # Layer-1 im2col in XLA (Cin=4 would waste 124/128 lanes inside the kernel).
    k1 = convs[0][0].shape[0]
    p1 = _im2col_xla(x, k1).astype(jnp.bfloat16)           # (N, H*W, K*K*Cin)

    kernel_inputs = [p1]
    in_specs = [pl.BlockSpec((1, H * W, p1.shape[-1]), lambda b: (b, 0, 0))]
    scratch_shapes = []
    for li, (cw, cb) in enumerate(convs):
        K, _, cin, cout = cw.shape
        kernel_inputs.append(cw.reshape(K * K * cin, cout).astype(jnp.bfloat16))
        kernel_inputs.append(cb.reshape(1, cout).astype(jnp.float32))
        in_specs += [_resident((K * K * cin, cout)), _resident((1, cout))]
        if li > 0:                                          # pad scratch, layers 2-4
            hh, ww, _ = layer_dims[li]
            pad = (K - 1) // 2
            scratch_shapes.append(
                pltpu.VMEM((1, hh + 2 * pad, ww + 2 * pad, cin), jnp.bfloat16))

    fcw = params["fc_w"].astype(jnp.bfloat16)
    fcb = params["fc_b"].reshape(1, -1).astype(jnp.float32)
    kernel_inputs += [fcw, fcb]
    in_specs += [_resident(fcw.shape), _resident(fcb.shape)]
    latent = fcw.shape[1]

    out = pl.pallas_call(
        _make_kernel(tuple(layer_dims)),
        out_shape=jax.ShapeDtypeStruct((N, 1, latent), jnp.float32),
        grid=(N,),                                          # one image per program
        in_specs=in_specs,
        out_specs=pl.BlockSpec((1, 1, latent), lambda b: (b, 0, 0)),
        scratch_shapes=scratch_shapes,
        compiler_params=pltpu.CompilerParams(
            dimension_semantics=("parallel",)),             # v7x: split batch on 2 TCs
    )(*kernel_inputs)
    return out.reshape(N, latent)


# ---------------------------------------------------------------------------
# Parameter init (deterministic, synthetic) and a pure-JAX f32 reference
# ---------------------------------------------------------------------------
def init_params(key, *, number_of_classes=4, input_size=(16, 16),
                latent_vector_size=64):
    conv_specs = [  # (Cin, Cout, K)
        (number_of_classes, 64, 5),
        (64, 128, 3),
        (128, 256, 3),
        (256, 256, 3),
    ]
    keys = jax.random.split(key, 2 * len(conv_specs) + 2)
    convs = []
    for i, (cin, cout, k) in enumerate(conv_specs):
        bound = 1.0 / float(cin * k * k) ** 0.5
        wgt = jax.random.uniform(keys[2 * i], (k, k, cin, cout),
                                 jnp.float32, -bound, bound)
        bia = jax.random.uniform(keys[2 * i + 1], (cout,),
                                 jnp.float32, -bound, bound)
        convs.append((wgt, bia))
    feat = (input_size[0] // 16) * (input_size[1] // 16) * 256
    fb = 1.0 / float(feat) ** 0.5
    fc_w = jax.random.uniform(keys[-2], (feat, latent_vector_size),
                              jnp.float32, -fb, fb)
    fc_b = jax.random.uniform(keys[-1], (latent_vector_size,),
                              jnp.float32, -fb, fb)
    return {"convs": convs, "fc_w": fc_w, "fc_b": fc_b}


def _reference_forward(x_nchw, params):
    x = jnp.transpose(x_nchw, (0, 2, 3, 1))
    for wgt, b in params["convs"]:
        x = jax.lax.conv_general_dilated(
            x, wgt, window_strides=(1, 1), padding="SAME",
            dimension_numbers=("NHWC", "HWIO", "NHWC"))
        x = jax.nn.relu(x + b)
        n, hh, ww, c = x.shape
        x = x.reshape(n, hh // 2, 2, ww // 2, 2, c).max(axis=(2, 4))
    return x.reshape(x.shape[0], -1) @ params["fc_w"] + params["fc_b"]


if __name__ == "__main__":
    key = jax.random.PRNGKey(0)
    k_x, k_p = jax.random.split(key)

    input_size = (16, 16)      # batch=2, classes=4, spatial=16 (small shapes)
    latent = 64
    x = jax.random.normal(k_x, (2, 4, *input_size), jnp.float32)
    params = init_params(k_p, number_of_classes=4, input_size=input_size,
                         latent_vector_size=latent)

    fwd = jax.jit(denoise_encoder_forward)
    out = jax.block_until_ready(fwd(x, params))

    assert out.shape == (2, latent), out.shape
    assert out.dtype == jnp.float32, out.dtype

    # bf16 MXU operands + per-layer requantization -> compare with loose tolerance.
    ref = _reference_forward(x, params)
    rel = float(jnp.max(jnp.abs(out - ref)) / (jnp.max(jnp.abs(ref)) + 1e-6))
    assert rel < 5e-2, f"max relative error vs f32 reference: {rel:.4f}"

    print("KERNEL_OK")
</pallas_src>

<mosaic_0001>
module attributes {stable_mosaic.version = 11 : i64} {
  func.func @kernel(%arg0: i32, %arg1: memref<1x256x100xbf16, #tpu.memory_space<vmem>>, %arg2: memref<100x64xbf16, #tpu.memory_space<vmem>>, %arg3: memref<1x64xf32, #tpu.memory_space<vmem>>, %arg4: memref<576x128xbf16, #tpu.memory_space<vmem>>, %arg5: memref<1x128xf32, #tpu.memory_space<vmem>>, %arg6: memref<1152x256xbf16, #tpu.memory_space<vmem>>, %arg7: memref<1x256xf32, #tpu.memory_space<vmem>>, %arg8: memref<2304x256xbf16, #tpu.memory_space<vmem>>, %arg9: memref<1x256xf32, #tpu.memory_space<vmem>>, %arg10: memref<256x64xbf16, #tpu.memory_space<vmem>>, %arg11: memref<1x64xf32, #tpu.memory_space<vmem>>, %arg12: memref<1x1x64xf32, #tpu.memory_space<vmem>>, %arg13: memref<1x10x10x64xbf16, #tpu.memory_space<vmem>>, %arg14: memref<1x6x6x128xbf16, #tpu.memory_space<vmem>>, %arg15: memref<1x4x4x256xbf16, #tpu.memory_space<vmem>>) attributes {dimension_semantics = [#tpu.dimension_semantics<parallel>], iteration_bounds = array<i64: 2>, scalar_prefetch = 0 : i64, scratch_operands = 3 : i64, tpu.core_type = #tpu.core_type<tc>, window_params = [{transform_indices = @transform_0, window_bounds = array<i64: 1, 256, 100>}, {pipeline_mode = #tpu.pipeline_mode<synchronous>, transform_indices = @transform_1, window_bounds = array<i64: 100, 64>}, {pipeline_mode = #tpu.pipeline_mode<synchronous>, transform_indices = @transform_2, window_bounds = array<i64: 1, 64>}, {pipeline_mode = #tpu.pipeline_mode<synchronous>, transform_indices = @transform_3, window_bounds = array<i64: 576, 128>}, {pipeline_mode = #tpu.pipeline_mode<synchronous>, transform_indices = @transform_4, window_bounds = array<i64: 1, 128>}, {pipeline_mode = #tpu.pipeline_mode<synchronous>, transform_indices = @transform_5, window_bounds = array<i64: 1152, 256>}, {pipeline_mode = #tpu.pipeline_mode<synchronous>, transform_indices = @transform_6, window_bounds = array<i64: 1, 256>}, {pipeline_mode = #tpu.pipeline_mode<synchronous>, transform_indices = @transform_7, window_bounds = array<i64: 2304, 256>}, {pipeline_mode = #tpu.pipeline_mode<synchronous>, transform_indices = @transform_8, window_bounds = array<i64: 1, 256>}, {pipeline_mode = #tpu.pipeline_mode<synchronous>, transform_indices = @transform_9, window_bounds = array<i64: 256, 64>}, {pipeline_mode = #tpu.pipeline_mode<synchronous>, transform_indices = @transform_10, window_bounds = array<i64: 1, 64>}, {transform_indices = @transform_11, window_bounds = array<i64: 1, 1, 64>}]} {
    %c0 = arith.constant 0 : index
    %c0_0 = arith.constant 0 : index
    %c0_1 = arith.constant 0 : index
    %0 = vector.load %arg1[%c0, %c0_0, %c0_1] : memref<1x256x100xbf16, #tpu.memory_space<vmem>>, vector<1x256x100xbf16>
    %1 = vector.shape_cast %0 : vector<1x256x100xbf16> to vector<256x100xbf16>
    %c0_2 = arith.constant 0 : index
    %c0_3 = arith.constant 0 : index
    %2 = vector.load %arg2[%c0_2, %c0_3] : memref<100x64xbf16, #tpu.memory_space<vmem>>, vector<100x64xbf16>
    %cst = arith.constant dense<0.000000e+00> : vector<256x64xf32>
    %3 = tpu.matmul %1, %2, %cst {dimension_numbers = #tpu.dot_dimension_numbers<[1], [0], [0], [1], [0, 0, 1, 1], [], []>} : vector<256x100xbf16>, vector<100x64xbf16>, vector<256x64xf32> -> vector<256x64xf32>
    %c0_4 = arith.constant 0 : index
    %c0_5 = arith.constant 0 : index
    %4 = vector.load %arg3[%c0_4, %c0_5] : memref<1x64xf32, #tpu.memory_space<vmem>>, vector<1x64xf32>
    %5 = vector.broadcast %4 : vector<1x64xf32> to vector<256x64xf32>
    %6 = arith.addf %3, %5 : vector<256x64xf32>
    %cst_6 = arith.constant 0.000000e+00 : f32
    %7 = vector.broadcast %cst_6 : f32 to vector<256x64xf32>
    %8 = arith.maximumf %6, %7 : vector<256x64xf32>
    %9 = vector.shape_cast %8 : vector<256x64xf32> to vector<128x2x64xf32>
    %10 = vector.extract_strided_slice %9 {offsets = [0, 0, 0], sizes = [128, 1, 64], strides = [1, 1, 1]} : vector<128x2x64xf32> to vector<128x1x64xf32>
    %11 = vector.shape_cast %10 : vector<128x1x64xf32> to vector<128x64xf32>
    %12 = vector.extract_strided_slice %9 {offsets = [0, 1, 0], sizes = [128, 1, 64], strides = [1, 1, 1]} : vector<128x2x64xf32> to vector<128x1x64xf32>
    %13 = vector.shape_cast %12 : vector<128x1x64xf32> to vector<128x64xf32>
    %14 = arith.maximumf %11, %13 : vector<128x64xf32>
    %15 = vector.shape_cast %14 : vector<128x64xf32> to vector<8x2x8x64xf32>
    %16 = vector.extract_strided_slice %15 {offsets = [0, 0, 0, 0], sizes = [8, 1, 8, 64], strides = [1, 1, 1, 1]} : vector<8x2x8x64xf32> to vector<8x1x8x64xf32>
    %17 = vector.shape_cast %16 : vector<8x1x8x64xf32> to vector<8x8x64xf32>
    %18 = vector.extract_strided_slice %15 {offsets = [0, 1, 0, 0], sizes = [8, 1, 8, 64], strides = [1, 1, 1, 1]} : vector<8x2x8x64xf32> to vector<8x1x8x64xf32>
    %19 = vector.shape_cast %18 : vector<8x1x8x64xf32> to vector<8x8x64xf32>
    %20 = arith.maximumf %17, %19 : vector<8x8x64xf32>
    %21 = vector.shape_cast %20 : vector<8x8x64xf32> to vector<1x8x8x64xf32>
    %22 = arith.truncf %21 : vector<1x8x8x64xf32> to vector<1x8x8x64xbf16>
    %cst_7 = arith.constant 0.000000e+00 : bf16
    %23 = vector.broadcast %cst_7 : bf16 to vector<1x1x10x64xbf16>
    %c0_8 = arith.constant 0 : index
    %c0_9 = arith.constant 0 : index
    %c0_10 = arith.constant 0 : index
    %c0_11 = arith.constant 0 : index
    %24 = vector.load %arg13[%c0_8, %c0_9, %c0_10, %c0_11] : memref<1x10x10x64xbf16, #tpu.memory_space<vmem>>, vector<1x1x10x64xbf16>
    tpu.vector_store %arg13[%c0_8, %c0_9, %c0_10, %c0_11], %23 {strides = array<i32>} : memref<1x10x10x64xbf16, #tpu.memory_space<vmem>>, vector<1x1x10x64xbf16>,
    %cst_12 = arith.constant 0.000000e+00 : bf16
    %25 = vector.broadcast %cst_12 : bf16 to vector<1x1x10x64xbf16>
    %c0_13 = arith.constant 0 : index
    %c9 = arith.constant 9 : index
    %c0_14 = arith.constant 0 : index
    %c0_15 = arith.constant 0 : index
    %26 = vector.load %arg13[%c0_13, %c9, %c0_14, %c0_15] : memref<1x10x10x64xbf16, #tpu.memory_space<vmem>>, vector<1x1x10x64xbf16>
    tpu.vector_store %arg13[%c0_13, %c9, %c0_14, %c0_15], %25 {strides = array<i32>} : memref<1x10x10x64xbf16, #tpu.memory_space<vmem>>, vector<1x1x10x64xbf16>,
    %cst_16 = arith.constant 0.000000e+00 : bf16
    %27 = vector.broadcast %cst_16 : bf16 to vector<1x8x1x64xbf16>
    %c0_17 = arith.constant 0 : index
    %c1 = arith.constant 1 : index
    %c0_18 = arith.constant 0 : index
    %c0_19 = arith.constant 0 : index
    %28 = vector.load %arg13[%c0_17, %c1, %c0_18, %c0_19] : memref<1x10x10x64xbf16, #tpu.memory_space<vmem>>, vector<1x8x1x64xbf16>
    tpu.vector_store %arg13[%c0_17, %c1, %c0_18, %c0_19], %27 {strides = array<i32>} : memref<1x10x10x64xbf16, #tpu.memory_space<vmem>>, vector<1x8x1x64xbf16>,
    %cst_20 = arith.constant 0.000000e+00 : bf16
    %29 = vector.broadcast %cst_20 : bf16 to vector<1x8x1x64xbf16>
    %c0_21 = arith.constant 0 : index
    %c1_22 = arith.constant 1 : index
    %c9_23 = arith.constant 9 : index
    %c0_24 = arith.constant 0 : index
    %30 = vector.load %arg13[%c0_21, %c1_22, %c9_23, %c0_24] : memref<1x10x10x64xbf16, #tpu.memory_space<vmem>>, vector<1x8x1x64xbf16>
    tpu.vector_store %arg13[%c0_21, %c1_22, %c9_23, %c0_24], %29 {strides = array<i32>} : memref<1x10x10x64xbf16, #tpu.memory_space<vmem>>, vector<1x8x1x64xbf16>,
    %c0_25 = arith.constant 0 : index
    %c1_26 = arith.constant 1 : index
    %c1_27 = arith.constant 1 : index
    %c0_28 = arith.constant 0 : index
    %31 = vector.load %arg13[%c0_25, %c1_26, %c1_27, %c0_28] : memref<1x10x10x64xbf16, #tpu.memory_space<vmem>>, vector<1x8x8x64xbf16>
    tpu.vector_store %arg13[%c0_25, %c1_26, %c1_27, %c0_28], %22 {strides = array<i32>} : memref<1x10x10x64xbf16, #tpu.memory_space<vmem>>, vector<1x8x8x64xbf16>,
    %c0_29 = arith.constant 0 : index
    %c0_30 = arith.constant 0 : index
    %c0_31 = arith.constant 0 : index
    %c0_32 = arith.constant 0 : index
    %32 = vector.load %arg13[%c0_29, %c0_30, %c0_31, %c0_32] : memref<1x10x10x64xbf16, #tpu.memory_space<vmem>>, vector<1x8x8x64xbf16>
    %c0_33 = arith.constant 0 : index
    %c0_34 = arith.constant 0 : index
    %c1_35 = arith.constant 1 : index
    %c0_36 = arith.constant 0 : index
    %33 = vector.load %arg13[%c0_33, %c0_34, %c1_35, %c0_36] : memref<1x10x10x64xbf16, #tpu.memory_space<vmem>>, vector<1x8x8x64xbf16>
    %c0_37 = arith.constant 0 : index
    %c0_38 = arith.constant 0 : index
    %c2 = arith.constant 2 : index
    %c0_39 = arith.constant 0 : index
    %34 = vector.load %arg13[%c0_37, %c0_38, %c2, %c0_39] : memref<1x10x10x64xbf16, #tpu.memory_space<vmem>>, vector<1x8x8x64xbf16>
    %c0_40 = arith.constant 0 : index
    %c1_41 = arith.constant 1 : index
    %c0_42 = arith.constant 0 : index
    %c0_43 = arith.constant 0 : index
    %35 = vector.load %arg13[%c0_40, %c1_41, %c0_42, %c0_43] : memref<1x10x10x64xbf16, #tpu.memory_space<vmem>>, vector<1x8x8x64xbf16>
    %c0_44 = arith.constant 0 : index
    %c1_45 = arith.constant 1 : index
    %c1_46 = arith.constant 1 : index
    %c0_47 = arith.constant 0 : index
    %36 = vector.load %arg13[%c0_44, %c1_45, %c1_46, %c0_47] : memref<1x10x10x64xbf16, #tpu.memory_space<vmem>>, vector<1x8x8x64xbf16>
    %c0_48 = arith.constant 0 : index
    %c1_49 = arith.constant 1 : index
    %c2_50 = arith.constant 2 : index
    %c0_51 = arith.constant 0 : index
    %37 = vector.load %arg13[%c0_48, %c1_49, %c2_50, %c0_51] : memref<1x10x10x64xbf16, #tpu.memory_space<vmem>>, vector<1x8x8x64xbf16>
    %c0_52 = arith.constant 0 : index
    %c2_53 = arith.constant 2 : index
    %c0_54 = arith.constant 0 : index
    %c0_55 = arith.constant 0 : index
    %38 = vector.load %arg13[%c0_52, %c2_53, %c0_54, %c0_55] : memref<1x10x10x64xbf16, #tpu.memory_space<vmem>>, vector<1x8x8x64xbf16>
    %c0_56 = arith.constant 0 : index
    %c2_57 = arith.constant 2 : index
    %c1_58 = arith.constant 1 : index
    %c0_59 = arith.constant 0 : index
    %39 = vector.load %arg13[%c0_56, %c2_57, %c1_58, %c0_59] : memref<1x10x10x64xbf16, #tpu.memory_space<vmem>>, vector<1x8x8x64xbf16>
    %c0_60 = arith.constant 0 : index
    %c2_61 = arith.constant 2 : index
    %c2_62 = arith.constant 2 : index
    %c0_63 = arith.constant 0 : index
    %40 = vector.load %arg13[%c0_60, %c2_61, %c2_62, %c0_63] : memref<1x10x10x64xbf16, #tpu.memory_space<vmem>>, vector<1x8x8x64xbf16>
    %41 = tpu.concatenate %32, %33, %34, %35, %36, %37, %38, %39, %40 in 3 : vector<1x8x8x64xbf16>, vector<1x8x8x64xbf16>, vector<1x8x8x64xbf16>, vector<1x8x8x64xbf16>, vector<1x8x8x64xbf16>, vector<1x8x8x64xbf16>, vector<1x8x8x64xbf16>, vector<1x8x8x64xbf16>, vector<1x8x8x64xbf16> -> vector<1x8x8x576xbf16>
    %42 = vector.shape_cast %41 : vector<1x8x8x576xbf16> to vector<64x576xbf16>
    %c0_64 = arith.constant 0 : index
    %c0_65 = arith.constant 0 : index
    %43 = vector.load %arg4[%c0_64, %c0_65] : memref<576x128xbf16, #tpu.memory_space<vmem>>, vector<576x128xbf16>
    %cst_66 = arith.constant dense<0.000000e+00> : vector<64x128xf32>
    %44 = tpu.matmul %42, %43, %cst_66 {dimension_numbers = #tpu.dot_dimension_numbers<[1], [0], [0], [1], [0, 0, 1, 1], [], []>} : vector<64x576xbf16>, vector<576x128xbf16>, vector<64x128xf32> -> vector<64x128xf32>
    %c0_67 = arith.constant 0 : index
    %c0_68 = arith.constant 0 : index
    %45 = vector.load %arg5[%c0_67, %c0_68] : memref<1x128xf32, #tpu.memory_space<vmem>>, vector<1x128xf32>
    %46 = vector.broadcast %45 : vector<1x128xf32> to vector<64x128xf32>
    %47 = arith.addf %44, %46 : vector<64x128xf32>
    %cst_69 = arith.constant 0.000000e+00 : f32
    %48 = vector.broadcast %cst_69 : f32 to vector<64x128xf32>
    %49 = arith.maximumf %47, %48 : vector<64x128xf32>
    %50 = vector.shape_cast %49 : vector<64x128xf32> to vector<32x2x128xf32>
    %51 = vector.extract_strided_slice %50 {offsets = [0, 0, 0], sizes = [32, 1, 128], strides = [1, 1, 1]} : vector<32x2x128xf32> to vector<32x1x128xf32>
    %52 = vector.shape_cast %51 : vector<32x1x128xf32> to vector<32x128xf32>
    %53 = vector.extract_strided_slice %50 {offsets = [0, 1, 0], sizes = [32, 1, 128], strides = [1, 1, 1]} : vector<32x2x128xf32> to vector<32x1x128xf32>
    %54 = vector.shape_cast %53 : vector<32x1x128xf32> to vector<32x128xf32>
    %55 = arith.maximumf %52, %54 : vector<32x128xf32>
    %56 = vector.shape_cast %55 : vector<32x128xf32> to vector<4x2x4x128xf32>
    %57 = vector.extract_strided_slice %56 {offsets = [0, 0, 0, 0], sizes = [4, 1, 4, 128], strides = [1, 1, 1, 1]} : vector<4x2x4x128xf32> to vector<4x1x4x128xf32>
    %58 = vector.shape_cast %57 : vector<4x1x4x128xf32> to vector<4x4x128xf32>
    %59 = vector.extract_strided_slice %56 {offsets = [0, 1, 0, 0], sizes = [4, 1, 4, 128], strides = [1, 1, 1, 1]} : vector<4x2x4x128xf32> to vector<4x1x4x128xf32>
    %60 = vector.shape_cast %59 : vector<4x1x4x128xf32> to vector<4x4x128xf32>
    %61 = arith.maximumf %58, %60 : vector<4x4x128xf32>
    %62 = vector.shape_cast %61 : vector<4x4x128xf32> to vector<1x4x4x128xf32>
    %63 = arith.truncf %62 : vector<1x4x4x128xf32> to vector<1x4x4x128xbf16>
    %cst_70 = arith.constant 0.000000e+00 : bf16
    %64 = vector.broadcast %cst_70 : bf16 to vector<1x1x6x128xbf16>
    %c0_71 = arith.constant 0 : index
    %c0_72 = arith.constant 0 : index
    %c0_73 = arith.constant 0 : index
    %c0_74 = arith.constant 0 : index
    %65 = vector.load %arg14[%c0_71, %c0_72, %c0_73, %c0_74] : memref<1x6x6x128xbf16, #tpu.memory_space<vmem>>, vector<1x1x6x128xbf16>
    tpu.vector_store %arg14[%c0_71, %c0_72, %c0_73, %c0_74], %64 {strides = array<i32>} : memref<1x6x6x128xbf16, #tpu.memory_space<vmem>>, vector<1x1x6x128xbf16>,
    %cst_75 = arith.constant 0.000000e+00 : bf16
    %66 = vector.broadcast %cst_75 : bf16 to vector<1x1x6x128xbf16>
    %c0_76 = arith.constant 0 : index
    %c5 = arith.constant 5 : index
    %c0_77 = arith.constant 0 : index
    %c0_78 = arith.constant 0 : index
    %67 = vector.load %arg14[%c0_76, %c5, %c0_77, %c0_78] : memref<1x6x6x128xbf16, #tpu.memory_space<vmem>>, vector<1x1x6x128xbf16>
    tpu.vector_store %arg14[%c0_76, %c5, %c0_77, %c0_78], %66 {strides = array<i32>} : memref<1x6x6x128xbf16, #tpu.memory_space<vmem>>, vector<1x1x6x128xbf16>,
    %cst_79 = arith.constant 0.000000e+00 : bf16
    %68 = vector.broadcast %cst_79 : bf16 to vector<1x4x1x128xbf16>
    %c0_80 = arith.constant 0 : index
    %c1_81 = arith.constant 1 : index
    %c0_82 = arith.constant 0 : index
    %c0_83 = arith.constant 0 : index
    %69 = vector.load %arg14[%c0_80, %c1_81, %c0_82, %c0_83] : memref<1x6x6x128xbf16, #tpu.memory_space<vmem>>, vector<1x4x1x128xbf16>
    tpu.vector_store %arg14[%c0_80, %c1_81, %c0_82, %c0_83], %68 {strides = array<i32>} : memref<1x6x6x128xbf16, #tpu.memory_space<vmem>>, vector<1x4x1x128xbf16>,
    %cst_84 = arith.constant 0.000000e+00 : bf16
    %70 = vector.broadcast %cst_84 : bf16 to vector<1x4x1x128xbf16>
    %c0_85 = arith.constant 0 : index
    %c1_86 = arith.constant 1 : index
    %c5_87 = arith.constant 5 : index
    %c0_88 = arith.constant 0 : index
    %71 = vector.load %arg14[%c0_85, %c1_86, %c5_87, %c0_88] : memref<1x6x6x128xbf16, #tpu.memory_space<vmem>>, vector<1x4x1x128xbf16>
    tpu.vector_store %arg14[%c0_85, %c1_86, %c5_87, %c0_88], %70 {strides = array<i32>} : memref<1x6x6x128xbf16, #tpu.memory_space<vmem>>, vector<1x4x1x128xbf16>,
    %c0_89 = arith.constant 0 : index
    %c1_90 = arith.constant 1 : index
    %c1_91 = arith.constant 1 : index
    %c0_92 = arith.constant 0 : index
    %72 = vector.load %arg14[%c0_89, %c1_90, %c1_91, %c0_92] : memref<1x6x6x128xbf16, #tpu.memory_space<vmem>>, vector<1x4x4x128xbf16>
    tpu.vector_store %arg14[%c0_89, %c1_90, %c1_91, %c0_92], %63 {strides = array<i32>} : memref<1x6x6x128xbf16, #tpu.memory_space<vmem>>, vector<1x4x4x128xbf16>,
    %c0_93 = arith.constant 0 : index
    %c0_94 = arith.constant 0 : index
    %c0_95 = arith.constant 0 : index
    %c0_96 = arith.constant 0 : index
    %73 = vector.load %arg14[%c0_93, %c0_94, %c0_95, %c0_96] : memref<1x6x6x128xbf16, #tpu.memory_space<vmem>>, vector<1x4x4x128xbf16>
    %c0_97 = arith.constant 0 : index
    %c0_98 = arith.constant 0 : index
    %c1_99 = arith.constant 1 : index
    %c0_100 = arith.constant 0 : index
    %74 = vector.load %arg14[%c0_97, %c0_98, %c1_99, %c0_100] : memref<1x6x6x128xbf16, #tpu.memory_space<vmem>>, vector<1x4x4x128xbf16>
    %c0_101 = arith.constant 0 : index
    %c0_102 = arith.constant 0 : index
    %c2_103 = arith.constant 2 : index
    %c0_104 = arith.constant 0 : index
    %75 = vector.load %arg14[%c0_101, %c0_102, %c2_103, %c0_104] : memref<1x6x6x128xbf16, #tpu.memory_space<vmem>>, vector<1x4x4x128xbf16>
    %c0_105 = arith.constant 0 : index
    %c1_106 = arith.constant 1 : index
    %c0_107 = arith.constant 0 : index
    %c0_108 = arith.constant 0 : index
    %76 = vector.load %arg14[%c0_105, %c1_106, %c0_107, %c0_108] : memref<1x6x6x128xbf16, #tpu.memory_space<vmem>>, vector<1x4x4x128xbf16>
    %c0_109 = arith.constant 0 : index
    %c1_110 = arith.constant 1 : index
    %c1_111 = arith.constant 1 : index
    %c0_112 = arith.constant 0 : index
    %77 = vector.load %arg14[%c0_109, %c1_110, %c1_111, %c0_112] : memref<1x6x6x128xbf16, #tpu.memory_space<vmem>>, vector<1x4x4x128xbf16>
    %c0_113 = arith.constant 0 : index
    %c1_114 = arith.constant 1 : index
    %c2_115 = arith.constant 2 : index
    %c0_116 = arith.constant 0 : index
    %78 = vector.load %arg14[%c0_113, %c1_114, %c2_115, %c0_116] : memref<1x6x6x128xbf16, #tpu.memory_space<vmem>>, vector<1x4x4x128xbf16>
    %c0_117 = arith.constant 0 : index
    %c2_118 = arith.constant 2 : index
    %c0_119 = arith.constant 0 : index
    %c0_120 = arith.constant 0 : index
    %79 = vector.load %arg14[%c0_117, %c2_118, %c0_119, %c0_120] : memref<1x6x6x128xbf16, #tpu.memory_space<vmem>>, vector<1x4x4x128xbf16>
    %c0_121 = arith.constant 0 : index
    %c2_122 = arith.constant 2 : index
    %c1_123 = arith.constant 1 : index
    %c0_124 = arith.constant 0 : index
    %80 = vector.load %arg14[%c0_121, %c2_122, %c1_123, %c0_124] : memref<1x6x6x128xbf16, #tpu.memory_space<vmem>>, vector<1x4x4x128xbf16>
    %c0_125 = arith.constant 0 : index
    %c2_126 = arith.constant 2 : index
    %c2_127 = arith.constant 2 : index
    %c0_128 = arith.constant 0 : index
    %81 = vector.load %arg14[%c0_125, %c2_126, %c2_127, %c0_128] : memref<1x6x6x128xbf16, #tpu.memory_space<vmem>>, vector<1x4x4x128xbf16>
    %82 = tpu.concatenate %73, %74, %75, %76, %77, %78, %79, %80, %81 in 3 : vector<1x4x4x128xbf16>, vector<1x4x4x128xbf16>, vector<1x4x4x128xbf16>, vector<1x4x4x128xbf16>, vector<1x4x4x128xbf16>, vector<1x4x4x128xbf16>, vector<1x4x4x128xbf16>, vector<1x4x4x128xbf16>, vector<1x4x4x128xbf16> -> vector<1x4x4x1152xbf16>
    %83 = vector.shape_cast %82 : vector<1x4x4x1152xbf16> to vector<16x1152xbf16>
    %c0_129 = arith.constant 0 : index
    %c0_130 = arith.constant 0 : index
    %84 = vector.load %arg6[%c0_129, %c0_130] : memref<1152x256xbf16, #tpu.memory_space<vmem>>, vector<1152x256xbf16>
    %cst_131 = arith.constant dense<0.000000e+00> : vector<16x256xf32>
    %85 = tpu.matmul %83, %84, %cst_131 {dimension_numbers = #tpu.dot_dimension_numbers<[1], [0], [0], [1], [0, 0, 1, 1], [], []>} : vector<16x1152xbf16>, vector<1152x256xbf16>, vector<16x256xf32> -> vector<16x256xf32>
    %c0_132 = arith.constant 0 : index
    %c0_133 = arith.constant 0 : index
    %86 = vector.load %arg7[%c0_132, %c0_133] : memref<1x256xf32, #tpu.memory_space<vmem>>, vector<1x256xf32>
    %87 = vector.broadcast %86 : vector<1x256xf32> to vector<16x256xf32>
    %88 = arith.addf %85, %87 : vector<16x256xf32>
    %cst_134 = arith.constant 0.000000e+00 : f32
    %89 = vector.broadcast %cst_134 : f32 to vector<16x256xf32>
    %90 = arith.maximumf %88, %89 : vector<16x256xf32>
    %91 = vector.shape_cast %90 : vector<16x256xf32> to vector<8x2x256xf32>
    %92 = vector.extract_strided_slice %91 {offsets = [0, 0, 0], sizes = [8, 1, 256], strides = [1, 1, 1]} : vector<8x2x256xf32> to vector<8x1x256xf32>
    %93 = vector.shape_cast %92 : vector<8x1x256xf32> to vector<8x256xf32>
    %94 = vector.extract_strided_slice %91 {offsets = [0, 1, 0], sizes = [8, 1, 256], strides = [1, 1, 1]} : vector<8x2x256xf32> to vector<8x1x256xf32>
    %95 = vector.shape_cast %94 : vector<8x1x256xf32> to vector<8x256xf32>
    %96 = arith.maximumf %93, %95 : vector<8x256xf32>
    %97 = vector.shape_cast %96 : vector<8x256xf32> to vector<2x2x2x256xf32>
    %98 = vector.extract_strided_slice %97 {offsets = [0, 0, 0, 0], sizes = [2, 1, 2, 256], strides = [1, 1, 1, 1]} : vector<2x2x2x256xf32> to vector<2x1x2x256xf32>
    %99 = vector.shape_cast %98 : vector<2x1x2x256xf32> to vector<2x2x256xf32>
    %100 = vector.extract_strided_slice %97 {offsets = [0, 1, 0, 0], sizes = [2, 1, 2, 256], strides = [1, 1, 1, 1]} : vector<2x2x2x256xf32> to vector<2x1x2x256xf32>
    %101 = vector.shape_cast %100 : vector<2x1x2x256xf32> to vector<2x2x256xf32>
    %102 = arith.maximumf %99, %101 : vector<2x2x256xf32>
    %103 = vector.shape_cast %102 : vector<2x2x256xf32> to vector<1x2x2x256xf32>
    %104 = arith.truncf %103 : vector<1x2x2x256xf32> to vector<1x2x2x256xbf16>
    %cst_135 = arith.constant 0.000000e+00 : bf16
    %105 = vector.broadcast %cst_135 : bf16 to vector<1x1x4x256xbf16>
    %c0_136 = arith.constant 0 : index
    %c0_137 = arith.constant 0 : index
    %c0_138 = arith.constant 0 : index
    %c0_139 = arith.constant 0 : index
    %106 = vector.load %arg15[%c0_136, %c0_137, %c0_138, %c0_139] : memref<1x4x4x256xbf16, #tpu.memory_space<vmem>>, vector<1x1x4x256xbf16>
    tpu.vector_store %arg15[%c0_136, %c0_137, %c0_138, %c0_139], %105 {strides = array<i32>} : memref<1x4x4x256xbf16, #tpu.memory_space<vmem>>, vector<1x1x4x256xbf16>,
    %cst_140 = arith.constant 0.000000e+00 : bf16
    %107 = vector.broadcast %cst_140 : bf16 to vector<1x1x4x256xbf16>
    %c0_141 = arith.constant 0 : index
    %c3 = arith.constant 3 : index
    %c0_142 = arith.constant 0 : index
    %c0_143 = arith.constant 0 : index
    %108 = vector.load %arg15[%c0_141, %c3, %c0_142, %c0_143] : memref<1x4x4x256xbf16, #tpu.memory_space<vmem>>, vector<1x1x4x256xbf16>
    tpu.vector_store %arg15[%c0_141, %c3, %c0_142, %c0_143], %107 {strides = array<i32>} : memref<1x4x4x256xbf16, #tpu.memory_space<vmem>>, vector<1x1x4x256xbf16>,
    %cst_144 = arith.constant 0.000000e+00 : bf16
    %109 = vector.broadcast %cst_144 : bf16 to vector<1x2x1x256xbf16>
    %c0_145 = arith.constant 0 : index
    %c1_146 = arith.constant 1 : index
    %c0_147 = arith.constant 0 : index
    %c0_148 = arith.constant 0 : index
    %110 = vector.load %arg15[%c0_145, %c1_146, %c0_147, %c0_148] : memref<1x4x4x256xbf16, #tpu.memory_space<vmem>>, vector<1x2x1x256xbf16>
    tpu.vector_store %arg15[%c0_145, %c1_146, %c0_147, %c0_148], %109 {strides = array<i32>} : memref<1x4x4x256xbf16, #tpu.memory_space<vmem>>, vector<1x2x1x256xbf16>,
    %cst_149 = arith.constant 0.000000e+00 : bf16
    %111 = vector.broadcast %cst_149 : bf16 to vector<1x2x1x256xbf16>
    %c0_150 = arith.constant 0 : index
    %c1_151 = arith.constant 1 : index
    %c3_152 = arith.constant 3 : index
    %c0_153 = arith.constant 0 : index
    %112 = vector.load %arg15[%c0_150, %c1_151, %c3_152, %c0_153] : memref<1x4x4x256xbf16, #tpu.memory_space<vmem>>, vector<1x2x1x256xbf16>
    tpu.vector_store %arg15[%c0_150, %c1_151, %c3_152, %c0_153], %111 {strides = array<i32>} : memref<1x4x4x256xbf16, #tpu.memory_space<vmem>>, vector<1x2x1x256xbf16>,
    %c0_154 = arith.constant 0 : index
    %c1_155 = arith.constant 1 : index
    %c1_156 = arith.constant 1 : index
    %c0_157 = arith.constant 0 : index
    %113 = vector.load %arg15[%c0_154, %c1_155, %c1_156, %c0_157] : memref<1x4x4x256xbf16, #tpu.memory_space<vmem>>, vector<1x2x2x256xbf16>
    tpu.vector_store %arg15[%c0_154, %c1_155, %c1_156, %c0_157], %104 {strides = array<i32>} : memref<1x4x4x256xbf16, #tpu.memory_space<vmem>>, vector<1x2x2x256xbf16>,
    %c0_158 = arith.constant 0 : index
    %c0_159 = arith.constant 0 : index
    %c0_160 = arith.constant 0 : index
    %c0_161 = arith.constant 0 : index
    %114 = vector.load %arg15[%c0_158, %c0_159, %c0_160, %c0_161] : memref<1x4x4x256xbf16, #tpu.memory_space<vmem>>, vector<1x2x2x256xbf16>
    %c0_162 = arith.constant 0 : index
    %c0_163 = arith.constant 0 : index
    %c1_164 = arith.constant 1 : index
    %c0_165 = arith.constant 0 : index
    %115 = vector.load %arg15[%c0_162, %c0_163, %c1_164, %c0_165] : memref<1x4x4x256xbf16, #tpu.memory_space<vmem>>, vector<1x2x2x256xbf16>
    %c0_166 = arith.constant 0 : index
    %c0_167 = arith.constant 0 : index
    %c2_168 = arith.constant 2 : index
    %c0_169 = arith.constant 0 : index
    %116 = vector.load %arg15[%c0_166, %c0_167, %c2_168, %c0_169] : memref<1x4x4x256xbf16, #tpu.memory_space<vmem>>, vector<1x2x2x256xbf16>
    %c0_170 = arith.constant 0 : index
    %c1_171 = arith.constant 1 : index
    %c0_172 = arith.constant 0 : index
    %c0_173 = arith.constant 0 : index
    %117 = vector.load %arg15[%c0_170, %c1_171, %c0_172, %c0_173] : memref<1x4x4x256xbf16, #tpu.memory_space<vmem>>, vector<1x2x2x256xbf16>
    %c0_174 = arith.constant 0 : index
    %c1_175 = arith.constant 1 : index
    %c1_176 = arith.constant 1 : index
    %c0_177 = arith.constant 0 : index
    %118 = vector.load %arg15[%c0_174, %c1_175, %c1_176, %c0_177] : memref<1x4x4x256xbf16, #tpu.memory_space<vmem>>, vector<1x2x2x256xbf16>
    %c0_178 = arith.constant 0 : index
    %c1_179 = arith.constant 1 : index
    %c2_180 = arith.constant 2 : index
    %c0_181 = arith.constant 0 : index
    %119 = vector.load %arg15[%c0_178, %c1_179, %c2_180, %c0_181] : memref<1x4x4x256xbf16, #tpu.memory_space<vmem>>, vector<1x2x2x256xbf16>
    %c0_182 = arith.constant 0 : index
    %c2_183 = arith.constant 2 : index
    %c0_184 = arith.constant 0 : index
    %c0_185 = arith.constant 0 : index
    %120 = vector.load %arg15[%c0_182, %c2_183, %c0_184, %c0_185] : memref<1x4x4x256xbf16, #tpu.memory_space<vmem>>, vector<1x2x2x256xbf16>
    %c0_186 = arith.constant 0 : index
    %c2_187 = arith.constant 2 : index
    %c1_188 = arith.constant 1 : index
    %c0_189 = arith.constant 0 : index
    %121 = vector.load %arg15[%c0_186, %c2_187, %c1_188, %c0_189] : memref<1x4x4x256xbf16, #tpu.memory_space<vmem>>, vector<1x2x2x256xbf16>
    %c0_190 = arith.constant 0 : index
    %c2_191 = arith.constant 2 : index
    %c2_192 = arith.constant 2 : index
    %c0_193 = arith.constant 0 : index
    %122 = vector.load %arg15[%c0_190, %c2_191, %c2_192, %c0_193] : memref<1x4x4x256xbf16, #tpu.memory_space<vmem>>, vector<1x2x2x256xbf16>
    %123 = tpu.concatenate %114, %115, %116, %117, %118, %119, %120, %121, %122 in 3 : vector<1x2x2x256xbf16>, vector<1x2x2x256xbf16>, vector<1x2x2x256xbf16>, vector<1x2x2x256xbf16>, vector<1x2x2x256xbf16>, vector<1x2x2x256xbf16>, vector<1x2x2x256xbf16>, vector<1x2x2x256xbf16>, vector<1x2x2x256xbf16> -> vector<1x2x2x2304xbf16>
    %124 = vector.shape_cast %123 : vector<1x2x2x2304xbf16> to vector<4x2304xbf16>
    %c0_194 = arith.constant 0 : index
    %c0_195 = arith.constant 0 : index
    %125 = vector.load %arg8[%c0_194, %c0_195] : memref<2304x256xbf16, #tpu.memory_space<vmem>>, vector<2304x256xbf16>
    %cst_196 = arith.constant dense<0.000000e+00> : vector<4x256xf32>
    %126 = tpu.matmul %124, %125, %cst_196 {dimension_numbers = #tpu.dot_dimension_numbers<[1], [0], [0], [1], [0, 0, 1, 1], [], []>} : vector<4x2304xbf16>, vector<2304x256xbf16>, vector<4x256xf32> -> vector<4x256xf32>
    %c0_197 = arith.constant 0 : index
    %c0_198 = arith.constant 0 : index
    %127 = vector.load %arg9[%c0_197, %c0_198] : memref<1x256xf32, #tpu.memory_space<vmem>>, vector<1x256xf32>
    %128 = vector.broadcast %127 : vector<1x256xf32> to vector<4x256xf32>
    %129 = arith.addf %126, %128 : vector<4x256xf32>
    %cst_199 = arith.constant 0.000000e+00 : f32
    %130 = vector.broadcast %cst_199 : f32 to vector<4x256xf32>
    %131 = arith.maximumf %129, %130 : vector<4x256xf32>
    %132 = vector.shape_cast %131 : vector<4x256xf32> to vector<2x2x256xf32>
    %133 = vector.extract_strided_slice %132 {offsets = [0, 0, 0], sizes = [2, 1, 256], strides = [1, 1, 1]} : vector<2x2x256xf32> to vector<2x1x256xf32>
    %134 = vector.shape_cast %133 : vector<2x1x256xf32> to vector<2x256xf32>
    %135 = vector.extract_strided_slice %132 {offsets = [0, 1, 0], sizes = [2, 1, 256], strides = [1, 1, 1]} : vector<2x2x256xf32> to vector<2x1x256xf32>
    %136 = vector.shape_cast %135 : vector<2x1x256xf32> to vector<2x256xf32>
    %137 = arith.maximumf %134, %136 : vector<2x256xf32>
    %138 = vector.shape_cast %137 : vector<2x256xf32> to vector<1x2x1x256xf32>
    %139 = vector.extract_strided_slice %138 {offsets = [0, 0, 0, 0], sizes = [1, 1, 1, 256], strides = [1, 1, 1, 1]} : vector<1x2x1x256xf32> to vector<1x1x1x256xf32>
    %140 = vector.shape_cast %139 : vector<1x1x1x256xf32> to vector<1x1x256xf32>
    %141 = vector.extract_strided_slice %138 {offsets = [0, 1, 0, 0], sizes = [1, 1, 1, 256], strides = [1, 1, 1, 1]} : vector<1x2x1x256xf32> to vector<1x1x1x256xf32>
    %142 = vector.shape_cast %141 : vector<1x1x1x256xf32> to vector<1x1x256xf32>
    %143 = arith.maximumf %140, %142 : vector<1x1x256xf32>
    %144 = vector.shape_cast %143 : vector<1x1x256xf32> to vector<1x1x1x256xf32>
    %145 = vector.shape_cast %144 : vector<1x1x1x256xf32> to vector<1x256xf32>
    %146 = arith.truncf %145 : vector<1x256xf32> to vector<1x256xbf16>
    %c0_200 = arith.constant 0 : index
    %c0_201 = arith.constant 0 : index
    %147 = vector.load %arg10[%c0_200, %c0_201] : memref<256x64xbf16, #tpu.memory_space<vmem>>, vector<256x64xbf16>
    %cst_202 = arith.constant dense<0.000000e+00> : vector<1x64xf32>
    %148 = tpu.matmul %146, %147, %cst_202 {dimension_numbers = #tpu.dot_dimension_numbers<[1], [0], [0], [1], [0, 0, 1, 1], [], []>} : vector<1x256xbf16>, vector<256x64xbf16>, vector<1x64xf32> -> vector<1x64xf32>
    %c0_203 = arith.constant 0 : index
    %c0_204 = arith.constant 0 : index
    %149 = vector.load %arg11[%c0_203, %c0_204] : memref<1x64xf32, #tpu.memory_space<vmem>>, vector<1x64xf32>
    %150 = arith.addf %148, %149 : vector<1x64xf32>
    %151 = vector.shape_cast %150 : vector<1x64xf32> to vector<1x1x64xf32>
    %c0_205 = arith.constant 0 : index
    %c0_206 = arith.constant 0 : index
    %c0_207 = arith.constant 0 : index
    %152 = vector.load %arg12[%c0_205, %c0_206, %c0_207] : memref<1x1x64xf32, #tpu.memory_space<vmem>>, vector<1x1x64xf32>
    tpu.vector_store %arg12[%c0_205, %c0_206, %c0_207], %151 {strides = array<i32>} : memref<1x1x64xf32, #tpu.memory_space<vmem>>, vector<1x1x64xf32>,
    return
  }
  func.func @transform_0(%arg0: i32) -> (i32, i32, i32) {
    %c0_i32 = arith.constant 0 : i32
    %c0_i32_0 = arith.constant 0 : i32
    %c0_i32_1 = arith.constant 0 : i32
    return %arg0, %c0_i32, %c0_i32_0 : i32, i32, i32
  }
  func.func @transform_1(%arg0: i32) -> (i32, i32) {
    %c0_i32 = arith.constant 0 : i32
    %c0_i32_0 = arith.constant 0 : i32
    %c0_i32_1 = arith.constant 0 : i32
    return %c0_i32, %c0_i32_0 : i32, i32
  }
  func.func @transform_2(%arg0: i32) -> (i32, i32) {
    %c0_i32 = arith.constant 0 : i32
    %c0_i32_0 = arith.constant 0 : i32
    %c0_i32_1 = arith.constant 0 : i32
    return %c0_i32, %c0_i32_0 : i32, i32
  }
  func.func @transform_3(%arg0: i32) -> (i32, i32) {
    %c0_i32 = arith.constant 0 : i32
    %c0_i32_0 = arith.constant 0 : i32
    %c0_i32_1 = arith.constant 0 : i32
    return %c0_i32, %c0_i32_0 : i32, i32
  }
  func.func @transform_4(%arg0: i32) -> (i32, i32) {
    %c0_i32 = arith.constant 0 : i32
    %c0_i32_0 = arith.constant 0 : i32
    %c0_i32_1 = arith.constant 0 : i32
    return %c0_i32, %c0_i32_0 : i32, i32
  }
  func.func @transform_5(%arg0: i32) -> (i32, i32) {
    %c0_i32 = arith.constant 0 : i32
    %c0_i32_0 = arith.constant 0 : i32
    %c0_i32_1 = arith.constant 0 : i32
    return %c0_i32, %c0_i32_0 : i32, i32
  }
  func.func @transform_6(%arg0: i32) -> (i32, i32) {
    %c0_i32 = arith.constant 0 : i32
    %c0_i32_0 = arith.constant 0 : i32
    %c0_i32_1 = arith.constant 0 : i32
    return %c0_i32, %c0_i32_0 : i32, i32
  }
  func.func @transform_7(%arg0: i32) -> (i32, i32) {
    %c0_i32 = arith.constant 0 : i32
    %c0_i32_0 = arith.constant 0 : i32
    %c0_i32_1 = arith.constant 0 : i32
    return %c0_i32, %c0_i32_0 : i32, i32
  }
  func.func @transform_8(%arg0: i32) -> (i32, i32) {
    %c0_i32 = arith.constant 0 : i32
    %c0_i32_0 = arith.constant 0 : i32
    %c0_i32_1 = arith.constant 0 : i32
    return %c0_i32, %c0_i32_0 : i32, i32
  }
  func.func @transform_9(%arg0: i32) -> (i32, i32) {
    %c0_i32 = arith.constant 0 : i32
    %c0_i32_0 = arith.constant 0 : i32
    %c0_i32_1 = arith.constant 0 : i32
    return %c0_i32, %c0_i32_0 : i32, i32
  }
  func.func @transform_10(%arg0: i32) -> (i32, i32) {
    %c0_i32 = arith.constant 0 : i32
    %c0_i32_0 = arith.constant 0 : i32
    %c0_i32_1 = arith.constant 0 : i32
    return %c0_i32, %c0_i32_0 : i32, i32
  }
  func.func @transform_11(%arg0: i32) -> (i32, i32, i32) {
    %c0_i32 = arith.constant 0 : i32
    %c0_i32_0 = arith.constant 0 : i32
    %c0_i32_1 = arith.constant 0 : i32
    return %arg0, %c0_i32, %c0_i32_0 : i32, i32, i32
  }
}

</mosaic_0001>

<bundles_post_ra>
// kernel: denoise_encoder_forward.1
= control target key start
LH: loop header
LB: loop body
LE: loop exit
PB: predicated region body
PF: predicated region fallthrough
CT: control target
= control target key end

     0   :  { %s13978_s0 = inlined_call_operand.vmem [shape: bf16[2,256,100], index: 0, kind: input, shape index: {}]   ;;  %s13979_s1 = inlined_call_operand.vmem [shape: bf16[100,64], index: 1, kind: input, shape index: {}]   ;;  %s13980_s2 = inlined_call_operand.vmem [shape: f32[1,64], index: 2, kind: input, shape index: {}]   ;;  %s13981_s3 = inlined_call_operand.vmem [shape: bf16[576,128], index: 3, kind: input, shape index: {}]   ;;  %s13982_s4 = inlined_call_operand.vmem [shape: f32[1,128], index: 4, kind: input, shape index: {}]   ;;  %s13983_s5 = inlined_call_operand.vmem [shape: bf16[1152,256], index: 5, kind: input, shape index: {}]   ;;  %s13984_s6 = inlined_call_operand.vmem [shape: f32[1,256], index: 6, kind: input, shape index: {}]   ;;  %s13985_s7 = inlined_call_operand.vmem [shape: bf16[2304,256], index: 7, kind: input, shape index: {}]   ;;  %s13986_s8 = inlined_call_operand.vmem [shape: f32[1,256], index: 8, kind: input, shape index: {}]   ;;  %s13987_s9 = inlined_call_operand.vmem [shape: bf16[256,64], index: 9, kind: input, shape index: {}]   ;;  %s13988_s10 = inlined_call_operand.vmem [shape: f32[1,64], index: 10, kind: input, shape index: {}]   ;;  %s13989_s11 = inlined_call_operand.hbm [shape: f32[2,1,64], index: 11, kind: output, shape index: {}]  }
   0x1   :  { %13990 = sst [smem:[#allocation8_spill]] %s13978_s0 }
   0x2   :  { %16 = vsyncpa [#allocation6], 0 }
   0x3   :  { %18 = vsyncpa [#allocation6 + $0x1], 0  ;;  %s11459_s17 = smov 0   ;;  %s11461_s18 = smov 0  }
   0x4   :  { %s11463_s19 = smov 0   ;;  %s11465_s20 = smov 0  }
   0x5 LB: > { %s11480_s21 = sadd.s32 4294967295, %s11392_s20   ;;  %s9266_s22 = sadd.s32 4294967294, %s11392_s20   ;;  %s11392_s20 = sphi %s11465_s20, %s14015_s20   ;;  %s11388_s19 = sphi %s11463_s19, %s14014_s19   ;;  %s11384_s18 = sphi %s11461_s18, %s14013_s18   ;;  %s11380_s17 = sphi %s11459_s17, %s14012_s17  }
   0x6   : > { %s11484_s23 = sadd.s32 1, %s11392_s20   ;;  %s267_s24 = sadd.s32 1, %s11388_s19 }
   0x7   : > { %s264_s25 = ssub.s32 %s11392_s20, %s11484_s23  ;;  %p277_p0 = scmp.ne.s32.totalorder %s11388_s19, %s11384_s18 }
   0x8   : > { %p265_p1 = scmp.eq.s32.totalorder %s264_s25, 0  ;;  %p278_p2 = scmp.eq.s32.totalorder %s11480_s21, 1 }
   0x9   : > { %p283_p3 = scmp.ne.s32.totalorder %s11384_s18, %s11380_s17  ;;  %p284_p4 = scmp.eq.s32.totalorder %s9266_s22, 1 }
   0xa   : > { %s11495_s26 = scalar_select %p265_p1, %s11388_s19, %s267_s24  }
   0xb   : > { %p11497_p5 = por %p278_p2, %p277_p0  ;;  %p11501_p6 = por %p284_p4, %p283_p3 }
   0xc   : > { %p9269_p7 = scmp.ge.s32.totalorder %s11392_s20, 1  ;;  %p340_p8 = scmp.lt.s32.totalorder %s11392_s20, 3 }
   0xe   : > { %p341_p9 = pnand %p9269_p7, %p340_p8 }
   0xf   : > { %p379_p10 = scmp.lt.s32.totalorder (!%p341_p9), %s11480_s21, 1  ;;  %s13993_s0 = sld [smem:[#allocation8_spill]] (!%p341_p9) }
  0x10   : > { %344 = sbr.rel (%p341_p9) target bundleno = 1925 (0x785), region = 64  ;;  %s11396_s30 = smov (!%p341_p9), 64  }
  0x11   : > { %s10193_s13 = sshll.u32 (!%p341_p9), %s11480_s21, 4 }
  0x15   : > { %v10524_v0 = vld [vmem:[%s13979_s1 + $0x30] ss:$0 sps:$4 sm:$0x33]   ;;  %vm605_vm0 = vcmask 1041408   ;;  %v10525_v1 = vld [vmem:[%s13979_s1 + $0x28] sm:$0xff]   ;;  %v10526_v3 = vld [vmem:[%s13979_s1 + $0x20] sm:$0xff]   ;;  %v838_v46 = vlaneseq }
  0x16   : > { %10480 = vmatprep.subr.msk.bf16.mxu0 %vm605_vm0, %v10524_v0  ;;  %v607_v2 = vsel %vm605_vm0, %v10524_v0, 0  ;;  %s380_s16 = scalar_select %p379_p10, %s11480_s21, 1  ;;  %v10527_v4 = vld [vmem:[%s13979_s1 + $0x18] sm:$0xff]   ;;  %vm556_vm1 = vcmask 818176   ;;  %v10528_v6 = vld [vmem:[%s13979_s1 + $0x10] sm:$0xff]   ;;  %v10529_v7 = vld [vmem:[%s13979_s1 + $0x8] sm:$0xff]  }
  0x17   : > { %10419 = vmatpush3.bf16.msra.mxu0 %v607_v2  ;;  %v10530_v8 = vld [vmem:[%s13979_s1] sm:$0xff]   ;;  %vm2148_vm2 = vcmask 516096   ;;  %vm2181_vm3 = vsmask.f32 7938  ;;  %v2183_v25 = vld [vmem:[#allocation2 + $0xc] sm:$0x1] }
  0x18   : > { %10420 = vmatprep.subr.bf16.mxu0 %v10525_v1  ;;  %s10196_s22 = sshll.u32 %s380_s16, 7  ;;  %vm11571_vm4 = vmand %vm2148_vm2, %vm2181_vm3  ;;  %vm2146_vm5 = vcmask 519168   ;;  %vm2155_vm6 = vsmask.f32 256  ;;  %v2157_v27 = vld [vmem:[#allocation2 + $0x8] sm:$0x1] }
  0x19   : > { %s11523_s29 = scalar_lea.vmem %s13993_s0, %s10196_s22  ;;  %v2184_v26 = vsel %vm11571_vm4, 0, %v2183_v25  ;;  %v11394_v28 = vmov 0   ;;  %vm11581_vm7 = vmand %vm2148_vm2, %vm2155_vm6  ;;  %v2186_v32 = vld [vmem:[#allocation2 + $0x14] sm:$0x1]  ;;  %v2160_v34 = vld [vmem:[#allocation2 + $0x10] sm:$0x1]  ;;  %s13942_s22 = scalar_lea.hbm %s13989_s11, %s10193_s13 }
  0x1a   : > { %v10531_v5 = vld [vmem:[%s11523_s29] sm:$0xff]   ;;  %v10532_v9 = vld [vmem:[%s11523_s29 + $0x8] sm:$0xff]   ;;  %v10533_v10 = vld [vmem:[%s11523_s29 + $0x10] sm:$0xff]   ;;  %2185 = vst [vmem:[#allocation2 + $0xc] sm:$0x1] %v2184_v26  ;;  %v2158_v30 = vsel %vm11581_vm7, 0, %v2157_v27 }
  0x1b   : > { %10421 = vmatpush3.bf16.msra.mxu0 %v10525_v1  ;;  %10432 = vmatprep.mubr.msk.bf16.mxu0 %vm556_vm1, %v10531_v5  ;;  %v10534_v11 = vld [vmem:[%s11523_s29 + $0x18] sm:$0xff]   ;;  %v10535_v12 = vld [vmem:[%s11523_s29 + $0x20] sm:$0xff]   ;;  %v10536_v13 = vld [vmem:[%s11523_s29 + $0x28] sm:$0xff]   ;;  %2151 = vst.msk [vmem:[#allocation2 + $0x48] sm:$0xf] %vm2146_vm5, %v11394_v28  ;;  %v2187_v33 = vsel %vm11571_vm4, 0, %v2186_v32 }
  0x1c   : > { %10422 = vmatprep.subr.bf16.mxu0 %v10526_v3  ;;  %v10537_v14 = vld [vmem:[%s11523_s29 + $0x30] sm:$0xff]   ;;  %v10538_v15 = vld [vmem:[%s11523_s29 + $0x38] sm:$0xff]   ;;  %v10539_v16 = vld [vmem:[%s11523_s29 + $0x40] sm:$0xff]   ;;  %2147 = vst.msk [vmem:[#allocation2] sm:$0xf] %vm2146_vm5, %v11394_v28  ;;  %v2161_v35 = vsel %vm11581_vm7, 0, %v2160_v34 }
  0x1d   : > { %v10540_v17 = vld [vmem:[%s11523_s29 + $0x48] sm:$0xff]   ;;  %v10541_v18 = vld [vmem:[%s11523_s29 + $0x50] sm:$0xff]   ;;  %v10542_v19 = vld [vmem:[%s11523_s29 + $0x58] sm:$0xff]   ;;  %2149 = vst.msk [vmem:[#allocation2 + $0x4] sm:$0x1] %vm2148_vm2, %v11394_v28  ;;  %v11617_v50 = vshrl.u32 %v838_v46, 7 }
  0x1e   : > { %v10543_v20 = vld [vmem:[%s11523_s29 + $0x60] sm:$0xff]   ;;  %v10544_v21 = vld [vmem:[%s11523_s29 + $0x68] sm:$0xff]   ;;  %v10545_v22 = vld [vmem:[%s11523_s29 + $0x70] sm:$0xff]   ;;  %2152 = vst.msk [vmem:[#allocation2 + $0x4c] sm:$0x1] %vm2148_vm2, %v11394_v28  ;;  %vm2465_vm9 = vcmask 1042434  }
  0x1f   : > { %10423 = vmatpush3.bf16.msra.mxu0 %v10526_v3  ;;  %v10546_v23 = vld [vmem:[%s11523_s29 + $0x78] sm:$0xff]   ;;  %4235 = vst [vmem:[#allocation3] sm:$0x7] %v11394_v28  ;;  %4237 = vst [vmem:[#allocation3 + $0x14] sm:$0x7] %v11394_v28  ;;  %vm2468_vm10 = vcmask 1043459  }
  0x20   : > { %10424 = vmatprep.subr.bf16.mxu0 %v10527_v4  ;;  %6093 = vst [vmem:[#allocation4] sm:$0xf] %v11394_v28  ;;  %6095 = vst [vmem:[#allocation4 + $0xc] sm:$0xf] %v11394_v28  ;;  %v2189_v36 = vld [vmem:[#allocation2 + $0x1c] sm:$0x1] }
  0x21   : > { %2159 = vst [vmem:[#allocation2 + $0x8] sm:$0x1] %v2158_v30  ;;  %vm11599_vm8 = vmand %vm2146_vm5, %vm2181_vm3  ;;  %v2190_v37 = vsel %vm11571_vm4, 0, %v2189_v36  ;;  %v2163_v38 = vld [vmem:[#allocation2 + $0x18] sm:$0x1]  ;;  %vm2471_vm11 = vcmask 1044484  }
  0x22   : > { %2188 = vst [vmem:[#allocation2 + $0x14] sm:$0x1] %v2187_v33  ;;  %2162 = vst [vmem:[#allocation2 + $0x10] sm:$0x1] %v2161_v35  ;;  %v2164_v39 = vsel %vm11581_vm7, 0, %v2163_v38  ;;  %vm2474_vm12 = vcmask 1045509  }
  0x23   : > { %10425 = vmatpush3.bf16.msra.mxu0 %v10527_v4  ;;  %2191 = vst [vmem:[#allocation2 + $0x1c] sm:$0x1] %v2190_v37  ;;  %2165 = vst [vmem:[#allocation2 + $0x18] sm:$0x1] %v2164_v39  ;;  %v2192_v40 = vld [vmem:[#allocation2 + $0x24] sm:$0x1] }
  0x24   : > { %10426 = vmatprep.subr.bf16.mxu0 %v10528_v6  ;;  %v2193_v41 = vsel %vm11571_vm4, 0, %v2192_v40  ;;  %v2166_v42 = vld [vmem:[#allocation2 + $0x20] sm:$0x1]  ;;  %v11395_v44 = vmov 1983009808   ;;  %vm2477_vm13 = vcmask 1046534  }
  0x25   : > { %2194 = vst [vmem:[#allocation2 + $0x24] sm:$0x1] %v2193_v41  ;;  %v2167_v43 = vsel %vm11581_vm7, 0, %v2166_v42  ;;  %v836_v45 = vunpack.c.l.s4 %v11395_v44  ;;  %v2195_v47 = vld [vmem:[#allocation2 + $0x2c] sm:$0x1]  ;;  %vm2480_vm14 = vcmask 1047559  }
  0x26   : > { %2168 = vst [vmem:[#allocation2 + $0x20] sm:$0x1] %v2167_v43  ;;  %v2196_v48 = vsel %vm11571_vm4, 0, %v2195_v47  ;;  %v11622_v51 = vld [vmem:[%s13980_s2] ss:$0 sm:$0xff]  ;;  %vm3184_vm15 = vcmask 523264  }
  0x27   : > { %10427 = vmatpush3.bf16.msra.mxu0 %v10528_v6  ;;  %2197 = vst [vmem:[#allocation2 + $0x2c] sm:$0x1] %v2196_v48  ;;  %v837_v49 = vunpack.c.0.s8 %v836_v45  ;;  %v2169_v52 = vld [vmem:[#allocation2 + $0x28] sm:$0x1]  ;;  %v2655_v55 = vld [vmem:[#allocation2] sm:$0xf] }
  0x28   : > { %10428 = vmatprep.subr.bf16.mxu0 %v10529_v7  ;;  %v2170_v53 = vsel %vm11581_vm7, 0, %v2169_v52  ;;  %v2663_v56 = vld [vmem:[#allocation2 + $0x4] sm:$0x1]  ;;  %vm4254_vm3 = vsmask.f32 7946  ;;  %s11398_s21 = smov [#allocation5]  }
  0x29   : > { %2171 = vst [vmem:[#allocation2 + $0x28] sm:$0x1] %v2170_v53  ;;  %v11628_v58 = vsub.s32 %v837_v49, %v11617_v50  ;;  %v9512_v59 = vcombine.low %v2655_v55, %v2663_v56  ;;  %vm12228_vm5 = vmand %vm2465_vm9, %vm4254_vm3  ;;  %s11336_s29 = sshll.u32 %s11398_s21, 4  ;;  %s11337_s29 = int_to_ptr.vmem [resolvable:$false] %s11336_s29 }
  0x2a   : > { %s11338_s12 = scalar_lea.vmem %s11337_s29, 32 }
  0x2b   : > { %10429 = vmatpush3.bf16.msra.mxu0 %v10529_v7  ;;  %v2771_v63 = vshll.u32 %v9512_v59, 16  ;;  %v2769_v6 = vshrl.u32 %v9512_v59, 16 }
  0x2c   : > { %10430 = vmatprep.subr.bf16.mxu0 %v10530_v8 }
  0x2d   : > { %v2773_v7 = vrot.slane %v2771_v63, 1 }
  0x2f   : > { %10431 = vmatpush3.bf16.msra.mxu0 %v10530_v8 }
  0x32   : > { %10433 = vmatmul.mubr.msk.bf16.vlgmr.msra.gmra.mxu0 %vm556_vm1, %v10532_v9 }
  0x33   : > { %10436 = vmatprep.mubr.msk.bf16.mxu0 %vm556_vm1, %v10533_v10 }
  0x3a   : > { %10437 = vmatmul.mubr.msk.bf16.gmra.mxu0 %vm556_vm1, %v10534_v11 }
  0x3b   : > { %10440 = vmatprep.mubr.msk.bf16.mxu0 %vm556_vm1, %v10535_v12 }
  0x42   : > { %10441 = vmatmul.mubr.msk.bf16.gmra.mxu0 %vm556_vm1, %v10536_v13 }
  0x43   : > { %10444 = vmatprep.mubr.msk.bf16.mxu0 %vm556_vm1, %v10537_v14 }
  0x4a   : > { %10445 = vmatmul.mubr.msk.bf16.gmra.mxu0 %vm556_vm1, %v10538_v15  ;;  %v2774_v15 = vor.u32 %v2773_v7, %v2769_v6 }
  0x4b   : > { %10448 = vmatprep.mubr.msk.bf16.mxu0 %vm556_vm1, %v10539_v16 }
  0x4c   : > { %2824 = vrot.lane.b32.xlu1 %v2774_v15, %s11396_s30 }
  0x52   : > { %10449 = vmatmul.mubr.msk.bf16.gmra.mxu0 %vm556_vm1, %v10540_v17 }
  0x53   : > { %10452 = vmatprep.mubr.msk.bf16.mxu0 %vm556_vm1, %v10541_v18 }
  0x5a   : > { %10453 = vmatmul.mubr.msk.bf16.gmra.mxu0 %vm556_vm1, %v10542_v19 }
  0x5b   : > { %10456 = vmatprep.mubr.msk.bf16.mxu0 %vm556_vm1, %v10543_v20 }
  0x62   : > { %10457 = vmatmul.mubr.msk.bf16.gmra.mxu0 %vm556_vm1, %v10544_v21 }
  0x63   : > { %10460 = vmatprep.mubr.msk.bf16.mxu0 %vm556_vm1, %v10545_v22 }
  0x6a   : > { %10461 = vmatmul.mubr.msk.bf16.gmra.mxu0 %vm556_vm1, %v10546_v23  ;;  %vm4239_vm1 = vcmask 1040384  }
  0xf2   : > { %v10434_v54 = vpop.f32.mrf.mxu0 }
  0xf3   : > { %v652_v57 = vadd.f32 %v10434_v54, %v11622_v51 }
  0xf4   : > { %v643_v60 = vpop.f32.mrf.mxu0 }
  0xf5   : > { %v772_v61 = vmax.f32 %v652_v57, 0.0  ;;  %v644_v62 = vadd.f32 %v11622_v51, %v643_v60 }
  0xf6   : > { %v10435_v0 = vpop.f32.mrf.mxu0 }
  0xf7   : > { %v868_v1 = vcombine.high %v772_v61, %v772_v61  ;;  %v875_v2 = vrot.slane %v772_v61, %v11628_v58  ;;  %v770_v3 = vmax.f32 %v644_v62, 0.0  ;;  %v655_v4 = vadd.f32 %v10435_v0, %v11622_v51 }
  0xf8   : > { %v646_v5 = vpop.f32.mrf.mxu0 }
  0xf9   : > { %v882_v8 = vrot.slane %v868_v1, %v11628_v58  ;;  %v883_v9 = vcombine.high %v875_v2, %v875_v2  ;;  %v9320_v10 = vrot.slane %v875_v2, 9  ;;  %v834_v11 = vcombine.high %v770_v3, %v770_v3 }
  0xfa   : > { %v841_v12 = vrot.slane %v770_v3, %v11628_v58  ;;  %v773_v13 = vmax.f32 %v655_v4, 0.0  ;;  %v647_v14 = vadd.f32 %v11622_v51, %v646_v5  ;;  %v10438_v36 = vpop.f32.mrf.mxu0 }
  0xfb   : > { %v884_v16 = vcombine.high %v882_v8, %v882_v8  ;;  %v9321_v17 = vrot.slane %v883_v9, 9  ;;  %v9322_v18 = vrot.slane %v882_v8, 9  ;;  %v1898_v19 = vmax.f32 %v875_v2, %v9320_v10 }
  0xfc   : > { %v848_v20 = vrot.slane %v834_v11, %v11628_v58  ;;  %v849_v21 = vcombine.high %v841_v12, %v841_v12  ;;  %v9312_v22 = vrot.slane %v841_v12, 9  ;;  %v885_v23 = vcombine.high %v773_v13, %v773_v13  ;;  %v659_v55 = vpop.f32.mrf.mxu0 }
  0xfd   : > { %v9323_v25 = vrot.slane %v884_v16, 9  ;;  %v1899_v26 = vmax.f32 %v883_v9, %v9321_v17  ;;  %v1900_v27 = vmax.f32 %v882_v8, %v9322_v18  ;;  %v892_v30 = vrot.slane %v773_v13, %v11628_v58 }
  0xfe   : > { %v850_v32 = vcombine.high %v848_v20, %v848_v20  ;;  %v9313_v33 = vrot.slane %v849_v21, 9  ;;  %v9314_v34 = vrot.slane %v848_v20, 9  ;;  %v1890_v35 = vmax.f32 %v841_v12, %v9312_v22  ;;  %v10439_v9 = vpop.f32.mrf.mxu0 }
  0xff   : > { %v1901_v37 = vmax.f32 %v884_v16, %v9323_v25  ;;  %v899_v38 = vrot.slane %v885_v23, %v11628_v58  ;;  %v900_v39 = vcombine.high %v892_v30, %v892_v30  ;;  %v9324_v40 = vrot.slane %v892_v30, 9 }
 0x100   : > { %v9315_v41 = vrot.slane %v850_v32, 9  ;;  %v1891_v42 = vmax.f32 %v849_v21, %v9313_v33  ;;  %v1892_v43 = vmax.f32 %v848_v20, %v9314_v34  ;;  %v2018_v44 = vmax.f32 %v1890_v35, %v1898_v19 }
 0x101   : > { %v901_v45 = vcombine.high %v899_v38, %v899_v38  ;;  %v9325_v46 = vrot.slane %v900_v39, 9  ;;  %v9326_v47 = vrot.slane %v899_v38, 9  ;;  %v1902_v48 = vmax.f32 %v892_v30, %v9324_v40 }
 0x102   : > { %v1893_v49 = vmax.f32 %v850_v32, %v9315_v41  ;;  %v2019_v52 = vmax.f32 %v1891_v42, %v1899_v26  ;;  %v2020_v53 = vmax.f32 %v1892_v43, %v1900_v27  ;;  %v10197_v54 = vpack.c.bf16 %v2018_v44, %v2018_v44  ;;  %v662_v27 = vpop.f32.mrf.mxu0 }
 0x103   : > { %v9327_v56 = vrot.slane %v901_v45, 9  ;;  %v1903_v57 = vmax.f32 %v900_v39, %v9325_v46  ;;  %v1904_v59 = vmax.f32 %v899_v38, %v9326_v47  ;;  %v771_v60 = vmax.f32 %v647_v14, 0.0 }
 0x104   : > { %v2021_v61 = vmax.f32 %v1893_v49, %v1901_v37  ;;  %v10198_v62 = vpack.c.bf16 %v2019_v52, %v2019_v52  ;;  %v10199_v63 = vpack.c.bf16 %v2020_v53, %v2020_v53  ;;  %v2399_v0 = vunpack.c.l.b16 %v10197_v54  ;;  %v10442_v47 = vpop.f32.mrf.mxu0 }
 0x105   : > { %v1905_v1 = vmax.f32 %v901_v45, %v9327_v56  ;;  %v851_v2 = vcombine.high %v771_v60, %v771_v60  ;;  %v858_v3 = vrot.slane %v771_v60, %v11628_v58  ;;  %v668_v4 = vadd.f32 %v10438_v36, %v11622_v51 }
 0x106   : > { %v10200_v5 = vpack.c.bf16 %v2021_v61, %v2021_v61  ;;  %v2400_v6 = vunpack.c.l.b16 %v10198_v62  ;;  %v2401_v7 = vunpack.c.l.b16 %v10199_v63  ;;  %v2463_v8 = vrot.slane %v2399_v0, 7 }
 0x107   : > { %v865_v10 = vrot.slane %v851_v2, %v11628_v58  ;;  %v866_v11 = vcombine.high %v858_v3, %v858_v3  ;;  %v9316_v12 = vrot.slane %v858_v3, 9  ;;  %v776_v13 = vmax.f32 %v668_v4, 0.0 }
 0x108   : > { %v2402_v14 = vunpack.c.l.b16 %v10200_v5  ;;  %v2464_v15 = vrot.slane %v2400_v6, 6  ;;  %v2467_v16 = vrot.slane %v2401_v7, 5  ;;  %v660_v17 = vadd.f32 %v11622_v51, %v659_v55  ;;  %v675_v5 = vpop.f32.mrf.mxu0 }
 0x109   : > { %v867_v18 = vcombine.high %v865_v10, %v865_v10  ;;  %v9317_v19 = vrot.slane %v866_v11, 9  ;;  %v9318_v20 = vrot.slane %v865_v10, 9  ;;  %v1894_v21 = vmax.f32 %v858_v3, %v9316_v12 }
 0x10a   : > { %v2466_v22 = vsel %vm2465_vm9, %v2464_v15, %v2463_v8  ;;  %v2470_v23 = vrot.slane %v2402_v14, 4  ;;  %v936_v25 = vcombine.high %v776_v13, %v776_v13  ;;  %v943_v26 = vrot.slane %v776_v13, %v11628_v58 }
 0x10b   : > { %v2469_v30 = vsel %vm2468_vm10, %v2467_v16, %v2466_v22  ;;  %v9319_v32 = vrot.slane %v867_v18, 9  ;;  %v1895_v33 = vmax.f32 %v866_v11, %v9317_v19  ;;  %v1896_v34 = vmax.f32 %v865_v10, %v9318_v20 }
 0x10c   : > { %v2022_v35 = vmax.f32 %v1894_v21, %v1902_v48  ;;  %v2472_v36 = vsel %vm2471_vm11, %v2470_v23, %v2469_v30  ;;  %v950_v37 = vrot.slane %v936_v25, %v11628_v58  ;;  %v951_v38 = vcombine.high %v943_v26, %v943_v26  ;;  %v2610_v48 = vld [vmem:[#allocation2 + $0xc] sm:$0x1] }
 0x10d   : > { %v1897_v39 = vmax.f32 %v867_v18, %v9319_v32  ;;  %v2023_v40 = vmax.f32 %v1895_v33, %v1903_v57  ;;  %v2024_v41 = vmax.f32 %v1896_v34, %v1904_v59  ;;  %v9336_v42 = vrot.slane %v943_v26, 9  ;;  %v2607_v18 = vld [vmem:[#allocation2 + $0x8] sm:$0xf] }
 0x10e   : > { %v10201_v43 = vpack.c.bf16 %v2022_v35, %v2022_v35  ;;  %v952_v44 = vcombine.high %v950_v37, %v950_v37  ;;  %v9337_v45 = vrot.slane %v951_v38, 9  ;;  %v9338_v46 = vrot.slane %v950_v37, 9 }
 0x10f   : > { %v2025_v49 = vmax.f32 %v1897_v39, %v1905_v1  ;;  %v10202_v52 = vpack.c.bf16 %v2023_v40, %v2023_v40  ;;  %v10203_v53 = vpack.c.bf16 %v2024_v41, %v2024_v41  ;;  %v1914_v54 = vmax.f32 %v943_v26, %v9336_v42 }
 0x110   : > { %v2403_v55 = vunpack.c.l.b16 %v10201_v43  ;;  %v9339_v56 = vrot.slane %v952_v44, 9  ;;  %v1915_v60 = vmax.f32 %v951_v38, %v9337_v45  ;;  %v1916_v61 = vmax.f32 %v950_v37, %v9338_v46  ;;  %v11666_v46 = vpop.f32.mrf.mxu0 }
 0x111   : > { %v2404_v62 = vunpack.c.l.b16 %v10202_v52  ;;  %v2405_v63 = vunpack.c.l.b16 %v10203_v53  ;;  %v10261_v0 = vpack.c.bf16 %v2025_v49, %v2025_v49  ;;  %v774_v57 = vmax.f32 %v660_v17, 0.0 }
 0x112   : > { %v2473_v59 = vrot.slane %v2403_v55, 3  ;;  %v1917_v2 = vmax.f32 %v952_v44, %v9339_v56  ;;  %v671_v3 = vadd.f32 %v10439_v9, %v11622_v51  ;;  %v663_v4 = vadd.f32 %v11622_v51, %v662_v27 }
 0x113   : > { %v2476_v1 = vrot.slane %v2404_v62, 2  ;;  %v2479_v6 = vrot.slane %v2405_v63, 1  ;;  %v2611_v7 = vsel %vm11581_vm7, %v10261_v0, %v2610_v48  ;;  %v902_v8 = vcombine.high %v774_v57, %v774_v57 }
 0x114   : > { %v2475_v10 = vsel %vm2474_vm12, %v2473_v59, %v2472_v36  ;;  %2612 = vst [vmem:[#allocation2 + $0xc] sm:$0x1] %v2611_v7  ;;  %v909_v11 = vrot.slane %v774_v57, %v11628_v58  ;;  %v777_v12 = vmax.f32 %v671_v3, 0.0  ;;  %v775_v13 = vmax.f32 %v663_v4, 0.0 }
 0x115   : > { %v2478_v14 = vsel %vm2477_vm13, %v2476_v1, %v2475_v10  ;;  %v916_v9 = vrot.slane %v902_v8, %v11628_v58  ;;  %v684_v15 = vadd.f32 %v10442_v47, %v11622_v51  ;;  %v11659_v16 = vadd.f32 %v11622_v51, %v675_v5  ;;  %v678_v5 = vpop.f32.mrf.mxu0 }
 0x116   : > { %v2481_v17 = vsel %vm2480_vm14, %v2479_v6, %v2478_v14  ;;  %v917_v19 = vcombine.high %v909_v11, %v909_v11  ;;  %v9328_v20 = vrot.slane %v909_v11, 9  ;;  %v953_v21 = vcombine.high %v777_v12, %v777_v12 }
 0x117   : > { %v2573_v22 = vpack.c.b16 %v2481_v17, %v2481_v17  ;;  %v918_v23 = vcombine.high %v916_v9, %v916_v9  ;;  %v9330_v25 = vrot.slane %v916_v9, 9  ;;  %v960_v26 = vrot.slane %v777_v12, %v11628_v58 }
 0x118   : > { %v9329_v27 = vrot.slane %v917_v19, 9  ;;  %v1906_v30 = vmax.f32 %v909_v11, %v9328_v20  ;;  %v967_v32 = vrot.slane %v953_v21, %v11628_v58  ;;  %v919_v33 = vcombine.high %v775_v13, %v775_v13  ;;  %v10446_v21 = vpop.f32.mrf.mxu0 }
 0x119   : > { %v2608_v34 = vsel %vm11599_vm8, %v2573_v22, %v2607_v18  ;;  %v9331_v35 = vrot.slane %v918_v23, 9  ;;  %v1908_v36 = vmax.f32 %v916_v9, %v9330_v25  ;;  %v968_v37 = vcombine.high %v960_v26, %v960_v26 }
 0x11a   : > { %2609 = vst [vmem:[#allocation2 + $0x8] sm:$0xf] %v2608_v34  ;;  %v1907_v38 = vmax.f32 %v917_v19, %v9329_v27  ;;  %v2026_v39 = vmax.f32 %v1906_v30, %v1914_v54  ;;  %v969_v40 = vcombine.high %v967_v32, %v967_v32  ;;  %v9340_v41 = vrot.slane %v960_v26, 9 }
 0x11b   : > { %v1909_v42 = vmax.f32 %v918_v23, %v9331_v35  ;;  %v2028_v43 = vmax.f32 %v1908_v36, %v1916_v61  ;;  %v9341_v44 = vrot.slane %v968_v37, 9  ;;  %v9342_v45 = vrot.slane %v967_v32, 9 }
 0x11c   : > { %v2027_v47 = vmax.f32 %v1907_v38, %v1915_v60  ;;  %v10205_v49 = vpack.c.bf16 %v2026_v39, %v2026_v39  ;;  %v9343_v52 = vrot.slane %v969_v40, 9  ;;  %v1918_v53 = vmax.f32 %v960_v26, %v9340_v41  ;;  %v691_v41 = vpop.f32.mrf.mxu0 }
 0x11d   : > { %v2029_v55 = vmax.f32 %v1909_v42, %v1917_v2  ;;  %v10207_v48 = vpack.c.bf16 %v2028_v43, %v2028_v43  ;;  %v1919_v56 = vmax.f32 %v968_v37, %v9341_v44  ;;  %v1920_v62 = vmax.f32 %v967_v32, %v9342_v45  ;;  %v2616_v44 = vld [vmem:[#allocation2 + $0x14] sm:$0x1] }
 0x11e   : > { %v10206_v63 = vpack.c.bf16 %v2027_v47, %v2027_v47  ;;  %v2407_v0 = vunpack.c.l.b16 %v10205_v49  ;;  %v1921_v57 = vmax.f32 %v969_v40, %v9343_v52  ;;  %v926_v54 = vrot.slane %v775_v13, %v11628_v58 }
 0x11f   : > { %v10208_v59 = vpack.c.bf16 %v2029_v55, %v2029_v55  ;;  %v2409_v3 = vunpack.c.l.b16 %v10207_v48  ;;  %v933_v61 = vrot.slane %v919_v33, %v11628_v58  ;;  %v780_v4 = vmax.f32 %v684_v15, 0.0 }
 0x120   : > { %v2408_v1 = vunpack.c.l.b16 %v10206_v63  ;;  %v2482_v60 = vrot.slane %v2407_v0, 7  ;;  %v934_v6 = vcombine.high %v926_v54, %v926_v54  ;;  %v9332_v7 = vrot.slane %v926_v54, 9 }
 0x121   : > { %v2410_v8 = vunpack.c.l.b16 %v10208_v59  ;;  %v2485_v2 = vrot.slane %v2409_v3, 5  ;;  %v935_v10 = vcombine.high %v933_v61, %v933_v61  ;;  %v9334_v11 = vrot.slane %v933_v61, 9  ;;  %v10447_v3 = vpop.f32.mrf.mxu0 }
 0x122   : > { %v2483_v12 = vrot.slane %v2408_v1, 6  ;;  %v9333_v14 = vrot.slane %v934_v6, 9  ;;  %v1910_v9 = vmax.f32 %v926_v54, %v9332_v7  ;;  %v1004_v17 = vcombine.high %v780_v4, %v780_v4 }
 0x123   : > { %v2487_v18 = vrot.slane %v2410_v8, 4  ;;  %v9335_v13 = vrot.slane %v935_v10, 9  ;;  %v1912_v19 = vmax.f32 %v933_v61, %v9334_v11  ;;  %v1011_v20 = vrot.slane %v780_v4, %v11628_v58 }
 0x124   : > { %v2484_v15 = vsel %vm2465_vm9, %v2483_v12, %v2482_v60  ;;  %v1911_v22 = vmax.f32 %v934_v6, %v9333_v14  ;;  %v2030_v23 = vmax.f32 %v1910_v9, %v1918_v53  ;;  %v1018_v25 = vrot.slane %v1004_v17, %v11628_v58 }
 0x125   : > { %v2486_v26 = vsel %vm2468_vm10, %v2485_v2, %v2484_v15  ;;  %v1913_v27 = vmax.f32 %v935_v10, %v9335_v13  ;;  %v2032_v30 = vmax.f32 %v1912_v19, %v1920_v62  ;;  %v1019_v32 = vcombine.high %v1011_v20, %v1011_v20 }
 0x126   : > { %v2031_v33 = vmax.f32 %v1911_v22, %v1919_v56  ;;  %v10209_v34 = vpack.c.bf16 %v2030_v23, %v2030_v23  ;;  %v2488_v35 = vsel %vm2471_vm11, %v2487_v18, %v2486_v26  ;;  %v1020_v36 = vcombine.high %v1018_v25, %v1018_v25 }
 0x127   : > { %v2033_v37 = vmax.f32 %v1913_v27, %v1921_v57  ;;  %v10211_v38 = vpack.c.bf16 %v2032_v30, %v2032_v30  ;;  %v9352_v39 = vrot.slane %v1011_v20, 9  ;;  %v9353_v40 = vrot.slane %v1019_v32, 9 }
 0x128   : > { %v10210_v42 = vpack.c.bf16 %v2031_v33, %v2031_v33  ;;  %v2411_v43 = vunpack.c.l.b16 %v10209_v34  ;;  %v9354_v45 = vrot.slane %v1018_v25, 9  ;;  %v9355_v47 = vrot.slane %v1020_v36, 9 }
 0x129   : > { %v2413_v49 = vunpack.c.l.b16 %v10211_v38  ;;  %v10262_v52 = vpack.c.bf16 %v2033_v37, %v2033_v37  ;;  %v1930_v53 = vmax.f32 %v1011_v20, %v9352_v39  ;;  %v1931_v55 = vmax.f32 %v1019_v32, %v9353_v40 }
 0x12a   : > { %v2412_v48 = vunpack.c.l.b16 %v10210_v42  ;;  %v2489_v56 = vrot.slane %v2411_v43, 3  ;;  %v1932_v62 = vmax.f32 %v1018_v25, %v9354_v45  ;;  %v1933_v63 = vmax.f32 %v1020_v36, %v9355_v47  ;;  %v10553_v25 = vld [vmem:[%s13981_s3 + $0x118] sm:$0xff]  }
 0x12b   : > { %v2493_v0 = vrot.slane %v2413_v49, 1  ;;  %v2617_v57 = vsel %vm11581_vm7, %v10262_v52, %v2616_v44  ;;  %v778_v54 = vmax.f32 %v11659_v16, 0.0  ;;  %v687_v59 = vadd.f32 %v11666_v46, %v11622_v51  ;;  %10464 = vmatprep.subr.bf16.mxu0 %v10553_v25 }
 0x12c   : > { %v2490_v61 = vsel %vm2474_vm12, %v2489_v56, %v2488_v35  ;;  %v2491_v4 = vrot.slane %v2412_v48, 2  ;;  %2618 = vst [vmem:[#allocation2 + $0x14] sm:$0x1] %v2617_v57  ;;  %v679_v1 = vadd.f32 %v11622_v51, %v678_v5  ;;  %v700_v60 = vadd.f32 %v10446_v21, %v11622_v51  ;;  %v2613_v5 = vld [vmem:[#allocation2 + $0x10] sm:$0xf]  ;;  %10465 = vmatpush3.bf16.msra.mxu0 %v10553_v25 }
 0x12d   : > { %v970_v6 = vcombine.high %v778_v54, %v778_v54  ;;  %v977_v7 = vrot.slane %v778_v54, %v11628_v58  ;;  %v781_v8 = vmax.f32 %v687_v59, 0.0  ;;  %v11685_v2 = vadd.f32 %v11622_v51, %v691_v41 }
 0x12e   : > { %v2492_v16 = vsel %vm2477_vm13, %v2491_v4, %v2490_v61  ;;  %v779_v10 = vmax.f32 %v679_v1, 0.0  ;;  %v11688_v46 = vmax.f32 %v700_v60, 0.0  ;;  %v11691_v11 = vadd.f32 %v10447_v3, %v11622_v51 }
 0x12f   : > { %v2494_v12 = vsel %vm2480_vm14, %v2493_v0, %v2492_v16  ;;  %v984_v14 = vrot.slane %v970_v6, %v11628_v58  ;;  %v985_v9 = vcombine.high %v977_v7, %v977_v7  ;;  %v9344_v17 = vrot.slane %v977_v7, 9 }
 0x130   : > { %v2575_v18 = vpack.c.b16 %v2494_v12, %v2494_v12  ;;  %v1021_v13 = vcombine.high %v781_v8, %v781_v8  ;;  %v1028_v19 = vrot.slane %v781_v8, %v11628_v58  ;;  %v987_v20 = vcombine.high %v779_v10, %v779_v10  ;;  %v694_v12 = vpop.f32.mrf.mxu0 }
 0x131   : > { %v986_v21 = vcombine.high %v984_v14, %v984_v14  ;;  %v9345_v15 = vrot.slane %v985_v9, 9  ;;  %v9346_v22 = vrot.slane %v984_v14, 9  ;;  %v1922_v23 = vmax.f32 %v977_v7, %v9344_v17 }
 0x132   : > { %v2614_v26 = vsel %vm11599_vm8, %v2575_v18, %v2613_v5  ;;  %v1035_v27 = vrot.slane %v1021_v13, %v11628_v58  ;;  %v1036_v30 = vcombine.high %v1028_v19, %v1028_v19  ;;  %v9356_v32 = vrot.slane %v1028_v19, 9 }
 0x133   : > { %2615 = vst [vmem:[#allocation2 + $0x10] sm:$0xf] %v2614_v26  ;;  %v9347_v33 = vrot.slane %v986_v21, 9  ;;  %v1923_v34 = vmax.f32 %v985_v9, %v9345_v15  ;;  %v1924_v35 = vmax.f32 %v984_v14, %v9346_v22  ;;  %v2034_v36 = vmax.f32 %v1922_v23, %v1930_v53 }
 0x134   : > { %v1037_v37 = vcombine.high %v1035_v27, %v1035_v27  ;;  %v9357_v38 = vrot.slane %v1036_v30, 9  ;;  %v9358_v39 = vrot.slane %v1035_v27, 9  ;;  %v1934_v40 = vmax.f32 %v1028_v19, %v9356_v32  ;;  %v10450_v32 = vpop.f32.mrf.mxu0 }
 0x135   : > { %v1925_v41 = vmax.f32 %v986_v21, %v9347_v33  ;;  %v2035_v42 = vmax.f32 %v1923_v34, %v1931_v55  ;;  %v2036_v43 = vmax.f32 %v1924_v35, %v1932_v62  ;;  %v10213_v44 = vpack.c.bf16 %v2034_v36, %v2034_v36 }
 0x136   : > { %v9359_v45 = vrot.slane %v1037_v37, 9  ;;  %v1935_v47 = vmax.f32 %v1036_v30, %v9357_v38  ;;  %v1936_v49 = vmax.f32 %v1035_v27, %v9358_v39  ;;  %v994_v52 = vrot.slane %v779_v10, %v11628_v58  ;;  %v2622_v38 = vld [vmem:[#allocation2 + $0x1c] sm:$0x1] }
 0x137   : > { %v2037_v48 = vmax.f32 %v1925_v41, %v1933_v63  ;;  %v10214_v56 = vpack.c.bf16 %v2035_v42, %v2035_v42  ;;  %v10215_v0 = vpack.c.bf16 %v2036_v43, %v2036_v43  ;;  %v2415_v57 = vunpack.c.l.b16 %v10213_v44 }
 0x138   : > { %v1937_v53 = vmax.f32 %v1037_v37, %v9359_v45  ;;  %v1001_v54 = vrot.slane %v987_v20, %v11628_v58  ;;  %v1002_v59 = vcombine.high %v994_v52, %v994_v52  ;;  %v9348_v3 = vrot.slane %v994_v52, 9 }
 0x139   : > { %v10216_v61 = vpack.c.bf16 %v2037_v48, %v2037_v48  ;;  %v2416_v4 = vunpack.c.l.b16 %v10214_v56  ;;  %v2417_v1 = vunpack.c.l.b16 %v10215_v0  ;;  %v2495_v55 = vrot.slane %v2415_v57, 7  ;;  %v707_v48 = vpop.f32.mrf.mxu0 }
 0x13a   : > { %v1003_v62 = vcombine.high %v1001_v54, %v1001_v54  ;;  %v9349_v60 = vrot.slane %v1002_v59, 9  ;;  %v9350_v6 = vrot.slane %v1001_v54, 9  ;;  %v1926_v7 = vmax.f32 %v994_v52, %v9348_v3 }
 0x13b   : > { %v2418_v8 = vunpack.c.l.b16 %v10216_v61  ;;  %v2496_v16 = vrot.slane %v2416_v4, 6  ;;  %v2498_v10 = vrot.slane %v2417_v1, 5  ;;  %v1072_v63 = vcombine.high %v11688_v46, %v11688_v46 }
 0x13c   : > { %v9351_v5 = vrot.slane %v1003_v62, 9  ;;  %v1927_v14 = vmax.f32 %v1002_v59, %v9349_v60  ;;  %v1928_v9 = vmax.f32 %v1001_v54, %v9350_v6  ;;  %v2038_v17 = vmax.f32 %v1926_v7, %v1934_v40 }
 0x13d   : > { %v2497_v18 = vsel %vm2465_vm9, %v2496_v16, %v2495_v55  ;;  %v2500_v13 = vrot.slane %v2418_v8, 4  ;;  %v1079_v19 = vrot.slane %v11688_v46, %v11628_v58  ;;  %v1086_v20 = vrot.slane %v1072_v63, %v11628_v58 }
 0x13e   : > { %v2499_v21 = vsel %vm2468_vm10, %v2498_v10, %v2497_v18  ;;  %v1929_v15 = vmax.f32 %v1003_v62, %v9351_v5  ;;  %v2039_v22 = vmax.f32 %v1927_v14, %v1935_v47  ;;  %v2040_v23 = vmax.f32 %v1928_v9, %v1936_v49 }
 0x13f   : > { %v10217_v25 = vpack.c.bf16 %v2038_v17, %v2038_v17  ;;  %v2501_v26 = vsel %vm2471_vm11, %v2500_v13, %v2499_v21  ;;  %v1087_v27 = vcombine.high %v1079_v19, %v1079_v19  ;;  %v1088_v30 = vcombine.high %v1086_v20, %v1086_v20 }
 0x140   : > { %v2041_v33 = vmax.f32 %v1929_v15, %v1937_v53  ;;  %v10218_v34 = vpack.c.bf16 %v2039_v22, %v2039_v22  ;;  %v10219_v35 = vpack.c.bf16 %v2040_v23, %v2040_v23  ;;  %v9368_v36 = vrot.slane %v1079_v19, 9 }
 0x141   : > { %v2419_v37 = vunpack.c.l.b16 %v10217_v25  ;;  %v9369_v46 = vrot.slane %v1087_v27, 9  ;;  %v9370_v39 = vrot.slane %v1086_v20, 9  ;;  %v9371_v40 = vrot.slane %v1088_v30, 9 }
 0x142   : > { %v2420_v41 = vunpack.c.l.b16 %v10218_v34  ;;  %v2421_v42 = vunpack.c.l.b16 %v10219_v35  ;;  %v10263_v43 = vpack.c.bf16 %v2041_v33, %v2041_v33  ;;  %v1946_v44 = vmax.f32 %v1079_v19, %v9368_v36 }
 0x143   : > { %v2502_v45 = vrot.slane %v2419_v37, 3  ;;  %v1947_v47 = vmax.f32 %v1087_v27, %v9369_v46  ;;  %v1948_v49 = vmax.f32 %v1086_v20, %v9370_v39  ;;  %v1949_v52 = vmax.f32 %v1088_v30, %v9371_v40  ;;  %v10557_v30 = vld [vmem:[%s13981_s3 + $0x110] sm:$0xff]  }
 0x144   : > { %v2504_v56 = vrot.slane %v2420_v41, 2  ;;  %v2506_v0 = vrot.slane %v2421_v42, 1  ;;  %v2623_v57 = vsel %vm11581_vm7, %v10263_v43, %v2622_v38  ;;  %v782_v53 = vmax.f32 %v11685_v2, 0.0  ;;  %v2619_v2 = vld [vmem:[#allocation2 + $0x18] sm:$0xf]  ;;  %10466 = vmatprep.subr.bf16.mxu0 %v10557_v30 }
 0x145   : > { %v2503_v54 = vsel %vm2474_vm12, %v2502_v45, %v2501_v26  ;;  %2624 = vst [vmem:[#allocation2 + $0x1c] sm:$0x1] %v2623_v57  ;;  %v785_v59 = vmax.f32 %v11691_v11, 0.0  ;;  %v695_v3 = vadd.f32 %v11622_v51, %v694_v12  ;;  %v716_v61 = vadd.f32 %v10450_v32, %v11622_v51  ;;  %v10559_v32 = vld [vmem:[%s13981_s3 + $0x108] sm:$0xff]   ;;  %10467 = vmatpush3.bf16.msra.mxu0 %v10557_v30 }
 0x146   : > { %v2505_v4 = vsel %vm2477_vm13, %v2504_v56, %v2503_v54  ;;  %v1038_v1 = vcombine.high %v782_v53, %v782_v53  ;;  %v1045_v55 = vrot.slane %v782_v53, %v11628_v58  ;;  %v11722_v62 = vadd.f32 %v11622_v51, %v707_v48  ;;  %10468 = vmatprep.subr.bf16.mxu0 %v10559_v32  ;;  %v10451_v54 = vpop.f32.mrf.mxu0 }
 0x147   : > { %v2507_v60 = vsel %vm2480_vm14, %v2506_v0, %v2505_v4  ;;  %v1089_v6 = vcombine.high %v785_v59, %v785_v59  ;;  %v1096_v7 = vrot.slane %v785_v59, %v11628_v58  ;;  %v783_v8 = vmax.f32 %v695_v3, 0.0 }
 0x148   : > { %v2577_v11 = vpack.c.b16 %v2507_v60, %v2507_v60  ;;  %v1052_v16 = vrot.slane %v1038_v1, %v11628_v58  ;;  %v1053_v10 = vcombine.high %v1045_v55, %v1045_v55  ;;  %v9360_v63 = vrot.slane %v1045_v55, 9 }
 0x149   : > { %v1103_v12 = vrot.slane %v1089_v6, %v11628_v58  ;;  %v1104_v5 = vcombine.high %v1096_v7, %v1096_v7  ;;  %v9372_v14 = vrot.slane %v1096_v7, 9  ;;  %v1055_v9 = vcombine.high %v783_v8, %v783_v8  ;;  %10469 = vmatpush3.bf16.msra.mxu0 %v10559_v32 }
 0x14a   : > { %v2620_v17 = vsel %vm11599_vm8, %v2577_v11, %v2619_v2  ;;  %v1054_v18 = vcombine.high %v1052_v16, %v1052_v16  ;;  %v9361_v13 = vrot.slane %v1053_v10, 9  ;;  %v9362_v19 = vrot.slane %v1052_v16, 9 }
 0x14b   : > { %2621 = vst [vmem:[#allocation2 + $0x18] sm:$0xf] %v2620_v17  ;;  %v1938_v20 = vmax.f32 %v1045_v55, %v9360_v63  ;;  %v1105_v21 = vcombine.high %v1103_v12, %v1103_v12  ;;  %v9373_v15 = vrot.slane %v1104_v5, 9  ;;  %v9374_v22 = vrot.slane %v1103_v12, 9 }
 0x14c   : > { %v9363_v23 = vrot.slane %v1054_v18, 9  ;;  %v1939_v25 = vmax.f32 %v1053_v10, %v9361_v13  ;;  %v1940_v26 = vmax.f32 %v1052_v16, %v9362_v19  ;;  %v1950_v27 = vmax.f32 %v1096_v7, %v9372_v14 }
 0x14d   : > { %v2042_v33 = vmax.f32 %v1938_v20, %v1946_v44  ;;  %v9375_v34 = vrot.slane %v1105_v21, 9  ;;  %v1951_v35 = vmax.f32 %v1104_v5, %v9373_v15  ;;  %v1952_v36 = vmax.f32 %v1103_v12, %v9374_v22  ;;  %v10561_v44 = vld [vmem:[%s13981_s3 + $0x100] sm:$0xff]   ;;  %v710_v12 = vpop.f32.mrf.mxu0 }
 0x14e   : > { %v1941_v37 = vmax.f32 %v1054_v18, %v9363_v23  ;;  %v2043_v38 = vmax.f32 %v1939_v25, %v1947_v47  ;;  %v2044_v46 = vmax.f32 %v1940_v26, %v1948_v49  ;;  %v1062_v39 = vrot.slane %v783_v8, %v11628_v58  ;;  %10470 = vmatprep.subr.bf16.mxu0 %v10561_v44  ;;  %v2628_v22 = vld [vmem:[#allocation2 + $0x24] sm:$0x1] }
 0x14f   : > { %v10221_v40 = vpack.c.bf16 %v2042_v33, %v2042_v33  ;;  %v1953_v41 = vmax.f32 %v1105_v21, %v9375_v34  ;;  %v1069_v42 = vrot.slane %v1055_v9, %v11628_v58  ;;  %v788_v43 = vmax.f32 %v716_v61, 0.0  ;;  %10471 = vmatpush3.bf16.msra.mxu0 %v10561_v44  ;;  %v10454_v33 = vpop.f32.mrf.mxu0 }
 0x150   : > { %v2045_v45 = vmax.f32 %v1941_v37, %v1949_v52  ;;  %v10222_v48 = vpack.c.bf16 %v2043_v38, %v2043_v38  ;;  %v10223_v56 = vpack.c.bf16 %v2044_v46, %v2044_v46  ;;  %v1070_v0 = vcombine.high %v1062_v39, %v1062_v39 }
 0x151   : > { %v2423_v47 = vunpack.c.l.b16 %v10221_v40  ;;  %v1071_v49 = vcombine.high %v1069_v42, %v1069_v42  ;;  %v9364_v57 = vrot.slane %v1062_v39, 9  ;;  %v9366_v53 = vrot.slane %v1069_v42, 9  ;;  %v723_v44 = vpop.f32.mrf.mxu0 }
 0x152   : > { %v10224_v59 = vpack.c.bf16 %v2045_v45, %v2045_v45  ;;  %v2424_v3 = vunpack.c.l.b16 %v10222_v48  ;;  %v2425_v4 = vunpack.c.l.b16 %v10223_v56  ;;  %v9365_v1 = vrot.slane %v1070_v0, 9 }
 0x153   : > { %v2508_v61 = vrot.slane %v2423_v47, 7  ;;  %v9367_v55 = vrot.slane %v1071_v49, 9  ;;  %v1942_v52 = vmax.f32 %v1062_v39, %v9364_v57  ;;  %v1944_v60 = vmax.f32 %v1069_v42, %v9366_v53 }
 0x154   : > { %v2426_v2 = vunpack.c.l.b16 %v10224_v59  ;;  %v2509_v6 = vrot.slane %v2424_v3, 6  ;;  %v2511_v7 = vrot.slane %v2425_v4, 5  ;;  %v1943_v8 = vmax.f32 %v1070_v0, %v9365_v1  ;;  %v2625_v3 = vld [vmem:[#allocation2 + $0x20] sm:$0xf] }
 0x155   : > { %v1945_v11 = vmax.f32 %v1071_v49, %v9367_v55  ;;  %v2046_v16 = vmax.f32 %v1942_v52, %v1950_v27  ;;  %v2048_v10 = vmax.f32 %v1944_v60, %v1952_v36  ;;  %v1140_v63 = vcombine.high %v788_v43, %v788_v43 }
 0x156   : > { %v2510_v5 = vsel %vm2465_vm9, %v2509_v6, %v2508_v61  ;;  %v2513_v14 = vrot.slane %v2426_v2, 4  ;;  %v2047_v9 = vmax.f32 %v1943_v8, %v1951_v35  ;;  %v1147_v17 = vrot.slane %v788_v43, %v11628_v58 }
 0x157   : > { %v2512_v18 = vsel %vm2468_vm10, %v2511_v7, %v2510_v5  ;;  %v2049_v13 = vmax.f32 %v1945_v11, %v1953_v41  ;;  %v10225_v19 = vpack.c.bf16 %v2046_v16, %v2046_v16  ;;  %v10227_v20 = vpack.c.bf16 %v2048_v10, %v2048_v10 }
 0x158   : > { %v10226_v21 = vpack.c.bf16 %v2047_v9, %v2047_v9  ;;  %v2514_v15 = vsel %vm2471_vm11, %v2513_v14, %v2512_v18  ;;  %v1154_v23 = vrot.slane %v1140_v63, %v11628_v58  ;;  %v1155_v25 = vcombine.high %v1147_v17, %v1147_v17 }
 0x159   : > { %v2427_v26 = vunpack.c.l.b16 %v10225_v19  ;;  %v2429_v27 = vunpack.c.l.b16 %v10227_v20  ;;  %v10264_v30 = vpack.c.bf16 %v2049_v13, %v2049_v13  ;;  %v9384_v32 = vrot.slane %v1147_v17, 9 }
 0x15a   : > { %v2428_v34 = vunpack.c.l.b16 %v10226_v21  ;;  %v1156_v35 = vcombine.high %v1154_v23, %v1154_v23  ;;  %v9385_v36 = vrot.slane %v1155_v25, 9  ;;  %v9386_v37 = vrot.slane %v1154_v23, 9 }
 0x15b   : > { %v2515_v38 = vrot.slane %v2427_v26, 3  ;;  %v2519_v46 = vrot.slane %v2429_v27, 1  ;;  %v2629_v39 = vsel %vm11581_vm7, %v10264_v30, %v2628_v22  ;;  %v1962_v42 = vmax.f32 %v1147_v17, %v9384_v32 }
 0x15c   : > { %v2517_v40 = vrot.slane %v2428_v34, 2  ;;  %2630 = vst [vmem:[#allocation2 + $0x24] sm:$0x1] %v2629_v39  ;;  %v9387_v41 = vrot.slane %v1156_v35, 9  ;;  %v1963_v43 = vmax.f32 %v1155_v25, %v9385_v36  ;;  %v786_v48 = vmax.f32 %v11722_v62, 0.0 }
 0x15d   : > { %v2516_v45 = vsel %vm2474_vm12, %v2515_v38, %v2514_v15  ;;  %v719_v56 = vadd.f32 %v10451_v54, %v11622_v51  ;;  %v711_v0 = vadd.f32 %v11622_v51, %v710_v12  ;;  %v1964_v49 = vmax.f32 %v1154_v23, %v9386_v37 }
 0x15e   : > { %v2518_v47 = vsel %vm2477_vm13, %v2517_v40, %v2516_v45  ;;  %v1965_v57 = vmax.f32 %v1156_v35, %v9387_v41  ;;  %v732_v53 = vadd.f32 %v10454_v33, %v11622_v51  ;;  %v1106_v4 = vcombine.high %v786_v48, %v786_v48 }
 0x15f   : > { %v2520_v59 = vsel %vm2480_vm14, %v2519_v46, %v2518_v47  ;;  %v1113_v1 = vrot.slane %v786_v48, %v11628_v58  ;;  %v789_v61 = vmax.f32 %v719_v56, 0.0  ;;  %v787_v62 = vmax.f32 %v711_v0, 0.0 }
 0x160   : > { %v2579_v55 = vpack.c.b16 %v2520_v59, %v2520_v59  ;;  %v11756_v52 = vmax.f32 %v732_v53, 0.0  ;;  %v11759_v54 = vadd.f32 %v11622_v51, %v723_v44  ;;  %v1120_v60 = vrot.slane %v1106_v4, %v11628_v58 }
 0x161   : > { %v1121_v2 = vcombine.high %v1113_v1, %v1113_v1  ;;  %v9376_v6 = vrot.slane %v1113_v1, 9  ;;  %v1157_v7 = vcombine.high %v789_v61, %v789_v61  ;;  %v1164_v11 = vrot.slane %v789_v61, %v11628_v58 }
 0x162   : > { %v2626_v8 = vsel %vm11599_vm8, %v2579_v55, %v2625_v3  ;;  %v1123_v16 = vcombine.high %v787_v62, %v787_v62  ;;  %v1130_v10 = vrot.slane %v787_v62, %v11628_v58  ;;  %v1122_v63 = vcombine.high %v1120_v60, %v1120_v60 }
 0x163   : > { %2627 = vst [vmem:[#allocation2 + $0x20] sm:$0xf] %v2626_v8  ;;  %v9377_v12 = vrot.slane %v1121_v2, 9  ;;  %v9378_v5 = vrot.slane %v1120_v60, 9  ;;  %v1954_v14 = vmax.f32 %v1113_v1, %v9376_v6  ;;  %v1171_v51 = vrot.slane %v1157_v7, %v11628_v58 }
 0x164   : > { %v1172_v9 = vcombine.high %v1164_v11, %v1164_v11  ;;  %v9388_v17 = vrot.slane %v1164_v11, 9  ;;  %v1137_v18 = vrot.slane %v1123_v16, %v11628_v58  ;;  %v9379_v13 = vrot.slane %v1122_v63, 9 }
 0x165   : > { %v1955_v19 = vmax.f32 %v1121_v2, %v9377_v12  ;;  %v1956_v20 = vmax.f32 %v1120_v60, %v9378_v5  ;;  %v2050_v21 = vmax.f32 %v1954_v14, %v1962_v42  ;;  %v1173_v15 = vcombine.high %v1171_v51, %v1171_v51  ;;  %v2634_v12 = vld [vmem:[#allocation2 + $0x2c] sm:$0x1] }
 0x166   : > { %v9389_v22 = vrot.slane %v1172_v9, 9  ;;  %v9390_v23 = vrot.slane %v1171_v51, 9  ;;  %v1966_v25 = vmax.f32 %v1164_v11, %v9388_v17  ;;  %v1957_v26 = vmax.f32 %v1122_v63, %v9379_v13 }
 0x167   : > { %v2051_v27 = vmax.f32 %v1955_v19, %v1963_v43  ;;  %v2052_v30 = vmax.f32 %v1956_v20, %v1964_v49  ;;  %v10229_v32 = vpack.c.bf16 %v2050_v21, %v2050_v21  ;;  %v9391_v33 = vrot.slane %v1173_v15, 9 }
 0x168   : > { %v1967_v34 = vmax.f32 %v1172_v9, %v9389_v22  ;;  %v1968_v35 = vmax.f32 %v1171_v51, %v9390_v23  ;;  %v1138_v36 = vcombine.high %v1130_v10, %v1130_v10  ;;  %v2053_v37 = vmax.f32 %v1957_v26, %v1965_v57  ;;  %v2679_v22 = vld [vmem:[#allocation2 + $0x8] sm:$0xf]  ;;  %v10455_v23 = vpop.f32.mrf.mxu0 }
 0x169   : > { %v10230_v38 = vpack.c.bf16 %v2051_v27, %v2051_v27  ;;  %v10231_v46 = vpack.c.bf16 %v2052_v30, %v2052_v30  ;;  %v2431_v39 = vunpack.c.l.b16 %v10229_v32  ;;  %v1969_v40 = vmax.f32 %v1173_v15, %v9391_v33 }
 0x16a   : > { %v1139_v41 = vcombine.high %v1137_v18, %v1137_v18  ;;  %v9380_v45 = vrot.slane %v1130_v10, 9  ;;  %v9381_v42 = vrot.slane %v1138_v36, 9  ;;  %v10232_v48 = vpack.c.bf16 %v2053_v37, %v2053_v37 }
 0x16b   : > { %v2432_v56 = vunpack.c.l.b16 %v10230_v38  ;;  %v2433_v0 = vunpack.c.l.b16 %v10231_v46  ;;  %v2521_v44 = vrot.slane %v2431_v39, 7  ;;  %v9382_v47 = vrot.slane %v1137_v18, 9  ;;  %v11785_v38 = vld [vmem:[%s13980_s2] ss:$0 sm:$0xff] }
 0x16c   : > { %v9383_v43 = vrot.slane %v1139_v41, 9  ;;  %v1958_v49 = vmax.f32 %v1130_v10, %v9380_v45  ;;  %v1959_v53 = vmax.f32 %v1138_v36, %v9381_v42  ;;  %v2434_v59 = vunpack.c.l.b16 %v10232_v48 }
 0x16d   : > { %v2522_v3 = vrot.slane %v2432_v56, 6  ;;  %v2524_v4 = vrot.slane %v2433_v0, 5  ;;  %v1208_v57 = vcombine.high %v11756_v52, %v11756_v52  ;;  %v1960_v1 = vmax.f32 %v1137_v18, %v9382_v47 }
 0x16e   : > { %v1961_v61 = vmax.f32 %v1139_v41, %v9383_v43  ;;  %v2054_v55 = vmax.f32 %v1958_v49, %v1966_v25  ;;  %v2055_v62 = vmax.f32 %v1959_v53, %v1967_v34  ;;  %v2526_v2 = vrot.slane %v2434_v59, 4  ;;  %v726_v59 = vpop.f32.mrf.mxu0 }
 0x16f   : > { %v2523_v60 = vsel %vm2465_vm9, %v2522_v3, %v2521_v44  ;;  %v1215_v6 = vrot.slane %v11756_v52, %v11628_v58  ;;  %v1222_v7 = vrot.slane %v1208_v57, %v11628_v58  ;;  %v2056_v11 = vmax.f32 %v1960_v1, %v1968_v35  ;;  %v10599_v3 = vld [vmem:[%s13981_s3 + $0x78] sm:$0xff]   ;;  %v10601_v57 = vld [vmem:[%s13981_s3 + $0x70] sm:$0xff]  }
 0x170   : > { %v2525_v8 = vsel %vm2468_vm10, %v2524_v4, %v2523_v60  ;;  %v2057_v16 = vmax.f32 %v1961_v61, %v1969_v40  ;;  %v10233_v10 = vpack.c.bf16 %v2054_v55, %v2054_v55  ;;  %v10234_v63 = vpack.c.bf16 %v2055_v62, %v2055_v62  ;;  %v2631_v40 = vld [vmem:[#allocation2 + $0x28] sm:$0xf]  ;;  %v10600_v4 = vld [vmem:[%s13981_s3 + $0x38] sm:$0xff]   ;;  %10308 = vmatprep.subr.bf16.mxu1 %v10599_v3  ;;  %v10606_v3 = vld [vmem:[%s13981_s3 + $0x20] sm:$0xff]  }
 0x171   : > { %v1223_v5 = vcombine.high %v1215_v6, %v1215_v6  ;;  %v1224_v14 = vcombine.high %v1222_v7, %v1222_v7  ;;  %v10235_v51 = vpack.c.bf16 %v2056_v11, %v2056_v11  ;;  %v790_v18 = vmax.f32 %v11759_v54, 0.0  ;;  %10309 = vmatpush3.bf16.msra.mxu1 %v10600_v4 }
 0x172   : > { %v2435_v9 = vunpack.c.l.b16 %v10233_v10  ;;  %v10265_v17 = vpack.c.bf16 %v2057_v16, %v2057_v16  ;;  %v2436_v13 = vunpack.c.l.b16 %v10234_v63  ;;  %v2527_v19 = vsel %vm2471_vm11, %v2526_v2, %v2525_v8  ;;  %v10602_v63 = vld [vmem:[%s13981_s3 + $0x30] sm:$0xff]   ;;  %10310 = vmatprep.subr.bf16.mxu1 %v10601_v57 }
 0x173   : > { %v9400_v52 = vrot.slane %v1215_v6, 9  ;;  %v2437_v20 = vunpack.c.l.b16 %v10235_v51  ;;  %v9401_v26 = vrot.slane %v1223_v5, 9  ;;  %v9402_v27 = vrot.slane %v1222_v7, 9 }
 0x174   : > { %v2528_v21 = vrot.slane %v2435_v9, 3  ;;  %v2635_v15 = vsel %vm11581_vm7, %v10265_v17, %v2634_v12  ;;  %v2530_v25 = vrot.slane %v2436_v13, 2  ;;  %v9403_v30 = vrot.slane %v1224_v14, 9  ;;  %v10603_v9 = vld [vmem:[%s13981_s3 + $0x68] sm:$0xff]  }
 0x175   : > { %2636 = vst [vmem:[#allocation2 + $0x2c] sm:$0x1] %v2635_v15  ;;  %v2532_v33 = vrot.slane %v2437_v20, 1  ;;  %v1174_v54 = vcombine.high %v790_v18, %v790_v18  ;;  %v1181_v34 = vrot.slane %v790_v18, %v11628_v58  ;;  %v1978_v36 = vmax.f32 %v1215_v6, %v9400_v52  ;;  %v10458_v52 = vpop.f32.mrf.mxu0  ;;  %10311 = vmatpush3.bf16.msra.mxu1 %v10602_v63 }
 0x176   : > { %v2529_v32 = vsel %vm2474_vm12, %v2528_v21, %v2527_v19  ;;  %v9528_v37 = vcombine.low %v2679_v22, %v2679_v22  ;;  %v735_v46 = vadd.f32 %v11785_v38, %v10455_v23  ;;  %v1979_v56 = vmax.f32 %v1223_v5, %v9401_v26  ;;  %v2172_v23 = vld [vmem:[#allocation2 + $0x30] sm:$0x1]  ;;  %10312 = vmatprep.subr.bf16.mxu1 %v10603_v9 }
 0x177   : > { %v2531_v35 = vsel %vm2477_vm13, %v2530_v25, %v2529_v32  ;;  %v1188_v41 = vrot.slane %v1174_v54, %v11628_v58  ;;  %v1189_v45 = vcombine.high %v1181_v34, %v1181_v34  ;;  %v9392_v42 = vrot.slane %v1181_v34, 9  ;;  %v2198_v32 = vld [vmem:[#allocation2 + $0x34] sm:$0x1] }
 0x178   : > { %v2533_v39 = vsel %vm2480_vm14, %v2532_v33, %v2531_v35  ;;  %v1980_v0 = vmax.f32 %v1222_v7, %v9402_v27  ;;  %2896 = vrot.lane.b32.xlu0 %v9528_v37, %s11396_s30  ;;  %v793_v44 = vmax.f32 %v735_v46, 0.0  ;;  %v1981_v61 = vmax.f32 %v1224_v14, %v9403_v30  ;;  %v10604_v33 = vld [vmem:[%s13981_s3 + $0x28] sm:$0xff]   ;;  %v10605_v37 = vld [vmem:[%s13981_s3 + $0x60] sm:$0xff]  }
 0x179   : > { %v2581_v48 = vpack.c.b16 %v2533_v39, %v2533_v39  ;;  %v1190_v47 = vcombine.high %v1188_v41, %v1188_v41  ;;  %v9393_v43 = vrot.slane %v1189_v45, 9  ;;  %v9394_v49 = vrot.slane %v1188_v41, 9  ;;  %10313 = vmatpush3.bf16.msra.mxu1 %v10604_v33 }
 0x17a   : > { %v1970_v53 = vmax.f32 %v1181_v34, %v9392_v42  ;;  %v1225_v55 = vcombine.high %v793_v44, %v793_v44  ;;  %v1232_v62 = vrot.slane %v793_v44, %v11628_v58  ;;  %v727_v10 = vadd.f32 %v11785_v38, %v726_v59  ;;  %v739_v42 = vpop.f32.mrf.mxu0  ;;  %v11824_v59 = vld [vmem:[#allocation2 + $0xc] sm:$0x1]  ;;  %10314 = vmatprep.subr.bf16.mxu1 %v10605_v37 }
 0x17b   : > { %v2632_v1 = vsel %vm11599_vm8, %v2581_v48, %v2631_v40  ;;  %v9395_v60 = vrot.slane %v1190_v47, 9  ;;  %v1971_v2 = vmax.f32 %v1189_v45, %v9393_v43  ;;  %v1972_v6 = vmax.f32 %v1188_v41, %v9394_v49  ;;  %v2656_v45 = vld [vmem:[#allocation2 + $0x8] sm:$0xf] }
 0x17c   : > { %2633 = vst [vmem:[#allocation2 + $0x28] sm:$0xf] %v2632_v1  ;;  %v2058_v7 = vmax.f32 %v1970_v53, %v1978_v36  ;;  %v1239_v8 = vrot.slane %v1225_v55, %v11628_v58  ;;  %v1240_v11 = vcombine.high %v1232_v62, %v1232_v62  ;;  %v9404_v16 = vrot.slane %v1232_v62, 9  ;;  %v10607_v55 = vld [vmem:[%s13981_s3 + $0x58] sm:$0xff]  }
 0x17d   : > { %v1973_v12 = vmax.f32 %v1190_v47, %v9395_v60  ;;  %v2059_v5 = vmax.f32 %v1971_v2, %v1979_v56  ;;  %v2060_v14 = vmax.f32 %v1972_v6, %v1980_v0  ;;  %v791_v30 = vmax.f32 %v727_v10, 0.0  ;;  %10315 = vmatpush3.bf16.msra.mxu1 %v10606_v3 }
 0x17e   : > { %v10237_v51 = vpack.c.bf16 %v2058_v7, %v2058_v7  ;;  %v1241_v17 = vcombine.high %v1239_v8, %v1239_v8  ;;  %v9405_v18 = vrot.slane %v1240_v11, 9  ;;  %v9406_v13 = vrot.slane %v1239_v8, 9  ;;  %10316 = vmatprep.subr.bf16.mxu1 %v10607_v55 }
 0x17f   : > { %v1982_v19 = vmax.f32 %v1232_v62, %v9404_v16  ;;  %v2061_v20 = vmax.f32 %v1973_v12, %v1981_v61  ;;  %v10238_v21 = vpack.c.bf16 %v2059_v5, %v2059_v5  ;;  %v10239_v15 = vpack.c.bf16 %v2060_v14, %v2060_v14  ;;  %v10608_v14 = vld [vmem:[%s13981_s3 + $0x18] sm:$0xff]  }
 0x180   : > { %v2439_v22 = vunpack.c.l.b16 %v10237_v51  ;;  %v9407_v25 = vrot.slane %v1241_v17, 9  ;;  %v1983_v26 = vmax.f32 %v1240_v11, %v9405_v18  ;;  %v1984_v27 = vmax.f32 %v1239_v8, %v9406_v13  ;;  %v10609_v13 = vld [vmem:[%s13981_s3 + $0x50] sm:$0xff]  }
 0x181   : > { %v10240_v54 = vpack.c.bf16 %v2061_v20, %v2061_v20  ;;  %v2440_v34 = vunpack.c.l.b16 %v10238_v21  ;;  %v2441_v35 = vunpack.c.l.b16 %v10239_v15  ;;  %v1191_v39 = vcombine.high %v791_v30, %v791_v30  ;;  %10317 = vmatpush3.bf16.msra.mxu1 %v10608_v14 }
 0x182   : > { %v2534_v36 = vrot.slane %v2439_v22, 7  ;;  %v1985_v46 = vmax.f32 %v1241_v17, %v9407_v25  ;;  %v1198_v40 = vrot.slane %v791_v30, %v11628_v58  ;;  %v2173_v41 = vsel %vm11581_vm7, 0, %v2172_v23  ;;  %10318 = vmatprep.subr.bf16.mxu1 %v10609_v13  ;;  %v10614_v13 = vld [vmem:[%s13981_s3] sm:$0xff]  }
 0x183   : > { %v2442_v48 = vunpack.c.l.b16 %v10240_v54  ;;  %v2535_v56 = vrot.slane %v2440_v34, 6  ;;  %v2537_v0 = vrot.slane %v2441_v35, 5  ;;  %2174 = vst [vmem:[#allocation2 + $0x30] sm:$0x1] %v2173_v41  ;;  %v2199_v44 = vsel %vm11571_vm4, 0, %v2198_v32  ;;  %v10459_v32 = vpop.f32.mrf.mxu0  ;;  %v10610_v35 = vld [vmem:[%s13981_s3 + $0x10] sm:$0xff]  }
 0x184   : > { %v1205_v47 = vrot.slane %v1191_v39, %v11628_v58  ;;  %v1206_v43 = vcombine.high %v1198_v40, %v1198_v40  ;;  %v9396_v49 = vrot.slane %v1198_v40, 9  ;;  %2200 = vst [vmem:[#allocation2 + $0x34] sm:$0x1] %v2199_v44  ;;  %v748_v53 = vadd.f32 %v11785_v38, %v10458_v52 }
 0x185   : > { %v2536_v4 = vsel %vm2465_vm9, %v2535_v56, %v2534_v36  ;;  %v2539_v57 = vrot.slane %v2442_v48, 4  ;;  %v9513_v1 = vcombine.low %v2656_v45, %v11824_v59  ;;  %v740_v61 = vadd.f32 %v11785_v38, %v739_v42  ;;  %v11852_v48 = vld [vmem:[#allocation2 + $0x10] sm:$0xf]  ;;  %10319 = vmatpush3.bf16.msra.mxu1 %v10610_v35 }
 0x186   : > { %v2538_v62 = vsel %vm2468_vm10, %v2537_v0, %v2536_v4  ;;  %v1207_v60 = vcombine.high %v1205_v47, %v1205_v47  ;;  %v9397_v2 = vrot.slane %v1206_v43, 9  ;;  %v9398_v6 = vrot.slane %v1205_v47, 9 }
 0x187   : > { %v1974_v7 = vmax.f32 %v1198_v40, %v9396_v49  ;;  %v2540_v8 = vsel %vm2471_vm11, %v2539_v57, %v2538_v62  ;;  %v796_v11 = vmax.f32 %v748_v53, 0.0  ;;  %v2776_v16 = vshrl.u32 %v9513_v1, 16  ;;  %v10611_v40 = vld [vmem:[%s13981_s3 + $0x48] sm:$0xff]   ;;  %v2175_v57 = vld [vmem:[#allocation2 + $0x38] sm:$0x1] }
 0x188   : > { %v9399_v10 = vrot.slane %v1207_v60, 9  ;;  %v1975_v63 = vmax.f32 %v1206_v43, %v9397_v2  ;;  %v1976_v12 = vmax.f32 %v1205_v47, %v9398_v6  ;;  %v2778_v5 = vshll.u32 %v9513_v1, 16  ;;  %v742_v43 = vpop.f32.mrf.mxu0  ;;  %v10612_v1 = vld [vmem:[%s13981_s3 + $0x8] sm:$0xff]   ;;  %10320 = vmatprep.subr.bf16.mxu1 %v10611_v40  ;;  %v10613_v2 = vld [vmem:[%s13981_s3 + $0x40] sm:$0xff]  }
 0x189   : > { %v2062_v51 = vmax.f32 %v1974_v7, %v1982_v19  ;;  %v1276_v9 = vcombine.high %v796_v11, %v796_v11  ;;  %v1283_v17 = vrot.slane %v796_v11, %v11628_v58  ;;  %v794_v18 = vmax.f32 %v740_v61, 0.0  ;;  %10321 = vmatpush3.bf16.msra.mxu1 %v10612_v1 }
 0x18a   : > { %v1977_v52 = vmax.f32 %v1207_v60, %v9399_v10  ;;  %v2063_v20 = vmax.f32 %v1975_v63, %v1983_v26  ;;  %v2064_v21 = vmax.f32 %v1976_v12, %v1984_v27  ;;  %v2780_v15 = vrot.slane %v2778_v5, 1  ;;  %v2637_v63 = vld [vmem:[#allocation2 + $0x30] sm:$0xf]  ;;  %10322 = vmatprep.subr.bf16.mxu1 %v10613_v2 }
 0x18b   : > { %v10241_v22 = vpack.c.bf16 %v2062_v51, %v2062_v51  ;;  %v1290_v23 = vrot.slane %v1276_v9, %v11628_v58  ;;  %v1291_v25 = vcombine.high %v1283_v17, %v1283_v17  ;;  %v9416_v30 = vrot.slane %v1283_v17, 9  ;;  %v2640_v37 = vld [vmem:[#allocation2 + $0x34] sm:$0x1] }
 0x18c   : > { %v2065_v19 = vmax.f32 %v1977_v52, %v1985_v46  ;;  %v10242_v33 = vpack.c.bf16 %v2063_v20, %v2063_v20  ;;  %v10243_v54 = vpack.c.bf16 %v2064_v21, %v2064_v21  ;;  %v2781_v34 = vor.u32 %v2780_v15, %v2776_v16  ;;  %v2201_v16 = vld [vmem:[#allocation2 + $0x3c] sm:$0x1] }
 0x18d   : > { %v2443_v36 = vunpack.c.l.b16 %v10241_v22  ;;  %v1292_v26 = vcombine.high %v1290_v23, %v1290_v23  ;;  %v9417_v27 = vrot.slane %v1291_v25, 9  ;;  %v9418_v39 = vrot.slane %v1290_v23, 9  ;;  %10323 = vmatpush3.bf16.msra.mxu1 %v10614_v13 }
 0x18e   : > { %v2444_v41 = vunpack.c.l.b16 %v10242_v33  ;;  %v2445_v46 = vunpack.c.l.b16 %v10243_v54  ;;  %v10266_v45 = vpack.c.bf16 %v2065_v19, %v2065_v19  ;;  %v1994_v42 = vmax.f32 %v1283_v17, %v9416_v30  ;;  %2826 = vrot.lane.b32.xlu1 %v2781_v34, %s11396_s30 }
 0x18f   : > { %v2541_v56 = vrot.slane %v2443_v36, 3  ;;  %v9419_v0 = vrot.slane %v1292_v26, 9  ;;  %v1995_v44 = vmax.f32 %v1291_v25, %v9417_v27  ;;  %v1996_v47 = vmax.f32 %v1290_v23, %v9418_v39 }
 0x190   : > { %v2543_v49 = vrot.slane %v2444_v41, 2  ;;  %v2545_v53 = vrot.slane %v2445_v46, 1  ;;  %v2641_v3 = vsel %vm11581_vm7, %v10266_v45, %v2640_v37  ;;  %v1242_v4 = vcombine.high %v794_v18, %v794_v18  ;;  %v10462_v41 = vpop.f32.mrf.mxu0 }
 0x191   : > { %v2542_v61 = vsel %vm2474_vm12, %v2541_v56, %v2540_v8  ;;  %2642 = vst [vmem:[#allocation2 + $0x34] sm:$0x1] %v2641_v3  ;;  %v1997_v55 = vmax.f32 %v1292_v26, %v9419_v0  ;;  %v1249_v62 = vrot.slane %v794_v18, %v11628_v58  ;;  %v9529_v60 = vcombine.low %v11852_v48, %v11852_v48 }
 0x192   : > { %v2544_v6 = vsel %vm2477_vm13, %v2543_v49, %v2542_v61  ;;  %v1256_v7 = vrot.slane %v1242_v4, %v11628_v58  ;;  %v751_v11 = vadd.f32 %v11785_v38, %v10459_v32  ;;  %v743_v8 = vadd.f32 %v11785_v38, %v742_v43 }
 0x193   : > { %v2546_v10 = vsel %vm2480_vm14, %v2545_v53, %v2544_v6  ;;  %v1257_v12 = vcombine.high %v1249_v62, %v1249_v62  ;;  %v9408_v5 = vrot.slane %v1249_v62, 9  ;;  %2898 = vrot.lane.b32.xlu0 %v9529_v60, %s11396_s30  ;;  %v2176_v14 = vsel %vm11581_vm7, 0, %v2175_v57  ;;  %v755_v60 = vpop.f32.mrf.mxu0 }
 0x194   : > { %v2583_v51 = vpack.c.b16 %v2546_v10, %v2546_v10  ;;  %v1258_v9 = vcombine.high %v1256_v7, %v1256_v7  ;;  %v9410_v17 = vrot.slane %v1256_v7, 9  ;;  %v797_v18 = vmax.f32 %v751_v11, 0.0  ;;  %2177 = vst [vmem:[#allocation2 + $0x38] sm:$0x1] %v2176_v14 }
 0x195   : > { %v9409_v52 = vrot.slane %v1257_v12, 9  ;;  %v1986_v20 = vmax.f32 %v1249_v62, %v9408_v5  ;;  %v795_v21 = vmax.f32 %v743_v8, 0.0  ;;  %v2202_v15 = vsel %vm11571_vm4, 0, %v2201_v16 }
 0x196   : > { %v2638_v22 = vsel %vm11599_vm8, %v2583_v51, %v2637_v63  ;;  %v9411_v23 = vrot.slane %v1258_v9, 9  ;;  %v1988_v25 = vmax.f32 %v1256_v7, %v9410_v17  ;;  %v1293_v30 = vcombine.high %v797_v18, %v797_v18  ;;  %2203 = vst [vmem:[#allocation2 + $0x3c] sm:$0x1] %v2202_v15 }
 0x197   : > { %2639 = vst [vmem:[#allocation2 + $0x30] sm:$0xf] %v2638_v22  ;;  %v1987_v32 = vmax.f32 %v1257_v12, %v9409_v52  ;;  %v2066_v19 = vmax.f32 %v1986_v20, %v1994_v42  ;;  %v1300_v33 = vrot.slane %v797_v18, %v11628_v58  ;;  %v1259_v54 = vcombine.high %v795_v21, %v795_v21 }
 0x198   : > { %v1989_v34 = vmax.f32 %v1258_v9, %v9411_v23  ;;  %v2068_v35 = vmax.f32 %v1988_v25, %v1996_v47  ;;  %v1307_v36 = vrot.slane %v1293_v30, %v11628_v58  ;;  %v1266_v37 = vrot.slane %v795_v21, %v11628_v58 }
 0x199   : > { %v2067_v26 = vmax.f32 %v1987_v32, %v1995_v44  ;;  %v10245_v27 = vpack.c.bf16 %v2066_v19, %v2066_v19  ;;  %v1308_v39 = vcombine.high %v1300_v33, %v1300_v33  ;;  %v9420_v40 = vrot.slane %v1300_v33, 9 }
 0x19a   : > { %v2069_v46 = vmax.f32 %v1989_v34, %v1997_v55  ;;  %v10247_v45 = vpack.c.bf16 %v2068_v35, %v2068_v35  ;;  %v1309_v56 = vcombine.high %v1307_v36, %v1307_v36  ;;  %v9422_v0 = vrot.slane %v1307_v36, 9 }
 0x19b   : > { %v10246_v42 = vpack.c.bf16 %v2067_v26, %v2067_v26  ;;  %v2447_v43 = vunpack.c.l.b16 %v10245_v27  ;;  %v9421_v49 = vrot.slane %v1308_v39, 9  ;;  %v1998_v53 = vmax.f32 %v1300_v33, %v9420_v40 }
 0x19c   : > { %v10248_v3 = vpack.c.bf16 %v2069_v46, %v2069_v46  ;;  %v2449_v47 = vunpack.c.l.b16 %v10247_v45  ;;  %v9423_v4 = vrot.slane %v1309_v56, 9  ;;  %v2000_v57 = vmax.f32 %v1307_v36, %v9422_v0  ;;  %v10463_v0 = vpop.f32.mrf.mxu0 }
 0x19d   : > { %v2448_v1 = vunpack.c.l.b16 %v10246_v42  ;;  %v2547_v61 = vrot.slane %v2447_v43, 7  ;;  %v1999_v62 = vmax.f32 %v1308_v39, %v9421_v49  ;;  %v1273_v44 = vrot.slane %v1259_v54, %v11628_v58  ;;  %v2646_v26 = vld [vmem:[#allocation2 + $0x3c] sm:$0x1] }
 0x19e   : > { %v2450_v2 = vunpack.c.l.b16 %v10248_v3  ;;  %v2550_v6 = vrot.slane %v2449_v47, 5  ;;  %v2001_v55 = vmax.f32 %v1309_v56, %v9423_v4  ;;  %v1274_v7 = vcombine.high %v1266_v37, %v1266_v37 }
 0x19f   : > { %v2548_v11 = vrot.slane %v2448_v1, 6  ;;  %v1275_v8 = vcombine.high %v1273_v44, %v1273_v44  ;;  %v9412_v16 = vrot.slane %v1266_v37, 9  ;;  %v9414_v10 = vrot.slane %v1273_v44, 9  ;;  %v11896_v1 = vld [vmem:[#allocation2 + $0x18] sm:$0xf] }
 0x1a0   : > { %v2552_v63 = vrot.slane %v2450_v2, 4  ;;  %v9413_v12 = vrot.slane %v1274_v7, 9  ;;  %v764_v5 = vadd.f32 %v11785_v38, %v10462_v41  ;;  %v756_v14 = vadd.f32 %v11785_v38, %v755_v60 }
 0x1a1   : > { %v2549_v51 = vsel %vm2465_vm9, %v2548_v11, %v2547_v61  ;;  %v9415_v9 = vrot.slane %v1275_v8, 9  ;;  %v1990_v17 = vmax.f32 %v1266_v37, %v9412_v16  ;;  %v1992_v18 = vmax.f32 %v1273_v44, %v9414_v10  ;;  %v758_v11 = vpop.f32.mrf.mxu0 }
 0x1a2   : > { %v2551_v13 = vsel %vm2468_vm10, %v2550_v6, %v2549_v51  ;;  %v1991_v52 = vmax.f32 %v1274_v7, %v9413_v12  ;;  %v800_v20 = vmax.f32 %v764_v5, 0.0  ;;  %v798_v21 = vmax.f32 %v756_v14, 0.0  ;;  %v2178_v12 = vld [vmem:[#allocation2 + $0x40] sm:$0x1]  ;;  %v2643_v14 = vld [vmem:[#allocation2 + $0x38] sm:$0xf] }
 0x1a3   : > { %v1993_v15 = vmax.f32 %v1275_v8, %v9415_v9  ;;  %v2070_v22 = vmax.f32 %v1990_v17, %v1998_v53  ;;  %v2072_v23 = vmax.f32 %v1992_v18, %v2000_v57  ;;  %v2553_v25 = vsel %vm2471_vm11, %v2552_v63, %v2551_v13 }
 0x1a4   : > { %v2071_v30 = vmax.f32 %v1991_v52, %v1999_v62  ;;  %v1344_v32 = vcombine.high %v800_v20, %v800_v20  ;;  %v1351_v19 = vrot.slane %v800_v20, %v11628_v58  ;;  %v1310_v33 = vcombine.high %v798_v21, %v798_v21 }
 0x1a5   : > { %v2073_v54 = vmax.f32 %v1993_v15, %v2001_v55  ;;  %v10249_v34 = vpack.c.bf16 %v2070_v22, %v2070_v22  ;;  %v10251_v35 = vpack.c.bf16 %v2072_v23, %v2072_v23  ;;  %v1317_v36 = vrot.slane %v798_v21, %v11628_v58  ;;  %v2204_v21 = vld [vmem:[#allocation2 + $0x44] sm:$0x1] }
 0x1a6   : > { %v10250_v37 = vpack.c.bf16 %v2071_v30, %v2071_v30  ;;  %v1358_v27 = vrot.slane %v1344_v32, %v11628_v58  ;;  %v1359_v39 = vcombine.high %v1351_v19, %v1351_v19  ;;  %v9432_v40 = vrot.slane %v1351_v19, 9 }
 0x1a7   : > { %v2451_v41 = vunpack.c.l.b16 %v10249_v34  ;;  %v2453_v46 = vunpack.c.l.b16 %v10251_v35  ;;  %v10267_v45 = vpack.c.bf16 %v2073_v54, %v2073_v54  ;;  %v1324_v56 = vrot.slane %v1310_v33, %v11628_v58 }
 0x1a8   : > { %v2452_v42 = vunpack.c.l.b16 %v10250_v37  ;;  %v1360_v43 = vcombine.high %v1358_v27, %v1358_v27  ;;  %v9433_v49 = vrot.slane %v1359_v39, 9  ;;  %v9434_v53 = vrot.slane %v1358_v27, 9 }
 0x1a9   : > { %v2554_v3 = vrot.slane %v2451_v41, 3  ;;  %v2558_v47 = vrot.slane %v2453_v46, 1  ;;  %v2647_v4 = vsel %vm11581_vm7, %v10267_v45, %v2646_v26  ;;  %v2010_v57 = vmax.f32 %v1351_v19, %v9432_v40 }
 0x1aa   : > { %v2556_v61 = vrot.slane %v2452_v42, 2  ;;  %2648 = vst [vmem:[#allocation2 + $0x3c] sm:$0x1] %v2647_v4  ;;  %v9435_v62 = vrot.slane %v1360_v43, 9  ;;  %v2011_v44 = vmax.f32 %v1359_v39, %v9433_v49  ;;  %v2012_v60 = vmax.f32 %v1358_v27, %v9434_v53 }
 0x1ab   : > { %v2555_v2 = vsel %vm2474_vm12, %v2554_v3, %v2553_v25  ;;  %v1325_v6 = vcombine.high %v1317_v36, %v1317_v36  ;;  %v1326_v55 = vcombine.high %v1324_v56, %v1324_v56  ;;  %v9424_v7 = vrot.slane %v1317_v36, 9 }
 0x1ac   : > { %v2557_v8 = vsel %vm2477_vm13, %v2556_v61, %v2555_v2  ;;  %v2013_v16 = vmax.f32 %v1360_v43, %v9435_v62  ;;  %v9426_v10 = vrot.slane %v1324_v56, 9  ;;  %v9530_v63 = vcombine.low %v11896_v1, %v11896_v1 }
 0x1ad   : > { %v2559_v5 = vsel %vm2480_vm14, %v2558_v47, %v2557_v8  ;;  %v9425_v51 = vrot.slane %v1325_v6, 9  ;;  %v9427_v9 = vrot.slane %v1326_v55, 9  ;;  %v2002_v17 = vmax.f32 %v1317_v36, %v9424_v7 }
 0x1ae   : > { %v2585_v18 = vpack.c.b16 %v2559_v5, %v2559_v5  ;;  %v2004_v13 = vmax.f32 %v1324_v56, %v9426_v10  ;;  %2900 = vrot.lane.b32.xlu0 %v9530_v63, %s11396_s30  ;;  %v767_v52 = vadd.f32 %v11785_v38, %v10463_v0  ;;  %v759_v20 = vadd.f32 %v11785_v38, %v758_v11  ;;  %v11916_v11 = vld [vmem:[#allocation2 + $0x14] sm:$0x1] }
 0x1af   : > { %v2003_v15 = vmax.f32 %v1325_v6, %v9425_v51  ;;  %v2005_v22 = vmax.f32 %v1326_v55, %v9427_v9  ;;  %v2074_v23 = vmax.f32 %v2002_v17, %v2010_v57  ;;  %v2179_v25 = vsel %vm11581_vm7, 0, %v2178_v12  ;;  %v2721_v12 = vld [vmem:[#allocation2 + $0x18] sm:$0xe]  ;;  %v11921_v17 = vld [vmem:[#allocation2 + $0x10] sm:$0xf] }
 0x1b0   : > { %v2644_v30 = vsel %vm11599_vm8, %v2585_v18, %v2643_v14  ;;  %v2076_v32 = vmax.f32 %v2004_v13, %v2012_v60  ;;  %v801_v19 = vmax.f32 %v767_v52, 0.0  ;;  %v799_v33 = vmax.f32 %v759_v20, 0.0  ;;  %2180 = vst [vmem:[#allocation2 + $0x40] sm:$0x1] %v2179_v25  ;;  %v2720_v60 = vld [vmem:[#allocation2 + $0x10] sm:$0xe] }
 0x1b1   : > { %2645 = vst [vmem:[#allocation2 + $0x38] sm:$0xf] %v2644_v30  ;;  %v2075_v54 = vmax.f32 %v2003_v15, %v2011_v44  ;;  %v2077_v34 = vmax.f32 %v2005_v22, %v2013_v16  ;;  %v10253_v35 = vpack.c.bf16 %v2074_v23, %v2074_v23  ;;  %v2205_v38 = vsel %vm11571_vm4, 0, %v2204_v21  ;;  %v11923_v21 = vld [vmem:[#allocation2 + $0x1c] sm:$0x1]  ;;  %vm12221_vm4 = vmand %vm4239_vm1, %vm2155_vm6 }
 0x1b2   : > { %v10255_v36 = vpack.c.bf16 %v2076_v32, %v2076_v32  ;;  %v1361_v37 = vcombine.high %v801_v19, %v801_v19  ;;  %v1368_v26 = vrot.slane %v801_v19, %v11628_v58  ;;  %v1327_v27 = vcombine.high %v799_v33, %v799_v33  ;;  %2206 = vst [vmem:[#allocation2 + $0x44] sm:$0x1] %v2205_v38  ;;  %v11925_v15 = vld [vmem:[#allocation2 + $0x20] sm:$0xf]  ;;  %v11927_v22 = vld [vmem:[#allocation2 + $0x18] sm:$0xf] }
 0x1b3   : > { %v10254_v39 = vpack.c.bf16 %v2075_v54, %v2075_v54  ;;  %v10256_v40 = vpack.c.bf16 %v2077_v34, %v2077_v34  ;;  %v2455_v41 = vunpack.c.l.b16 %v10253_v35  ;;  %v1334_v46 = vrot.slane %v799_v33, %v11628_v58  ;;  %v11931_v19 = vld [vmem:[#allocation2 + $0x14] sm:$0x1]  ;;  %v11935_v38 = vld [vmem:[#allocation2 + $0x1c] sm:$0x1] }
 0x1b4   : > { %v2457_v45 = vunpack.c.l.b16 %v10255_v36  ;;  %v1375_v56 = vrot.slane %v1361_v37, %v11628_v58  ;;  %v1376_v0 = vcombine.high %v1368_v26, %v1368_v26  ;;  %v9436_v42 = vrot.slane %v1368_v26, 9 }
 0x1b5   : > { %v2456_v43 = vunpack.c.l.b16 %v10254_v39  ;;  %v2458_v49 = vunpack.c.l.b16 %v10256_v40  ;;  %v1341_v24 = vrot.slane %v1327_v27, %v11628_v58  ;;  %v2560_v57 = vrot.slane %v2455_v41, 7 }
 0x1b6   : > { %v2563_v53 = vrot.slane %v2457_v45, 5  ;;  %v1377_v3 = vcombine.high %v1375_v56, %v1375_v56  ;;  %v9437_v47 = vrot.slane %v1376_v0, 9  ;;  %v9438_v4 = vrot.slane %v1375_v56, 9  ;;  %v2722_v45 = vld [vmem:[#allocation2 + $0x20] sm:$0xe] }
 0x1b7   : > { %v2561_v61 = vrot.slane %v2456_v43, 6  ;;  %v2565_v62 = vrot.slane %v2458_v49, 4  ;;  %v1342_v44 = vcombine.high %v1334_v46, %v1334_v46  ;;  %v2014_v6 = vmax.f32 %v1368_v26, %v9436_v42  ;;  %v11942_v49 = vld [vmem:[#allocation2 + $0x24] sm:$0x1] }
 0x1b8   : > { %v9439_v2 = vrot.slane %v1377_v3, 9  ;;  %v2015_v55 = vmax.f32 %v1376_v0, %v9437_v47  ;;  %v1343_v7 = vcombine.high %v1341_v24, %v1341_v24  ;;  %v9428_v16 = vrot.slane %v1334_v46, 9 }
 0x1b9   : > { %v2562_v8 = vsel %vm2465_vm9, %v2561_v61, %v2560_v57  ;;  %v9429_v10 = vrot.slane %v1342_v44, 9  ;;  %v9430_v63 = vrot.slane %v1341_v24, 9  ;;  %v2016_v14 = vmax.f32 %v1375_v56, %v9438_v4  ;;  %v2723_v4 = vld [vmem:[#allocation2 + $0x28] sm:$0xe]  ;;  %v11944_v57 = vld [vmem:[#allocation2 + $0x20] sm:$0xf] }
 0x1ba   : > { %v2564_v5 = vsel %vm2468_vm10, %v2563_v53, %v2562_v8  ;;  %v9431_v51 = vrot.slane %v1343_v7, 9  ;;  %v9560_v9 = vcombine.low %v2720_v60, %v11916_v11  ;;  %v2017_v18 = vmax.f32 %v1377_v3, %v9439_v2  ;;  %v11946_v61 = vld [vmem:[#allocation2 + $0x24] sm:$0x1] }
 0x1bb   : > { %v2006_v13 = vmax.f32 %v1334_v46, %v9428_v16  ;;  %v2007_v52 = vmax.f32 %v1342_v44, %v9429_v10  ;;  %v2008_v20 = vmax.f32 %v1341_v24, %v9430_v63  ;;  %v2566_v25 = vsel %vm2471_vm11, %v2565_v62, %v2564_v5  ;;  %v2652_v46 = vld [vmem:[#allocation2 + $0x44] sm:$0x1]  ;;  %v10620_v62 = vld [vmem:[%s13981_s3 + $0xf8] sm:$0xff]  }
 0x1bc   : > { %v2009_v23 = vmax.f32 %v1343_v7, %v9431_v51  ;;  %v9561_v30 = vcombine.low %v2721_v12, %v11923_v21  ;;  %v3176_v32 = vrot.slane %v9560_v9, 1  ;;  %v9514_v35 = vcombine.low %v11921_v17, %v11931_v19  ;;  %v11957_v7 = vld [vmem:[#allocation2 + $0x28] sm:$0xf]  ;;  %v11959_v12 = vld [vmem:[#allocation2 + $0x2c] sm:$0x1]  ;;  %10348 = vmatprep.subr.bf16.mxu1 %v10620_v62 }
 0x1bd   : > { %v2078_v33 = vmax.f32 %v2006_v13, %v2014_v6  ;;  %v2079_v54 = vmax.f32 %v2007_v52, %v2015_v55  ;;  %v2080_v34 = vmax.f32 %v2008_v20, %v2016_v14  ;;  %v9531_v26 = vcombine.low %v11925_v15, %v11925_v15  ;;  %v11954_v6 = vld [vmem:[#allocation2 + $0x28] sm:$0xf]  ;;  %v11964_v51 = vld [vmem:[#allocation2 + $0x30] sm:$0xf]  ;;  %v11966_v9 = vld [vmem:[#allocation2 + $0x2c] sm:$0x1] }
 0x1be   : > { %v2081_v36 = vmax.f32 %v2009_v23, %v2017_v18  ;;  %v3177_v37 = vrot.slane %v9561_v30, 1  ;;  %v9515_v27 = vcombine.low %v11927_v22, %v11935_v38  ;;  %v2783_v42 = vshrl.u32 %v9514_v35, 16  ;;  %v2724_v23 = vld [vmem:[#allocation2 + $0x30] sm:$0xe]  ;;  %v11999_v62 = vld [vmem:[#allocation2 + $0x38] sm:$0xf] }
 0x1bf   : > { %v10257_v39 = vpack.c.bf16 %v2078_v33, %v2078_v33  ;;  %v10258_v40 = vpack.c.bf16 %v2079_v54, %v2079_v54  ;;  %v10259_v41 = vpack.c.bf16 %v2080_v34, %v2080_v34  ;;  %v2785_v43 = vshll.u32 %v9514_v35, 16  ;;  %2902 = vrot.lane.b32.xlu1 %v9531_v26, %s11396_s30  ;;  %v11973_v30 = vld [vmem:[#allocation2 + $0x30] sm:$0xf]  ;;  %v2725_v35 = vld [vmem:[#allocation2 + $0x38] sm:$0xe] }
 0x1c0   : > { %v10268_v56 = vpack.c.bf16 %v2081_v36, %v2081_v36  ;;  %v9573_v0 = vcombine.low %v3176_v32, %v3177_v37  ;;  %v2792_v47 = vshll.u32 %v9515_v27, 16  ;;  %v2790_v2 = vshrl.u32 %v9515_v27, 16  ;;  %v2649_v36 = vld [vmem:[#allocation2 + $0x40] sm:$0xf]  ;;  %v11981_v27 = vld [vmem:[#allocation2 + $0x34] sm:$0x1] }
 0x1c1   : > { %v2459_v24 = vunpack.c.l.b16 %v10257_v39  ;;  %v2460_v53 = vunpack.c.l.b16 %v10258_v40  ;;  %v2461_v3 = vunpack.c.l.b16 %v10259_v41  ;;  %v2787_v60 = vrot.slane %v2785_v43, 1 }
 0x1c2   : > { %v2653_v44 = vsel %vm11581_vm7, %v10268_v56, %v2652_v46  ;;  %10472 = vmatprep.mubr.msk.bf16.mxu0 %vm3184_vm15, %v9573_v0  ;;  %v9562_v55 = vcombine.low %v2722_v45, %v11942_v49  ;;  %v2794_v63 = vrot.slane %v2792_v47, 1  ;;  %v9563_v5 = vcombine.low %v2723_v4, %v11959_v12  ;;  %v11983_v46 = vld [vmem:[#allocation2 + $0x3c] sm:$0x1]  ;;  %v11986_v56 = vld [vmem:[#allocation2 + $0x34] sm:$0x1] }
 0x1c3   : > { %v2567_v8 = vrot.slane %v2459_v24, 3  ;;  %v2569_v16 = vrot.slane %v2460_v53, 2  ;;  %v2571_v10 = vrot.slane %v2461_v3, 1  ;;  %2654 = vst [vmem:[#allocation2 + $0x44] sm:$0x1] %v2653_v44  ;;  %v2788_v29 = vor.u32 %v2787_v60, %v2783_v42 }
 0x1c4   : > { %v9516_v14 = vcombine.low %v11944_v57, %v11946_v61  ;;  %v2795_v13 = vor.u32 %v2794_v63, %v2790_v2  ;;  %v9532_v52 = vcombine.low %v11954_v6, %v11954_v6  ;;  %v9517_v20 = vcombine.low %v11957_v7, %v11966_v9  ;;  %v11991_v24 = vld [vmem:[#allocation2 + $0x10] sm:$0xf]  ;;  %v11993_v53 = vld [vmem:[#allocation2 + $0x4c] sm:$0x1]  ;;  %v2727_v4 = vld [vmem:[#allocation2 + $0x48] sm:$0xe] }
 0x1c5   : > { %v2568_v18 = vsel %vm2474_vm12, %v2567_v8, %v2566_v25  ;;  %2828 = vrot.lane.b32.xlu0 %v2788_v29, %s11396_s30  ;;  %v3178_v33 = vrot.slane %v9562_v55, 1  ;;  %v3179_v54 = vrot.slane %v9563_v5, 1  ;;  %v9533_v37 = vcombine.low %v11964_v51, %v11964_v51  ;;  %v12002_v60 = vld [vmem:[#allocation2 + $0x38] sm:$0xf] }
 0x1c6   : > { %v2570_v32 = vsel %vm2477_vm13, %v2569_v16, %v2568_v18  ;;  %v2799_v34 = vshll.u32 %v9516_v14, 16  ;;  %2830 = vrot.lane.b32.xlu1 %v2795_v13, %s11396_s30  ;;  %v2806_v26 = vshll.u32 %v9517_v20, 16  ;;  %v9564_v45 = vcombine.low %v2724_v23, %v11981_v27  ;;  %v12008_v63 = vld [vmem:[#allocation2 + $0x18] sm:$0xf]  ;;  %v12012_v18 = vld [vmem:[#allocation2 + $0x1c] sm:$0x1] }
 0x1c7   : > { %v2572_v25 = vsel %vm2480_vm14, %v2571_v10, %v2570_v32  ;;  %v9578_v40 = vcombine.low %v3178_v33, %v3179_v54  ;;  %v9565_v42 = vcombine.low %v2725_v35, %v11983_v46  ;;  %v9518_v43 = vcombine.low %v11973_v30, %v11986_v56  ;;  %v12006_v10 = vld [vmem:[#allocation2 + $0x3c] sm:$0x1]  ;;  %v2688_v54 = vld [vmem:[#allocation2 + $0x14] sm:$0x1]  ;;  %v12028_v35 = vld [vmem:[#allocation2 + $0x20] sm:$0xf] }
 0x1c8   : > { %v2587_v39 = vpack.c.b16 %v2572_v25, %v2572_v25  ;;  %v2801_v41 = vrot.slane %v2799_v34, 1  ;;  %v2808_v0 = vrot.slane %v2806_v26, 1  ;;  %v2797_v47 = vshrl.u32 %v9516_v14, 16 }
 0x1c9   : > { %2904 = vrot.lane.b32.xlu0 %v9532_v52, %s11396_s30  ;;  %10473 = vmatmul.mubr.msk.bf16.vlgmr.msra.gmra.mxu0 %vm3184_vm15, %v9578_v40  ;;  %v2804_v44 = vshrl.u32 %v9517_v20, 16  ;;  %v3180_v2 = vrot.slane %v9564_v45, 1  ;;  %v3181_v55 = vrot.slane %v9565_v42, 1  ;;  %v2813_v16 = vshll.u32 %v9518_v43, 16  ;;  %v2695_v42 = vld [vmem:[#allocation2 + $0x8] sm:$0xe] }
 0x1ca   : > { %v2650_v3 = vsel %vm11599_vm8, %v2587_v39, %v2649_v36  ;;  %2906 = vrot.lane.b32.xlu1 %v9533_v37, %s11396_s30  ;;  %v2802_v8 = vor.u32 %v2801_v41, %v2797_v47  ;;  %v9552_v31 = vcombine.low %v11991_v24, %v11916_v11  ;;  %v9519_v14 = vcombine.low %v11999_v62, %v12006_v10  ;;  %v12026_v34 = vld [vmem:[#allocation2 + $0x44] sm:$0x1]  ;;  %v12037_v47 = vld [vmem:[#allocation2 + $0x28] sm:$0xf] }
 0x1cb   : > { %2651 = vst [vmem:[#allocation2 + $0x40] sm:$0xf] %v2650_v3  ;;  %v2809_v29 = vor.u32 %v2808_v0, %v2804_v44  ;;  %v9583_v5 = vcombine.low %v3180_v2, %v3181_v55  ;;  %v9534_v13 = vcombine.low %v12002_v60, %v12002_v60  ;;  %v9567_v52 = vcombine.low %v2727_v4, %v11993_v53  ;;  %v12040_v4 = vld [vmem:[#allocation2 + $0x2c] sm:$0x1]  ;;  %v2690_v44 = vld [vmem:[#allocation2 + $0x24] sm:$0x1] }
 0x1cc   : > { %v12020_v11 = vcombine.low %v11896_v1, %v12012_v18  ;;  %v2820_v20 = vshll.u32 %v9519_v14, 16  ;;  %v9553_v23 = vcombine.low %v12008_v63, %v11923_v21  ;;  %v2815_v32 = vrot.slane %v2813_v16, 1 }
 0x1cd   : > { %2832 = vrot.lane.b32.xlu0 %v2802_v8, %s11396_s30  ;;  %10476 = vmatprep.mubr.msk.bf16.mxu0 %vm3184_vm15, %v9583_v5  ;;  %v3083_v33 = vshll.u32 %v9552_v31, 16  ;;  %v12031_v25 = vcombine.low %v11852_v48, %v2688_v54  ;;  %v2811_v1 = vshrl.u32 %v9518_v43, 16  ;;  %v3183_v26 = vrot.slane %v9567_v52, 1 }
 0x1ce   : > { %2834 = vrot.lane.b32.xlu1 %v2809_v29, %s11396_s30  ;;  %v2822_v21 = vrot.slane %v2820_v20, 1  ;;  %v3090_v41 = vshll.u32 %v9553_v23, 16  ;;  %v9554_v3 = vcombine.low %v12028_v35, %v11942_v49  ;;  %v2818_v43 = vshrl.u32 %v9519_v14, 16  ;;  %v12050_v49 = vld [vmem:[#allocation2 + $0xc] sm:$0x1] }
 0x1cf   : > { %v2816_v45 = vor.u32 %v2815_v32, %v2811_v1  ;;  %v3085_v0 = vrot.slane %v3083_v33, 1  ;;  %v3081_v2 = vshrl.u32 %v9552_v31, 16  ;;  %v12045_v55 = vcombine.low %v11954_v6, %v12040_v4  ;;  %v2696_v31 = vld [vmem:[#allocation2 + $0x10] sm:$0xe]  ;;  %v12055_v32 = vld [vmem:[#allocation2 + $0x34] sm:$0x1] }
 0x1d0   : > { %v12048_v8 = vcombine.low %v11925_v15, %v2690_v44  ;;  %v2823_v29 = vor.u32 %v2822_v21, %v2818_v43  ;;  %v3092_v5 = vrot.slane %v3090_v41, 1  ;;  %v9555_v14 = vcombine.low %v12037_v47, %v11959_v12  ;;  %v12059_v6 = vld [vmem:[#allocation2 + $0x30] sm:$0xf]  ;;  %v12061_v33 = vld [vmem:[#allocation2 + $0x3c] sm:$0x1] }
 0x1d1   : > { %2908 = vrot.lane.b32.xlu0 %v9534_v13, %s11396_s30  ;;  %v3086_v13 = vor.u32 %v3085_v0, %v3081_v2  ;;  %v9544_v52 = vcombine.low %v2695_v42, %v12050_v49  ;;  %v3097_v20 = vshll.u32 %v9554_v3, 16  ;;  %v3088_v15 = vshrl.u32 %v9553_v23, 16  ;;  %v12074_v41 = vld [vmem:[#allocation2 + $0x38] sm:$0xf] }
 0x1d2   : > { %v2686_v36 = vld [vmem:[#allocation2 + $0x40] sm:$0xf]  ;;  %v12066_v12 = vcombine.low %v12002_v60, %v12061_v33  ;;  %v12070_v1 = vcombine.low %v11964_v51, %v12055_v32  ;;  %v9556_v23 = vcombine.low %v12059_v6, %v11981_v27  ;;  %v2697_v0 = vld [vmem:[#allocation2 + $0x18] sm:$0xe]  ;;  %v3095_v51 = vshrl.u32 %v9554_v3, 16 }
 0x1d3   : > { %v2726_v37 = vld [vmem:[#allocation2 + $0x40] sm:$0xe]  ;;  %v9535_v39 = vcombine.low %v2686_v36, %v2686_v36  ;;  %v3099_v21 = vrot.slane %v3097_v20, 1  ;;  %v9546_v2 = vcombine.low %v2697_v0, %v12012_v18  ;;  %v2699_v18 = vld [vmem:[#allocation2 + $0x28] sm:$0xe]  ;;  %vm4368_vm6 = vcmask 1042432  }
 0x1d4   : > { %v9566_v40 = vcombine.low %v2726_v37, %v12026_v34  ;;  %v3093_v37 = vor.u32 %v3092_v5, %v3088_v15  ;;  %v3111_v27 = vshll.u32 %v9556_v23, 16  ;;  %v12084_v5 = vld [vmem:[#allocation2 + $0x40] sm:$0xf]  ;;  %v3109_v15 = vshrl.u32 %v9556_v23, 16  ;;  %v2701_v23 = vld [vmem:[#allocation2 + $0x38] sm:$0xe] }
 0x1d5   : > { %2910 = vrot.lane.b32.xlu1 %v9535_v39, %s11396_s30  ;;  %2836 = vrot.lane.b32.xlu0 %v2816_v45, %s11396_s30  ;;  %v3104_v39 = vshll.u32 %v9555_v14, 16  ;;  %v2694_v45 = vld [vmem:[#allocation2 + $0x44] sm:$0x1]  ;;  %v3100_v43 = vor.u32 %v3099_v21, %v3095_v51  ;;  %v3018_v20 = vrot.slane %v9546_v2, 1  ;;  %v2700_v21 = vld [vmem:[#allocation2 + $0x30] sm:$0xe] }
 0x1d6   : > { %v3182_v48 = vrot.slane %v9566_v40, 1  ;;  %v3016_v40 = vrot.slane %v9544_v52, 1  ;;  %v12077_v60 = vcombine.low %v2686_v36, %v2694_v45  ;;  %v12087_v36 = vld [vmem:[#allocation2 + $0x48] sm:$0xf]  ;;  %vm4369_vm7 = vsmask.f32 2306 }
 0x1d7   : > { %vm12510_vm8 = vmand %vm4368_vm6, %vm4369_vm7  ;;  %vm6106_vm12 = vcmask 1041409   ;;  %vm6107_vm14 = vsmask.f32 7942  ;;  %vm6229_vm7 = vsmask.f32 3338 }
 0x1d8   : > { %v9588_v16 = vcombine.low %v3182_v48, %v3183_v26  ;;  %v9545_v26 = vcombine.low %v2696_v31, %v2688_v54  ;;  %v3106_v48 = vrot.slane %v3104_v39, 1  ;;  %v9557_v54 = vcombine.low %v12074_v41, %v11983_v46  ;;  %vm6108_vm3 = vmand %vm6106_vm12, %vm6107_vm14 }
 0x1d9   : > { %2838 = vrot.lane.b32.xlu1 %v2823_v29, %s11396_s30  ;;  %3136 = vrot.lane.b32.xlu0 %v3086_v13, %s11396_s30  ;;  %v3102_v29 = vshrl.u32 %v9555_v14, 16  ;;  %v3113_v31 = vrot.slane %v3111_v27, 1  ;;  %v9558_v46 = vcombine.low %v12084_v5, %v12026_v34  ;;  %v9559_v14 = vcombine.low %v12087_v36, %v11993_v53 }
 0x1da   : > { %10477 = vmatmul.mubr.msk.bf16.gmra.mxu0 %vm3184_vm15, %v9588_v16  ;;  %v3017_v42 = vrot.slane %v9545_v26, 1  ;;  %v2698_v16 = vld [vmem:[#allocation2 + $0x20] sm:$0xe]  ;;  %v3118_v52 = vshll.u32 %v9557_v54, 16  ;;  %v3116_v0 = vshrl.u32 %v9557_v54, 16  ;;  %v9550_v54 = vcombine.low %v2701_v23, %v12061_v33  ;;  %v10624_v23 = vld [vmem:[%s13981_s3 + $0xb0] sm:$0xff]  }
 0x1db   : > { %v3107_v3 = vor.u32 %v3106_v48, %v3102_v29  ;;  %v9547_v13 = vcombine.low %v2698_v16, %v2690_v44  ;;  %v3114_v39 = vor.u32 %v3113_v31, %v3109_v15  ;;  %v9548_v44 = vcombine.low %v2699_v18, %v12040_v4  ;;  %v2702_v29 = vld [vmem:[#allocation2 + $0x40] sm:$0xe]  ;;  %v2825_v31 = vpop.permute.xlu1 %2824  ;;  %v11328_v18 = vld [vmem:[#allocation2 + $0x4] sm:$0x1] }
 0x1dc   : > { %v3120_v26 = vrot.slane %v3118_v52, 1  ;;  %v3132_v34 = vshll.u32 %v9559_v14, 16  ;;  %v3123_v4 = vshrl.u32 %v9558_v46, 16 }
 0x1dd   : > { %3138 = vrot.lane.b32.xlu1 %v3093_v37, %s11396_s30  ;;  %3024 = vrot.lane.b32.xlu0 %v3016_v40, %s11396_s30  ;;  %v3019_v37 = vrot.slane %v9547_v13, 1  ;;  %v3125_v40 = vshll.u32 %v9558_v46, 16  ;;  %v3020_v53 = vrot.slane %v9548_v44, 1  ;;  %v3022_v13 = vrot.slane %v9550_v54, 1  ;;  %v2672_v46 = vld [vmem:[#allocation2 + $0x8] sm:$0xe] }
 0x1de   : > { %v3121_v51 = vor.u32 %v3120_v26, %v3116_v0  ;;  %v3134_v2 = vrot.slane %v3132_v34, 1  ;;  %v10631_v54 = vld [vmem:[%s13981_s3 + $0x98] sm:$0xff]  }
 0x1df   : > { %v3127_v48 = vrot.slane %v3125_v40, 1  ;;  %v11330_v40 = vld [vmem:[#allocation2 + $0x8] sm:$0xf] }
 0x1e1   : > { %3026 = vrot.lane.b32.xlu1 %v3017_v42, %s11396_s30  ;;  %3140 = vrot.lane.b32.xlu0 %v3100_v43, %s11396_s30  ;;  %v9549_v42 = vcombine.low %v2700_v21, %v12055_v32  ;;  %v3130_v43 = vshrl.u32 %v9559_v14, 16  ;;  %v3128_v16 = vor.u32 %v3127_v48, %v3123_v4  ;;  %v9551_v32 = vcombine.low %v2702_v29, %v2694_v45  ;;  %v11329_v45 = vld [vmem:[#allocation2] sm:$0xf]  ;;  %v10623_v48 = vld [vmem:[%s13981_s3 + $0xf0] sm:$0xff]  }
 0x1e2   : > { %v9521_v14 = vcombine.low %v2672_v46, %v11824_v59  ;;  %v3187_v44 = vsel %vm3184_vm15, %v11329_v45, %v2825_v31  ;;  %v10621_v59 = vld [vmem:[%s13981_s3 + $0xb8] sm:$0xff]   ;;  %v10628_v4 = vld [vmem:[%s13981_s3 + $0xe0] sm:$0xff]   ;;  %v10633_v29 = vld [vmem:[%s13981_s3 + $0xd0] sm:$0xff]  }
 0x1e3   : > { %v3021_v27 = vrot.slane %v9549_v42, 1  ;;  %v3023_v52 = vrot.slane %v9551_v32, 1  ;;  %v10635_v32 = vld [vmem:[%s13981_s3 + $0xc8] sm:$0xff]   ;;  %v2673_v31 = vld [vmem:[#allocation2 + $0x10] sm:$0xe] }
 0x1e4   : > { %v2674_v46 = vld [vmem:[#allocation2 + $0x18] sm:$0xe] }
 0x1e5   : > { %3142 = vrot.lane.b32.xlu1 %v3107_v3, %s11396_s30  ;;  %3028 = vrot.lane.b32.xlu0 %v3018_v20, %s11396_s30  ;;  %v3135_v3 = vor.u32 %v3134_v2, %v3130_v43  ;;  %v2671_v20 = vld [vmem:[#allocation2] sm:$0xe]  ;;  %v10625_v43 = vld [vmem:[%s13981_s3 + $0xe8] sm:$0xff]  }
 0x1e6   : > { %v9520_v33 = vcombine.low %v2671_v20, %v11328_v18  ;;  %v10627_v2 = vld [vmem:[%s13981_s3 + $0xa8] sm:$0xff]   ;;  %v10638_v20 = vld [vmem:[%s13981_s3 + $0x80] sm:$0xff]   ;;  %v9522_v18 = vcombine.low %v2673_v31, %v11931_v19 }
 0x1e8   : > { %v2864_v26 = vrot.slane %v9520_v33, 1  ;;  %v9523_v33 = vcombine.low %v2674_v46, %v11935_v38 }
 0x1e9   : > { %3030 = vrot.lane.b32.xlu1 %v3019_v37, %s11396_s30  ;;  %3144 = vrot.lane.b32.xlu0 %v3114_v39, %s11396_s30  ;;  %v2865_v39 = vrot.slane %v9521_v14, 1 }
 0x1ea   : > { %v2897_v15 = vpop.permute.xlu0 %2896 }
 0x1eb   : > { %v3211_v34 = vsel %vm3184_vm15, %v2864_v26, %v2897_v15  ;;  %v2866_v15 = vrot.slane %v9522_v18, 1 }
 0x1ed   : > { %3146 = vrot.lane.b32.xlu1 %v3121_v51, %s11396_s30  ;;  %3032 = vrot.lane.b32.xlu0 %v3020_v53, %s11396_s30 }
 0x1f1   : > { %3034 = vrot.lane.b32.xlu1 %v3021_v27, %s11396_s30  ;;  %3148 = vrot.lane.b32.xlu0 %v3128_v16, %s11396_s30  ;;  %v10629_v27 = vld [vmem:[%s13981_s3 + $0xa0] sm:$0xff]   ;;  %v10630_v16 = vld [vmem:[%s13981_s3 + $0xd8] sm:$0xff]  }
 0x1f5   : > { %3150 = vrot.lane.b32.xlu1 %v3135_v3, %s11396_s30  ;;  %3036 = vrot.lane.b32.xlu0 %v3022_v13, %s11396_s30  ;;  %v10634_v3 = vld [vmem:[%s13981_s3 + $0x90] sm:$0xff]   ;;  %v10636_v13 = vld [vmem:[%s13981_s3 + $0x88] sm:$0xff]  }
 0x1f9   : > { %3038 = vrot.lane.b32.xlu1 %v3023_v52, %s11396_s30  ;;  %v10637_v52 = vld [vmem:[%s13981_s3 + $0xc0] sm:$0xff]   ;;  %s377_s30 = sand.u32 1, %s11384_s18  }
 0x1fa   : > { %s378_s14 = scalar_lea.vmem [#allocation5], %s377_s30  ;;  %s9199_s24 = scalar_lea.sflag [#allocation6], %s377_s30 }
 0x1fb   : > { %s9211_s0 = sshll.u32 %s378_s14, 4  ;;  %s9212_s0 = int_to_ptr.vmem [resolvable:$true] %s9211_s0 }
 0x1fc   : > { %s11332_s25 = scalar_lea.vmem %s9212_s0, 16  ;;  %p11339_p0 = scmp.lt.s32.totalorder %s9212_s0, %s11337_s29 }
 0x1fd   : > { %p11333_p11 = scmp.ne.s32.totalorder %s9212_s0, %s11332_s25  ;;  %p11340_p1 = scmp.lt.s32.totalorder %s11338_s12, %s11332_s25 }
 0x1ff   : > { %p11334_p12 = pnand %p11333_p11, %p11497_p5  ;;  %p11341_p2 = por %p11340_p1, %p11339_p0 }
 0x200   : > { %v2827_v37 = vpop.permute.xlu1 %2826 }
 0x201   : > { %v3190_v21 = vsel %vm3184_vm15, %v11330_v40, %v2827_v37  ;;  %v2867_v37 = vrot.slane %v9523_v33, 1  ;;  %v2675_v40 = vld [vmem:[#allocation2 + $0x20] sm:$0xe]  ;;  %p11335_p13 = pneg %p11334_p12 }
 0x202   : > { %v9569_v53 = vcombine.low %v3187_v44, %v3190_v21  ;;  %v2676_v21 = vld [vmem:[#allocation2 + $0x28] sm:$0xe] }
 0x203   : > { %p11342_p3 = pnand %p11341_p2, %p11335_p13 }
 0x205   : > { %v2899_v0 = vpop.permute.xlu0 %2898 }
 0x206   : > { %v3214_v51 = vsel %vm3184_vm15, %v2865_v39, %v2899_v0 }
 0x207   : > { %v9570_v42 = vcombine.low %v3211_v34, %v3214_v51  ;;  %v9524_v34 = vcombine.low %v2675_v40, %v11946_v61  ;;  %v9525_v51 = vcombine.low %v2676_v21, %v11966_v9  ;;  %v2678_v9 = vld [vmem:[#allocation2 + $0x38] sm:$0xe] }
 0x209   : > { %3728 = vmatprep.mubr.bf16.mxu1 %v9570_v42 }
 0x20a   : > { %3729 = vmatmul.mubr.bf16.vlgmr.msra.gmra.mxu1 %v9569_v53  ;;  %v2868_v53 = vrot.slane %v9524_v34, 1 }
 0x20b   : > { %10349 = vmatpush3.bf16.msra.mxu1 %v10621_v59 }
 0x20c   : > { %10350 = vmatprep.subr.bf16.mxu1 %v10623_v48 }
 0x20f   : > { %10351 = vmatpush3.bf16.msra.mxu1 %v10624_v23  ;;  %v2869_v23 = vrot.slane %v9525_v51, 1 }
 0x210   : > { %10352 = vmatprep.subr.bf16.mxu1 %v10625_v43 }
 0x213   : > { %10353 = vmatpush3.bf16.msra.mxu1 %v10627_v2 }
 0x214   : > { %10354 = vmatprep.subr.bf16.mxu1 %v10628_v4 }
 0x217   : > { %10355 = vmatpush3.bf16.msra.mxu1 %v10629_v27  ;;  %v2677_v27 = vld [vmem:[#allocation2 + $0x30] sm:$0xe] }
 0x218   : > { %10356 = vmatprep.subr.bf16.mxu1 %v10630_v16 }
 0x21b   : > { %10357 = vmatpush3.bf16.msra.mxu1 %v10631_v54 }
 0x21c   : > { %10358 = vmatprep.subr.bf16.mxu1 %v10633_v29  ;;  %v9526_v29 = vcombine.low %v2677_v27, %v11986_v56  ;;  %v2946_v56 = vshll.u32 %v12031_v25, 16 }
 0x21e   : > { %v2870_v31 = vrot.slane %v9526_v29, 1 }
 0x21f   : > { %10359 = vmatpush3.bf16.msra.mxu1 %v10634_v3  ;;  %v9527_v3 = vcombine.low %v2678_v9, %v12006_v10 }
 0x220   : > { %10360 = vmatprep.subr.bf16.mxu1 %v10635_v32  ;;  %v2901_v14 = vpop.permute.xlu0 %2900 }
 0x221   : > { %v3217_v39 = vsel %vm3184_vm15, %v2866_v15, %v2901_v14  ;;  %v2871_v46 = vrot.slane %v9527_v3, 1 }
 0x223   : > { %10361 = vmatpush3.bf16.msra.mxu1 %v10636_v13 }
 0x224   : > { %10362 = vmatprep.subr.bf16.mxu1 %v10637_v52  ;;  %v11331_v52 = vld [vmem:[#allocation2 + $0x8] sm:$0xf] }
 0x227   : > { %10363 = vmatpush3.bf16.msra.mxu1 %v10638_v20  ;;  %v9536_v20 = vcombine.low %v11331_v52, %v12050_v49 }
 0x229   : > { %v2937_v21 = vshrl.u32 %v9536_v20, 16 }
 0x231   : > { %v2903_v26 = vpop.permute.xlu1 %2902 }
 0x232   : > { %v3220_v45 = vsel %vm3184_vm15, %v2867_v37, %v2903_v26 }
 0x233   : > { %v9575_v44 = vcombine.low %v3217_v39, %v3220_v45 }
 0x235   : > { %3736 = vmatprep.mubr.bf16.mxu1 %v9575_v44  ;;  %v2948_v44 = vrot.slane %v2946_v56, 1 }
 0x237   : > { %v2829_v0 = vpop.permute.xlu0 %2828 }
 0x238   : > { %v2831_v19 = vpop.permute.xlu1 %2830  ;;  %v3193_v38 = vsel %vm3184_vm15, %v11921_v17, %v2829_v0 }
 0x239   : > { %v3196_v42 = vsel %vm3184_vm15, %v11927_v22, %v2831_v19  ;;  %v2944_v19 = vshrl.u32 %v12031_v25, 16 }
 0x23a   : > { %v9574_v59 = vcombine.low %v3193_v38, %v3196_v42  ;;  %v2953_v38 = vshll.u32 %v12020_v11, 16 }
 0x23b   : > { %v2905_v48 = vpop.permute.xlu0 %2904 }
 0x23c   : > { %3737 = vmatmul.mubr.bf16.gmra.mxu1 %v9574_v59  ;;  %v2907_v43 = vpop.permute.xlu1 %2906  ;;  %v3223_v2 = vsel %vm3184_vm15, %v2868_v53, %v2905_v48  ;;  %v2949_v59 = vor.u32 %v2948_v44, %v2944_v19  ;;  %v2979_v44 = vshrl.u32 %v12066_v12, 16 }
 0x23d   : > { %v3226_v4 = vsel %vm3184_vm15, %v2869_v23, %v2907_v43 }
 0x23e   : > { %v9580_v61 = vcombine.low %v3223_v2, %v3226_v4  ;;  %v2955_v2 = vrot.slane %v2953_v38, 1 }
 0x23f   : > { %v2833_v16 = vpop.permute.xlu0 %2832 }
 0x240   : > { %3744 = vmatprep.mubr.bf16.mxu1 %v9580_v61  ;;  %v2835_v54 = vpop.permute.xlu1 %2834  ;;  %v3199_v17 = vsel %vm3184_vm15, %v11944_v57, %v2833_v16  ;;  %v2951_v61 = vshrl.u32 %v12020_v11, 16  ;;  %v2958_v16 = vshrl.u32 %v12048_v8, 16 }
 0x241   : > { %v3202_v22 = vsel %vm3184_vm15, %v11957_v7, %v2835_v54  ;;  %v2939_v7 = vshll.u32 %v9536_v20, 16 }
 0x242   : > { %v9579_v32 = vcombine.low %v3199_v17, %v3202_v22  ;;  %v2967_v17 = vshll.u32 %v12045_v55, 16  ;;  %v2974_v22 = vshll.u32 %v12070_v1, 16  ;;  %v2956_v29 = vor.u32 %v2955_v2, %v2951_v61  ;;  %v10639_v2 = vld [vmem:[%s13983_s5 + $0x70] ss:$8 sps:$4 sm:$0xff]   ;;  %v10647_v61 = vld [vmem:[%s13983_s5 + $0x64] ss:$8 sps:$4 sm:$0xff]  }
 0x243   : > { %v2909_v13 = vpop.permute.xlu0 %2908  ;;  %v2941_v45 = vrot.slane %v2939_v7, 1  ;;  %v2988_v7 = vshll.u32 %v12077_v60, 16 }
 0x244   : > { %3745 = vmatmul.mubr.bf16.gmra.mxu1 %v9579_v32  ;;  %v3229_v33 = vsel %vm3184_vm15, %v2870_v31, %v2909_v13  ;;  %v2969_v20 = vrot.slane %v2967_v17, 1  ;;  %v2976_v31 = vrot.slane %v2974_v22, 1  ;;  %v4262_v17 = vld [vmem:[#allocation3 + $0xc] sm:$0x4] }
 0x245   : > { %v2942_v42 = vor.u32 %v2941_v45, %v2937_v21  ;;  %v2990_v45 = vrot.slane %v2988_v7, 1  ;;  %v2986_v21 = vshrl.u32 %v12077_v60, 16  ;;  %v4256_v60 = vld [vmem:[#allocation3 + $0x4] sm:$0x4]  ;;  %v10671_v7 = vld [vmem:[%s13983_s5 + $0x24] ss:$8 sps:$4 sm:$0xff]  }
 0x247   : > { %v2911_v18 = vpop.permute.xlu1 %2910  ;;  %v2837_v14 = vpop.permute.xlu0 %2836  ;;  %v2991_v19 = vor.u32 %v2990_v45, %v2986_v21  ;;  %v10686_v45 = vld [vmem:[%s13983_s5 + $0x104] ss:$8 sps:$4 sm:$0xff]   ;;  %v10692_v21 = vld [vmem:[%s13983_s5 + $0x1f4] ss:$8 sps:$4 sm:$0xff]  }
 0x248   : > { %v3232_v57 = vsel %vm3184_vm15, %v2871_v46, %v2911_v18  ;;  %v3205_v37 = vsel %vm3184_vm15, %v11973_v30, %v2837_v14  ;;  %v2965_v46 = vshrl.u32 %v12045_v55, 16  ;;  %v2972_v14 = vshrl.u32 %v12070_v1, 16 }
 0x249   : > { %v9585_v15 = vcombine.low %v3229_v33, %v3232_v57 }
 0x24a   : > { %v2970_v56 = vor.u32 %v2969_v20, %v2965_v46  ;;  %v4250_v20 = vld [vmem:[#allocation3 + $0x10] sm:$0x1] }
 0x24b   : > { %3752 = vmatprep.mubr.bf16.mxu1 %v9585_v15  ;;  %v2839_v10 = vpop.permute.xlu1 %2838  ;;  %v3137_v26 = vpop.permute.xlu0 %3136  ;;  %v2981_v15 = vshll.u32 %v12066_v12, 16  ;;  %v10660_v46 = vld [vmem:[%s13983_s5 + $0x140] ss:$8 sps:$4 sm:$0xff]   ;;  %v10881_v12 = vld [vmem:[%s13985_s7 + $0x74] ss:$8 sps:$4 sm:$0xff]  }
 0x24c   : > { %v3208_v49 = vsel %vm3184_vm15, %v11999_v62, %v2839_v10  ;;  %v3259_v0 = vsel %vm3184_vm15, %v11991_v24, %v3137_v26  ;;  %v2960_v62 = vshll.u32 %v12048_v8, 16  ;;  %v2977_v10 = vor.u32 %v2976_v31, %v2972_v14  ;;  %v10657_v31 = vld [vmem:[%s13983_s5 + $0x40] ss:$8 sps:$4 sm:$0xff]   ;;  %v10665_v14 = vld [vmem:[%s13983_s5 + $0x34] ss:$8 sps:$4 sm:$0xff]  }
 0x24d   : > { %v9584_v39 = vcombine.low %v3205_v37, %v3208_v49 }
 0x24e   : > { %v2962_v4 = vrot.slane %v2960_v62, 1 }
 0x24f   : > { %3753 = vmatmul.mubr.bf16.gmra.mxu1 %v9584_v39  ;;  %v3139_v40 = vpop.permute.xlu1 %3138  ;;  %v3025_v34 = vpop.permute.xlu0 %3024  ;;  %v2983_v39 = vrot.slane %v2981_v15, 1  ;;  %v10668_v15 = vld [vmem:[%s13983_s5 + $0x134] ss:$8 sps:$4 sm:$0xff]  }
 0x250   : > { %v3262_v51 = vsel %vm3184_vm15, %v12008_v63, %v3139_v40  ;;  %v3235_v48 = vsel %vm3184_vm15, %v2942_v42, %v3025_v34  ;;  %v2963_v3 = vor.u32 %v2962_v4, %v2958_v16  ;;  %v10641_v4 = vld [vmem:[%s13983_s5 + $0x74] ss:$8 sps:$4 sm:$0xff]   ;;  %v10648_v16 = vld [vmem:[%s13983_s5 + $0x160] ss:$8 sps:$4 sm:$0xff]  }
 0x251   : > { %v9572_v30 = vcombine.low %v3259_v0, %v3262_v51  ;;  %v2984_v51 = vor.u32 %v2983_v39, %v2979_v44  ;;  %5738 = vmatprep.subr.bf16.mxu1 %v10641_v4  ;;  %v10683_v39 = vld [vmem:[%s13983_s5 + $0x4] ss:$8 sps:$4 sm:$0xff]   ;;  %v10684_v44 = vld [vmem:[%s13983_s5 + $0x100] ss:$8 sps:$4 sm:$0xff]  }
 0x253   : > { %3793 = vmatprep.mubr.bf16.mxu1 %v9572_v30  ;;  %v3027_v53 = vpop.permute.xlu1 %3026  ;;  %v3141_v23 = vpop.permute.xlu0 %3140 }
 0x254   : > { %v3238_v24 = vsel %vm3184_vm15, %v2949_v59, %v3027_v53  ;;  %v3265_v25 = vsel %vm3184_vm15, %v12028_v35, %v3141_v23  ;;  %v4257_v53 = vsel %vm12228_vm5, 0, %v4256_v60  ;;  %v4259_v23 = vld [vmem:[#allocation3 + $0x8] sm:$0x4]  ;;  %v10704_v60 = vld [vmem:[%s13983_s5 + $0x1d4] ss:$8 sps:$4 sm:$0xff]  }
 0x255   : > { %v9571_v43 = vcombine.low %v3235_v48, %v3238_v24  ;;  %4258 = vst [vmem:[#allocation3 + $0x4] sm:$0x4] %v4257_v53  ;;  %v4244_v48 = vld [vmem:[#allocation3 + $0x8] sm:$0x1] }
 0x256   : > { %v4245_v24 = vsel %vm12221_vm4, 0, %v4244_v48  ;;  %v10699_v59 = vld [vmem:[%s13983_s5 + $0xd0] ss:$8 sps:$4 sm:$0xff]  }
 0x257   : > { %3794 = vmatmul.mubr.bf16.vlgmr.msra.gmra.mxu1 %v9571_v43  ;;  %v3143_v63 = vpop.permute.xlu1 %3142  ;;  %v3029_v27 = vpop.permute.xlu0 %3028  ;;  %v4260_v43 = vsel %vm12228_vm5, 0, %v4259_v23  ;;  %4246 = vst [vmem:[#allocation3 + $0x8] sm:$0x1] %v4245_v24  ;;  %v10702_v48 = vld [vmem:[%s13983_s5 + $0x1d0] ss:$8 sps:$4 sm:$0xff]  }
 0x258   : > { %v3268_v9 = vsel %vm3184_vm15, %v12037_v47, %v3143_v63  ;;  %v3241_v13 = vsel %vm3184_vm15, %v2956_v29, %v3029_v27  ;;  %4261 = vst [vmem:[#allocation3 + $0x8] sm:$0x4] %v4260_v43  ;;  %v10642_v63 = vld [vmem:[%s13983_s5 + $0x170] ss:$8 sps:$4 sm:$0xff]   ;;  %v10650_v27 = vld [vmem:[%s13983_s5 + $0x164] ss:$8 sps:$4 sm:$0xff]   ;;  %5739 = vmatpush1.bf16.msra.mxu1 %v10639_v2 }
 0x259   : > { %v9577_v54 = vcombine.low %v3265_v25, %v3268_v9  ;;  %v10644_v25 = vld [vmem:[%s13983_s5 + $0x174] ss:$8 sps:$4 sm:$0xff]   ;;  %v10645_v9 = vld [vmem:[%s13983_s5 + $0x60] ss:$8 sps:$4 sm:$0xff]   ;;  %5740 = vmatprep.subr.bf16.mxu1 %v10647_v61  ;;  %v4263_v29 = vsel %vm12228_vm5, 0, %v4262_v17 }
 0x25a   : > { %5781 = vmatprep.subr.bf16.mxu0 %v10644_v25  ;;  %4264 = vst [vmem:[#allocation3 + $0xc] sm:$0x4] %v4263_v29  ;;  %v10707_v23 = vld [vmem:[%s13983_s5 + $0xc4] ss:$8 sps:$4 sm:$0xff]   ;;  %v10705_v2 = vld [vmem:[%s13983_s5 + $0xc0] ss:$8 sps:$4 sm:$0xff]  }
 0x25b   : > { %3801 = vmatprep.mubr.bf16.mxu1 %v9577_v54  ;;  %v3031_v32 = vpop.permute.xlu1 %3030  ;;  %v3145_v35 = vpop.permute.xlu0 %3144  ;;  %5782 = vmatpush1.bf16.msra.mxu0 %v10642_v63  ;;  %v4247_v54 = vld [vmem:[#allocation3 + $0xc] sm:$0x1]  ;;  %v10710_v24 = vld [vmem:[%s13983_s5 + $0x1c4] ss:$8 sps:$4 sm:$0xff]   ;;  %v10708_v63 = vld [vmem:[%s13983_s5 + $0x1c0] ss:$8 sps:$4 sm:$0xff]  }
 0x25c   : > { %v3244_v11 = vsel %vm3184_vm15, %v2963_v3, %v3031_v32  ;;  %v3271_v8 = vsel %vm3184_vm15, %v12059_v6, %v3145_v35  ;;  %5783 = vmatprep.subr.bf16.mxu0 %v10650_v27  ;;  %v4248_v22 = vsel %vm12221_vm4, 0, %v4247_v54  ;;  %5741 = vmatpush1.bf16.msra.mxu1 %v10645_v9  ;;  %v10651_v3 = vld [vmem:[%s13983_s5 + $0x50] ss:$8 sps:$4 sm:$0xff]   ;;  %v10653_v32 = vld [vmem:[%s13983_s5 + $0x54] ss:$8 sps:$4 sm:$0xff]  }
 0x25d   : > { %v9576_v52 = vcombine.low %v3241_v13, %v3244_v11  ;;  %4249 = vst [vmem:[#allocation3 + $0xc] sm:$0x1] %v4248_v22  ;;  %v10654_v13 = vld [vmem:[%s13983_s5 + $0x150] ss:$8 sps:$4 sm:$0xff]   ;;  %v10656_v35 = vld [vmem:[%s13983_s5 + $0x154] ss:$8 sps:$4 sm:$0xff]   ;;  %5742 = vmatprep.subr.bf16.mxu1 %v10653_v32 }
 0x25e   : > { %v10659_v11 = vld [vmem:[%s13983_s5 + $0x44] ss:$8 sps:$4 sm:$0xff]   ;;  %v10713_v25 = vld [vmem:[%s13983_s5 + $0xb4] ss:$8 sps:$4 sm:$0xff]   ;;  %v10711_v9 = vld [vmem:[%s13983_s5 + $0xb0] ss:$8 sps:$4 sm:$0xff]  }
 0x25f   : > { %3802 = vmatmul.mubr.bf16.gmra.mxu1 %v9576_v52  ;;  %v3147_v47 = vpop.permute.xlu1 %3146  ;;  %v3033_v18 = vpop.permute.xlu0 %3032  ;;  %5784 = vmatpush1.bf16.msra.mxu0 %v10648_v16  ;;  %v10662_v52 = vld [vmem:[%s13983_s5 + $0x144] ss:$8 sps:$4 sm:$0xff]   ;;  %v10716_v61 = vld [vmem:[%s13983_s5 + $0x1b4] ss:$8 sps:$4 sm:$0xff]   ;;  %v10714_v54 = vld [vmem:[%s13983_s5 + $0x1b0] ss:$8 sps:$4 sm:$0xff]  }
 0x260   : > { %v3274_v33 = vsel %vm3184_vm15, %v12074_v41, %v3147_v47  ;;  %v3247_v26 = vsel %vm3184_vm15, %v2970_v56, %v3033_v18  ;;  %5785 = vmatprep.subr.bf16.mxu0 %v10656_v35  ;;  %5743 = vmatpush1.bf16.msra.mxu1 %v10651_v3  ;;  %v4251_v47 = vsel %vm12221_vm4, 0, %v4250_v20  ;;  %v10674_v56 = vld [vmem:[%s13983_s5 + $0x124] ss:$8 sps:$4 sm:$0xff]   ;;  %v10717_v3 = vld [vmem:[%s13983_s5 + $0xa0] ss:$8 sps:$4 sm:$0xff]  }
 0x261   : > { %v9582_v57 = vcombine.low %v3271_v8, %v3274_v33  ;;  %v4265_v8 = vld [vmem:[#allocation3 + $0x10] sm:$0x4]  ;;  %5744 = vmatprep.subr.bf16.mxu1 %v10659_v11  ;;  %4252 = vst [vmem:[#allocation3 + $0x10] sm:$0x1] %v4251_v47  ;;  %v10663_v33 = vld [vmem:[%s13983_s5 + $0x30] ss:$8 sps:$4 sm:$0xff]  }
 0x262   : > { %v4266_v18 = vsel %vm12228_vm5, 0, %v4265_v8  ;;  %v10719_v17 = vld [vmem:[%s13983_s5 + $0xa4] ss:$8 sps:$4 sm:$0xff]   ;;  %v10725_v35 = vld [vmem:[%s13983_s5 + $0x94] ss:$8 sps:$4 sm:$0xff]  }
 0x263   : > { %3809 = vmatprep.mubr.bf16.mxu1 %v9582_v57  ;;  %v3035_v37 = vpop.permute.xlu1 %3034  ;;  %v3149_v6 = vpop.permute.xlu0 %3148  ;;  %5786 = vmatpush1.bf16.msra.mxu0 %v10654_v13  ;;  %4267 = vst [vmem:[#allocation3 + $0x10] sm:$0x4] %v4266_v18  ;;  %v10666_v57 = vld [vmem:[%s13983_s5 + $0x130] ss:$8 sps:$4 sm:$0xff]   ;;  %v10722_v22 = vld [vmem:[%s13983_s5 + $0x1a4] ss:$8 sps:$4 sm:$0xff]  }
 0x264   : > { %v3250_v55 = vsel %vm3184_vm15, %v2977_v10, %v3035_v37  ;;  %v3277_v1 = vsel %vm3184_vm15, %v12084_v5, %v3149_v6  ;;  %v4241_v5 = vld [vmem:[#allocation3 + $0x4] sm:$0x1]  ;;  %5787 = vmatprep.subr.bf16.mxu0 %v10662_v52  ;;  %5745 = vmatpush1.bf16.msra.mxu1 %v10657_v31  ;;  %v10669_v10 = vld [vmem:[%s13983_s5 + $0x20] ss:$8 sps:$4 sm:$0xff]   ;;  %v10723_v52 = vld [vmem:[%s13983_s5 + $0x90] ss:$8 sps:$4 sm:$0xff]  }
 0x265   : > { %v9581_v49 = vcombine.low %v3247_v26, %v3250_v55  ;;  %5746 = vmatprep.subr.bf16.mxu1 %v10665_v14  ;;  %v10672_v37 = vld [vmem:[%s13983_s5 + $0x120] ss:$8 sps:$4 sm:$0xff]   ;;  %v10677_v26 = vld [vmem:[%s13983_s5 + $0x14] ss:$8 sps:$4 sm:$0xff]   ;;  %v10675_v55 = vld [vmem:[%s13983_s5 + $0x10] ss:$8 sps:$4 sm:$0xff]  }
 0x266   : > { %v10680_v6 = vld [vmem:[%s13983_s5 + $0x114] ss:$8 sps:$4 sm:$0xff]   ;;  %v10720_v13 = vld [vmem:[%s13983_s5 + $0x1a0] ss:$8 sps:$4 sm:$0xff]   ;;  %v10726_v31 = vld [vmem:[%s13983_s5 + $0x190] ss:$8 sps:$4 sm:$0xff]  }
 0x267   : > { %3810 = vmatmul.mubr.bf16.gmra.mxu1 %v9581_v49  ;;  %v3151_v41 = vpop.permute.xlu1 %3150  ;;  %v3037_v0 = vpop.permute.xlu0 %3036  ;;  %5788 = vmatpush1.bf16.msra.mxu0 %v10660_v46  ;;  %v10678_v49 = vld [vmem:[%s13983_s5 + $0x110] ss:$8 sps:$4 sm:$0xff]   ;;  %v10728_v11 = vld [vmem:[%s13983_s5 + $0x194] ss:$8 sps:$4 sm:$0xff]   ;;  %v10731_v47 = vld [vmem:[%s13983_s5 + $0x84] ss:$8 sps:$4 sm:$0xff]  }
 0x268   : > { %v3280_v40 = vsel %vm3184_vm15, %v12087_v36, %v3151_v41  ;;  %v3253_v38 = vsel %vm3184_vm15, %v2984_v51, %v3037_v0  ;;  %v4242_v36 = vsel %vm12221_vm4, 0, %v4241_v5  ;;  %5789 = vmatprep.subr.bf16.mxu0 %v10668_v15  ;;  %5747 = vmatpush1.bf16.msra.mxu1 %v10663_v33  ;;  %v10690_v51 = vld [vmem:[%s13983_s5 + $0x1f0] ss:$8 sps:$4 sm:$0xff]   ;;  %v10701_v5 = vld [vmem:[%s13983_s5 + $0xd4] ss:$8 sps:$4 sm:$0xff]  }
 0x269   : > { %v9587_v34 = vcombine.low %v3277_v1, %v3280_v40  ;;  %4243 = vst [vmem:[#allocation3 + $0x4] sm:$0x1] %v4242_v36  ;;  %5748 = vmatprep.subr.bf16.mxu1 %v10671_v7  ;;  %v10681_v1 = vld [vmem:[%s13983_s5] ss:$8 sps:$4 sm:$0xff]   ;;  %v10689_v40 = vld [vmem:[%s13983_s5 + $0xf4] ss:$8 sps:$4 sm:$0xff]  }
 0x26a   : > { %v10734_v8 = vld [vmem:[%s13983_s5 + $0x184] ss:$8 sps:$4 sm:$0xff]   ;;  %v10729_v18 = vld [vmem:[%s13983_s5 + $0x80] ss:$8 sps:$4 sm:$0xff]   ;;  %v10748_v15 = vld [vmem:[%s13983_s5 + $0x374] ss:$8 sps:$4 sm:$0xff]  }
 0x26b   : > { %3817 = vmatprep.mubr.bf16.mxu1 %v9587_v34  ;;  %v3039_v30 = vpop.permute.xlu1 %3038  ;;  %5790 = vmatpush1.bf16.msra.mxu0 %v10666_v57  ;;  %v10687_v34 = vld [vmem:[%s13983_s5 + $0xf0] ss:$8 sps:$4 sm:$0xff]   ;;  %v10732_v14 = vld [vmem:[%s13983_s5 + $0x180] ss:$8 sps:$4 sm:$0xff]   ;;  %v10745_v57 = vld [vmem:[%s13983_s5 + $0x274] ss:$8 sps:$4 sm:$0xff]  }
 0x26c   : > { %v3256_v62 = vsel %vm3184_vm15, %v2991_v19, %v3039_v30  ;;  %5791 = vmatprep.subr.bf16.mxu0 %v10674_v56  ;;  %5749 = vmatpush1.bf16.msra.mxu1 %v10669_v10  ;;  %v10695_v19 = vld [vmem:[%s13983_s5 + $0xe4] ss:$8 sps:$4 sm:$0xff]   ;;  %vm6110_vm15 = vsmask.f32 7950 }
 0x26d   : > { %v9586_v42 = vcombine.low %v3253_v38, %v3256_v62  ;;  %5750 = vmatprep.subr.bf16.mxu1 %v10677_v26  ;;  %v10698_v30 = vld [vmem:[%s13983_s5 + $0x1e4] ss:$8 sps:$4 sm:$0xff]   ;;  %v10693_v62 = vld [vmem:[%s13983_s5 + $0xe0] ss:$8 sps:$4 sm:$0xff]   ;;  %vm6111_vm5 = vmand %vm2468_vm10, %vm6110_vm15 }
 0x26e   : > { %v12473_v26 = vld [vmem:[%s13982_s4] ss:$0 sm:$0xff]  ;;  %vm6112_vm6 = vmor %vm6111_vm5, %vm6108_vm3 }
 0x26f   : > { %3818 = vmatmul.mubr.bf16.gmra.mxu1 %v9586_v42  ;;  %5792 = vmatpush1.bf16.msra.mxu0 %v10672_v37  ;;  %v10696_v42 = vld [vmem:[%s13983_s5 + $0x1e0] ss:$8 sps:$4 sm:$0xff]  }
 0x270   : > { %5793 = vmatprep.subr.bf16.mxu0 %v10680_v6  ;;  %5751 = vmatpush1.bf16.msra.mxu1 %v10675_v55 }
 0x271   : > { %5752 = vmatprep.subr.bf16.mxu1 %v10683_v39 }
 0x273   : > { %5794 = vmatpush1.bf16.msra.mxu0 %v10678_v49 }
 0x274   : > { %5795 = vmatprep.subr.bf16.mxu0 %v10686_v45  ;;  %5753 = vmatpush1.bf16.msra.mxu1 %v10681_v1 }
 0x275   : > { %5754 = vmatprep.subr.bf16.mxu1 %v10689_v40 }
 0x277   : > { %5796 = vmatpush1.bf16.msra.mxu0 %v10684_v44 }
 0x278   : > { %5797 = vmatprep.subr.bf16.mxu0 %v10692_v21  ;;  %5755 = vmatpush2.bf16.msra.mxu1 %v10687_v34 }
 0x279   : > { %5756 = vmatprep.subr.bf16.mxu1 %v10695_v19 }
 0x27b   : > { %5798 = vmatpush2.bf16.msra.mxu0 %v10690_v51 }
 0x27c   : > { %5799 = vmatprep.subr.bf16.mxu0 %v10698_v30  ;;  %5757 = vmatpush2.bf16.msra.mxu1 %v10693_v62 }
 0x27d   : > { %5758 = vmatprep.subr.bf16.mxu1 %v10701_v5 }
 0x27f   : > { %5800 = vmatpush2.bf16.msra.mxu0 %v10696_v42 }
 0x280   : > { %5801 = vmatprep.subr.bf16.mxu0 %v10704_v60  ;;  %5759 = vmatpush2.bf16.msra.mxu1 %v10699_v59 }
 0x281   : > { %5760 = vmatprep.subr.bf16.mxu1 %v10707_v23 }
 0x283   : > { %5802 = vmatpush2.bf16.msra.mxu0 %v10702_v48 }
 0x284   : > { %5803 = vmatprep.subr.bf16.mxu0 %v10710_v24  ;;  %5761 = vmatpush2.bf16.msra.mxu1 %v10705_v2 }
 0x285   : > { %5762 = vmatprep.subr.bf16.mxu1 %v10713_v25 }
 0x287   : > { %5804 = vmatpush2.bf16.msra.mxu0 %v10708_v63 }
 0x288   : > { %5805 = vmatprep.subr.bf16.mxu0 %v10716_v61  ;;  %5763 = vmatpush2.bf16.msra.mxu1 %v10711_v9 }
 0x289   : > { %5764 = vmatprep.subr.bf16.mxu1 %v10719_v17  ;;  %v10474_v56 = vpop.f32.mrf.mxu0 }
 0x28b   : > { %5806 = vmatpush2.bf16.msra.mxu0 %v10714_v54  ;;  %v3860_v55 = vpop.f32.mrf.mxu0 }
 0x28c   : > { %5807 = vmatprep.subr.bf16.mxu0 %v10722_v22  ;;  %5765 = vmatpush2.bf16.msra.mxu1 %v10717_v3 }
 0x28d   : > { %5766 = vmatprep.subr.bf16.mxu1 %v10725_v35  ;;  %v10475_v21 = vpop.f32.mrf.mxu0 }
 0x28f   : > { %5808 = vmatpush2.bf16.msra.mxu0 %v10720_v13  ;;  %v3863_v5 = vpop.f32.mrf.mxu0 }
 0x290   : > { %5809 = vmatprep.subr.bf16.mxu0 %v10728_v11  ;;  %5767 = vmatpush2.bf16.msra.mxu1 %v10723_v52 }
 0x291   : > { %5768 = vmatprep.subr.bf16.mxu1 %v10731_v47 }
 0x293   : > { %5810 = vmatpush2.bf16.msra.mxu0 %v10726_v31 }
 0x294   : > { %5811 = vmatprep.subr.bf16.mxu0 %v10734_v8  ;;  %5769 = vmatpush2.bf16.msra.mxu1 %v10729_v18 }
 0x295   : > { %5824 = vmatprep.subr.bf16.mxu1 %v10745_v57 }
 0x297   : > { %5812 = vmatpush2.bf16.msra.mxu0 %v10732_v14 }
 0x298   : > { %5867 = vmatprep.subr.bf16.mxu0 %v10748_v15 }
 0x2ca   : > { %v12336_v41 = vpop.f32.mrf.mxu1 }
 0x2cc   : > { %v12350_v0 = vpop.f32.mrf.mxu1 }
 0x2cd   : > { %v10326_v37 = vadd.f32 %v12350_v0, %v12336_v41 }
 0x2ce   : > { %v12364_v38 = vpop.f32.mrf.mxu1 }
 0x2cf   : > { %v3731_v39 = vadd.f32 %v10326_v37, %v12473_v26 }
 0x2d0   : > { %v12378_v36 = vpop.f32.mrf.mxu1 }
 0x2d1   : > { %v10329_v45 = vadd.f32 %v12378_v36, %v12364_v38 }
 0x2d3   : > { %v3734_v41 = vadd.f32 %v10329_v45, %v12473_v26 }
 0x2fc   : > { %v12383_v53 = vpop.f32.mrf.mxu1 }
 0x2fe   : > { %v12394_v43 = vpop.f32.mrf.mxu1 }
 0x2ff   : > { %v10332_v19 = vadd.f32 %v12394_v43, %v12383_v53 }
 0x300   : > { %v12399_v4 = vpop.f32.mrf.mxu1 }
 0x301   : > { %v3739_v2 = vadd.f32 %v10332_v19, %v12473_v26 }
 0x302   : > { %v12410_v27 = vpop.f32.mrf.mxu1 }
 0x303   : > { %v10335_v60 = vadd.f32 %v12410_v27, %v12399_v4 }
 0x304   : > { %v12415_v16 = vpop.f32.mrf.mxu1 }
 0x305   : > { %v3742_v54 = vadd.f32 %v10335_v60, %v12473_v26 }
 0x306   : > { %v10337_v29 = vpop.f32.mrf.mxu1 }
 0x307   : > { %v10338_v38 = vadd.f32 %v10337_v29, %v12415_v16 }
 0x308   : > { %v10339_v32 = vpop.f32.mrf.mxu1 }
 0x309   : > { %v3747_v16 = vadd.f32 %v10338_v38, %v12473_v26  ;;  %v12499_v38 = vpop.f32.mrf.mxu0 }
 0x30a   : > { %v10340_v20 = vpop.f32.mrf.mxu1 }
 0x30b   : > { %v10341_v63 = vadd.f32 %v10340_v20, %v10339_v32 }
 0x30d   : > { %v12491_v52 = vadd.f32 %v10341_v63, %v12473_v26 }
 0x30f   : > { %v12450_v46 = vpop.f32.mrf.mxu1 }
 0x311   : > { %v10343_v33 = vpop.f32.mrf.mxu1 }
 0x312   : > { %v12494_v20 = vadd.f32 %v10343_v33, %v12450_v46 }
 0x313   : > { %v12464_v7 = vpop.f32.mrf.mxu1 }
 0x315   : > { %v12466_v10 = vpop.f32.mrf.mxu1 }
 0x317   : > { %v10364_v6 = vpop.f32.mrf.mxu1 }
 0x319   : > { %v10365_v49 = vpop.f32.mrf.mxu1 }
 0x31a   : > { %v10366_v1 = vadd.f32 %v10365_v49, %v10364_v6 }
 0x31b   : > { %v10367_v44 = vpop.f32.mrf.mxu1 }
 0x31c   : > { %v3796_v40 = vadd.f32 %v10366_v1, %v3731_v39 }
 0x31d   : > { %v10368_v34 = vpop.f32.mrf.mxu1 }
 0x31e   : > { %v3861_v0 = vadd.f32 %v3860_v55, %v3796_v40  ;;  %v10369_v51 = vadd.f32 %v10368_v34, %v10367_v44 }
 0x31f   : > { %v10370_v30 = vpop.f32.mrf.mxu1 }
 0x320   : > { %v3891_v62 = vmax.f32 %v3861_v0, 0.0  ;;  %v3799_v42 = vadd.f32 %v10369_v51, %v3734_v41 }
 0x321   : > { %v10371_v36 = vpop.f32.mrf.mxu1 }
 0x322   : > { %v3907_v59 = vcombine.high %v3891_v62, %v3891_v62  ;;  %v3914_v48 = vrot.slane %v3891_v62, %v11628_v58  ;;  %v3864_v23 = vadd.f32 %v3863_v5, %v3799_v42  ;;  %v10372_v24 = vadd.f32 %v10371_v36, %v10370_v30 }
 0x323   : > { %v10373_v25 = vpop.f32.mrf.mxu1 }
 0x324   : > { %v3921_v53 = vrot.slane %v3907_v59, %v11628_v58  ;;  %v3922_v43 = vcombine.high %v3914_v48, %v3914_v48  ;;  %v9629_v61 = vrot.slane %v3914_v48, 9  ;;  %v3892_v9 = vmax.f32 %v3864_v23, 0.0 }
 0x325   : > { %v3804_v4 = vadd.f32 %v10372_v24, %v3739_v2  ;;  %v10374_v27 = vpop.f32.mrf.mxu1 }
 0x326   : > { %v3923_v17 = vcombine.high %v3921_v53, %v3921_v53  ;;  %v9630_v22 = vrot.slane %v3922_v43, 9  ;;  %v9631_v29 = vrot.slane %v3921_v53, 9  ;;  %v3924_v3 = vcombine.high %v3892_v9, %v3892_v9 }
 0x327   : > { %v3931_v13 = vrot.slane %v3892_v9, %v11628_v58  ;;  %v3869_v35 = vadd.f32 %v10474_v56, %v3804_v4  ;;  %v10375_v32 = vadd.f32 %v10374_v27, %v10373_v25  ;;  %v10376_v11 = vpop.f32.mrf.mxu1  ;;  %v4171_v47 = vmax.f32 %v3914_v48, %v9629_v61 }
 0x328   : > { %v9632_v31 = vrot.slane %v3923_v17, 9  ;;  %v3938_v8 = vrot.slane %v3924_v3, %v11628_v58  ;;  %v4172_v37 = vmax.f32 %v3922_v43, %v9630_v22  ;;  %v4173_v6 = vmax.f32 %v3921_v53, %v9631_v29  ;;  %v3876_v22 = vpop.f32.mrf.mxu0 }
 0x329   : > { %v3939_v18 = vcombine.high %v3931_v13, %v3931_v13  ;;  %v9633_v14 = vrot.slane %v3931_v13, 9  ;;  %v3893_v57 = vmax.f32 %v3869_v35, 0.0  ;;  %v10377_v15 = vpop.f32.mrf.mxu1  ;;  %v3807_v56 = vadd.f32 %v10375_v32, %v3742_v54 }
 0x32a   : > { %v4174_v55 = vmax.f32 %v3923_v17, %v9632_v31  ;;  %v3940_v49 = vcombine.high %v3938_v8, %v3938_v8  ;;  %v9635_v45 = vrot.slane %v3938_v8, 9  ;;  %v10378_v34 = vadd.f32 %v10377_v15, %v10376_v11 }
 0x32b   : > { %v9634_v39 = vrot.slane %v3939_v18, 9  ;;  %v4175_v1 = vmax.f32 %v3931_v13, %v9633_v14  ;;  %v10379_v44 = vpop.f32.mrf.mxu1  ;;  %v3941_v40 = vcombine.high %v3893_v57, %v3893_v57  ;;  %v3948_v46 = vrot.slane %v3893_v57, %v11628_v58 }
 0x32c   : > { %v3872_v33 = vadd.f32 %v10475_v21, %v3807_v56  ;;  %v9636_v41 = vrot.slane %v3940_v49, 9  ;;  %v4177_v51 = vmax.f32 %v3938_v8, %v9635_v45  ;;  %v3812_v63 = vadd.f32 %v10378_v34, %v3747_v16 }
 0x32d   : > { %v4176_v0 = vmax.f32 %v3939_v18, %v9634_v39  ;;  %v4203_v19 = vmax.f32 %v4171_v47, %v4175_v1  ;;  %v3955_v30 = vrot.slane %v3941_v40, %v11628_v58  ;;  %v3956_v62 = vcombine.high %v3948_v46, %v3948_v46  ;;  %v10380_v60 = vpop.f32.mrf.mxu1 }
 0x32e   : > { %v9637_v42 = vrot.slane %v3948_v46, 9  ;;  %v3894_v5 = vmax.f32 %v3872_v33, 0.0  ;;  %v4178_v36 = vmax.f32 %v3940_v49, %v9636_v41  ;;  %v4205_v48 = vmax.f32 %v4173_v6, %v4177_v51 }
 0x32f   : > { %v4204_v59 = vmax.f32 %v4172_v37, %v4176_v0  ;;  %v10269_v23 = vpack.c.bf16 %v4203_v19, %v4203_v19  ;;  %v3957_v21 = vcombine.high %v3955_v30, %v3955_v30  ;;  %v9638_v24 = vrot.slane %v3956_v62, 9  ;;  %v12501_v17 = vpop.f32.mrf.mxu1  ;;  %v4371_v0 = vld [vmem:[#allocation3 + $0x4] sm:$0x7] }
 0x330   : > { %v9639_v2 = vrot.slane %v3955_v30, 9  ;;  %v4206_v25 = vmax.f32 %v4174_v55, %v4178_v36  ;;  %v10271_v43 = vpack.c.bf16 %v4205_v48, %v4205_v48  ;;  %v4179_v54 = vmax.f32 %v3948_v46, %v9637_v42  ;;  %v12515_v36 = vld [vmem:[#allocation3] ss:$0 sps:$4 sm:$0x77]  }
 0x331   : > { %v10270_v53 = vpack.c.bf16 %v4204_v59, %v4204_v59  ;;  %v4316_v61 = vunpack.c.l.b16 %v10269_v23  ;;  %v9640_v9 = vrot.slane %v3957_v21, 9  ;;  %v4180_v4 = vmax.f32 %v3956_v62, %v9638_v24  ;;  %v10383_v55 = vpop.f32.mrf.mxu1  ;;  %v10479_v59 = vpop.f32.mrf.mxu0 }
 0x332   : > { %v3958_v27 = vcombine.high %v3894_v5, %v3894_v5  ;;  %v10272_v29 = vpack.c.bf16 %v4206_v25, %v4206_v25  ;;  %v4318_v13 = vunpack.c.l.b16 %v10271_v43  ;;  %v4181_v35 = vmax.f32 %v3955_v30, %v9639_v2 }
 0x333   : > { %v4317_v3 = vunpack.c.l.b16 %v10270_v53  ;;  %v4332_v32 = vrot.slane %v4316_v61, 7  ;;  %v3965_v11 = vrot.slane %v3894_v5, %v11628_v58  ;;  %v3877_v31 = vadd.f32 %v3876_v22, %v3812_v63 }
 0x334   : > { %v3972_v16 = vrot.slane %v3958_v27, %v11628_v58  ;;  %v4319_v47 = vunpack.c.l.b16 %v10272_v29  ;;  %v4335_v18 = vrot.slane %v4318_v13, 5  ;;  %v4182_v14 = vmax.f32 %v3957_v21, %v9640_v9  ;;  %v3879_v29 = vpop.f32.mrf.mxu0 }
 0x335   : > { %v4333_v8 = vrot.slane %v4317_v3, 6  ;;  %v3973_v57 = vcombine.high %v3965_v11, %v3965_v11  ;;  %v9641_v37 = vrot.slane %v3965_v11, 9  ;;  %v3895_v39 = vmax.f32 %v3877_v31, 0.0 }
 0x336   : > { %v3974_v15 = vcombine.high %v3972_v16, %v3972_v16  ;;  %v9643_v6 = vrot.slane %v3972_v16, 9  ;;  %v4337_v49 = vrot.slane %v4319_v47, 4  ;;  %v10381_v45 = vadd.f32 %v10380_v60, %v10379_v44  ;;  %v10385_v60 = vpop.f32.mrf.mxu1 }
 0x337   : > { %v4334_v56 = vsel %vm2465_vm9, %v4333_v8, %v4332_v32  ;;  %v9642_v40 = vrot.slane %v3973_v57, 9  ;;  %v4183_v33 = vmax.f32 %v3965_v11, %v9641_v37  ;;  %v3975_v19 = vcombine.high %v3895_v39, %v3895_v39 }
 0x338   : > { %v4336_v1 = vsel %vm2468_vm10, %v4335_v18, %v4334_v56  ;;  %v9644_v46 = vrot.slane %v3974_v15, 9  ;;  %v4185_v51 = vmax.f32 %v3972_v16, %v9643_v6  ;;  %v3982_v30 = vrot.slane %v3895_v39, %v11628_v58 }
 0x339   : > { %v4338_v34 = vsel %vm2471_vm11, %v4337_v49, %v4336_v1  ;;  %v4184_v44 = vmax.f32 %v3973_v57, %v9642_v40  ;;  %v4207_v5 = vmax.f32 %v4179_v54, %v4183_v33  ;;  %v10347_v48 = vadd.f32 %v12466_v10, %v12464_v7  ;;  %v10386_v7 = vpop.f32.mrf.mxu1 }
 0x33a   : > { %v4360_v62 = vpack.c.b16 %v4338_v34, %v4338_v34  ;;  %v4186_v42 = vmax.f32 %v3974_v15, %v9644_v46  ;;  %v4209_v23 = vmax.f32 %v4181_v35, %v4185_v51  ;;  %v3989_v21 = vrot.slane %v3975_v19, %v11628_v58  ;;  %v4374_v34 = vld [vmem:[#allocation3 + $0x8] sm:$0x7] }
 0x33b   : > { %v3815_v24 = vadd.f32 %v10381_v45, %v12491_v52  ;;  %v4208_v63 = vmax.f32 %v4180_v4, %v4184_v44  ;;  %v10273_v53 = vpack.c.bf16 %v4207_v5, %v4207_v5  ;;  %v3990_v61 = vcombine.high %v3982_v30, %v3982_v30 }
 0x33c   : > { %v4372_v2 = vsel %vm12510_vm8, %v4360_v62, %v4371_v0  ;;  %v4210_v25 = vmax.f32 %v4182_v14, %v4186_v42  ;;  %v10275_v43 = vpack.c.bf16 %v4209_v23, %v4209_v23  ;;  %v4433_v9 = vshrl.u32 %v12515_v36, 16 }
 0x33d   : > { %4373 = vst [vmem:[#allocation3 + $0x4] sm:$0x7] %v4372_v2  ;;  %v10274_v54 = vpack.c.bf16 %v4208_v63, %v4208_v63  ;;  %v4320_v22 = vunpack.c.l.b16 %v10273_v53  ;;  %v4435_v10 = vshll.u32 %v12515_v36, 16  ;;  %v3755_v52 = vadd.f32 %v12494_v20, %v12473_v26 }
 0x33e   : > { %v10276_v27 = vpack.c.bf16 %v4210_v25, %v4210_v25  ;;  %v3758_v3 = vadd.f32 %v10347_v48, %v12473_v26  ;;  %v4322_v4 = vunpack.c.l.b16 %v10275_v43  ;;  %v9645_v13 = vrot.slane %v3982_v30, 9 }
 0x33f   : > { %v4321_v35 = vunpack.c.l.b16 %v10274_v54  ;;  %v3991_v11 = vcombine.high %v3989_v21, %v3989_v21  ;;  %v3880_v16 = vadd.f32 %v3879_v29, %v3815_v24  ;;  %v9646_v47 = vrot.slane %v3990_v61, 9 }
 0x340   : > { %v4323_v32 = vunpack.c.l.b16 %v10276_v27  ;;  %v4342_v31 = vrot.slane %v4322_v4, 5  ;;  %v10384_v8 = vadd.f32 %v10383_v55, %v12501_v17  ;;  %v10387_v18 = vadd.f32 %v10386_v7, %v10385_v60 }
 0x341   : > { %v4339_v14 = vrot.slane %v4320_v22, 7  ;;  %v4340_v57 = vrot.slane %v4321_v35, 6  ;;  %v3896_v37 = vmax.f32 %v3880_v16, 0.0  ;;  %v9647_v6 = vrot.slane %v3989_v21, 9 }
 0x342   : > { %v4344_v15 = vrot.slane %v4323_v32, 4  ;;  %v4187_v56 = vmax.f32 %v3982_v30, %v9645_v13  ;;  %v3820_v20 = vadd.f32 %v10384_v8, %v3755_v52  ;;  %v3823_v49 = vadd.f32 %v10387_v18, %v3758_v3 }
 0x343   : > { %v4341_v26 = vsel %vm2465_vm9, %v4340_v57, %v4339_v14  ;;  %v9648_v39 = vrot.slane %v3991_v11, 9  ;;  %v3992_v45 = vcombine.high %v3896_v37, %v3896_v37  ;;  %v3999_v1 = vrot.slane %v3896_v37, %v11628_v58 }
 0x344   : > { %v4343_v40 = vsel %vm2468_vm10, %v4342_v31, %v4341_v26  ;;  %v4188_v46 = vmax.f32 %v3990_v61, %v9646_v47  ;;  %v3885_v17 = vadd.f32 %v12499_v38, %v3820_v20  ;;  %v3888_v55 = vadd.f32 %v10479_v59, %v3823_v49  ;;  %v10736_v57 = vld [vmem:[#allocation3 + $0x4] ss:$0 sps:$4 sm:$0x77]  }
 0x345   : > { %v4345_v33 = vsel %vm2471_vm11, %v4344_v15, %v4343_v40  ;;  %v4006_v0 = vrot.slane %v3992_v45, %v11628_v58  ;;  %v4007_v51 = vcombine.high %v3999_v1, %v3999_v1  ;;  %v9649_v19 = vrot.slane %v3999_v1, 9 }
 0x346   : > { %v4361_v30 = vpack.c.b16 %v4345_v33, %v4345_v33  ;;  %v4189_v62 = vmax.f32 %v3989_v21, %v9647_v6  ;;  %v3897_v44 = vmax.f32 %v3885_v17, 0.0  ;;  %v3898_v42 = vmax.f32 %v3888_v55, 0.0 }
 0x347   : > { %v4008_v5 = vcombine.high %v4006_v0, %v4006_v0  ;;  %v9650_v60 = vrot.slane %v4007_v51, 9  ;;  %v9651_v48 = vrot.slane %v4006_v0, 9  ;;  %v4191_v23 = vmax.f32 %v3999_v1, %v9649_v19 }
 0x348   : > { %v4375_v24 = vsel %vm12510_vm8, %v4361_v30, %v4374_v34  ;;  %v4190_v38 = vmax.f32 %v3991_v11, %v9648_v39  ;;  %v4009_v59 = vcombine.high %v3897_v44, %v3897_v44  ;;  %v4016_v2 = vrot.slane %v3897_v44, %v11628_v58 }
 0x349   : > { %4376 = vst [vmem:[#allocation3 + $0x8] sm:$0x7] %v4375_v24  ;;  %v9652_v63 = vrot.slane %v4008_v5, 9  ;;  %v4192_v25 = vmax.f32 %v4007_v51, %v9650_v60  ;;  %v4193_v53 = vmax.f32 %v4006_v0, %v9651_v48  ;;  %v4211_v43 = vmax.f32 %v4187_v56, %v4191_v23  ;;  %v4377_v23 = vld [vmem:[#allocation3 + $0xc] sm:$0x7] }
 0x34a   : > { %v4023_v21 = vrot.slane %v4009_v59, %v11628_v58  ;;  %v4024_v61 = vcombine.high %v4016_v2, %v4016_v2  ;;  %v9653_v54 = vrot.slane %v4016_v2, 9  ;;  %v4026_v27 = vcombine.high %v3898_v42, %v3898_v42 }
 0x34b   : > { %v4194_v22 = vmax.f32 %v4008_v5, %v9652_v63  ;;  %v4212_v7 = vmax.f32 %v4188_v46, %v4192_v25  ;;  %v4213_v29 = vmax.f32 %v4189_v62, %v4193_v53  ;;  %v10277_v52 = vpack.c.bf16 %v4211_v43, %v4211_v43  ;;  %v12546_v43 = vld [vmem:[#allocation3 + $0x14] ss:$0 sps:$4 sm:$0x77]  }
 0x34c   : > { %v4025_v3 = vcombine.high %v4023_v21, %v4023_v21  ;;  %v9654_v4 = vrot.slane %v4024_v61, 9  ;;  %v9655_v13 = vrot.slane %v4023_v21, 9  ;;  %v4033_v35 = vrot.slane %v3898_v42, %v11628_v58 }
 0x34d   : > { %v4214_v32 = vmax.f32 %v4190_v38, %v4194_v22  ;;  %v10278_v11 = vpack.c.bf16 %v4212_v7, %v4212_v7  ;;  %v10279_v16 = vpack.c.bf16 %v4213_v29, %v4213_v29  ;;  %v4324_v31 = vunpack.c.l.b16 %v10277_v52 }
 0x34e   : > { %v9656_v47 = vrot.slane %v4025_v3, 9  ;;  %v4195_v8 = vmax.f32 %v4016_v2, %v9653_v54  ;;  %v4196_v18 = vmax.f32 %v4024_v61, %v9654_v4  ;;  %v4040_v14 = vrot.slane %v4026_v27, %v11628_v58 }
 0x34f   : > { %v10280_v15 = vpack.c.bf16 %v4214_v32, %v4214_v32  ;;  %v4325_v37 = vunpack.c.l.b16 %v10278_v11  ;;  %v4326_v6 = vunpack.c.l.b16 %v10279_v16  ;;  %v4197_v56 = vmax.f32 %v4023_v21, %v9655_v13  ;;  %v10740_v11 = vld [vmem:[#allocation3 + $0x4] ss:$0 sps:$4 sm:$0x66]  }
 0x350   : > { %v4346_v20 = vrot.slane %v4324_v31, 7  ;;  %v4041_v49 = vcombine.high %v4033_v35, %v4033_v35  ;;  %v4042_v26 = vcombine.high %v4040_v14, %v4040_v14  ;;  %v9657_v39 = vrot.slane %v4033_v35, 9  ;;  %v10737_v62 = vld [vmem:[#allocation3 + $0x8] ss:$0 sps:$4 sm:$0x77]  }
 0x351   : > { %v4327_v45 = vunpack.c.l.b16 %v10280_v15  ;;  %v4347_v1 = vrot.slane %v4325_v37, 6  ;;  %v4349_v40 = vrot.slane %v4326_v6, 5  ;;  %v9659_v46 = vrot.slane %v4040_v14, 9  ;;  %v4395_v37 = vld [vmem:[#allocation3 + $0x4] sm:$0x3] }
 0x352   : > { %v9658_v17 = vrot.slane %v4041_v49, 9  ;;  %v9660_v55 = vrot.slane %v4042_v26, 9  ;;  %v4199_v33 = vmax.f32 %v4033_v35, %v9657_v39  ;;  %v4442_v34 = vshll.u32 %v10736_v57, 16  ;;  %v4383_v35 = vld [vmem:[#allocation3] sm:$0x3] }
 0x353   : > { %v4348_v0 = vsel %vm2465_vm9, %v4347_v1, %v4346_v20  ;;  %v4351_v51 = vrot.slane %v4327_v45, 4  ;;  %v4198_v19 = vmax.f32 %v4025_v3, %v9656_v47  ;;  %v4201_v30 = vmax.f32 %v4040_v14, %v9659_v46  ;;  %v10739_v3 = vld [vmem:[#allocation3] ss:$0 sps:$4 sm:$0x66]   ;;  %v4384_v47 = vld [vmem:[#allocation3 + $0x4] sm:$0x3] }
 0x354   : > { %v4350_v44 = vsel %vm2468_vm10, %v4349_v40, %v4348_v0  ;;  %v4200_v42 = vmax.f32 %v4041_v49, %v9658_v17  ;;  %v4202_v5 = vmax.f32 %v4042_v26, %v9660_v55  ;;  %v4215_v60 = vmax.f32 %v4195_v8, %v4199_v33  ;;  %v10759_v8 = vld [vmem:[#allocation3 + $0x8] ss:$0 sps:$4 sm:$0x77]   ;;  %v4380_v40 = vld [vmem:[#allocation3 + $0x10] sm:$0x7] }
 0x355   : > { %v4352_v48 = vsel %vm2471_vm11, %v4351_v51, %v4350_v44  ;;  %v4217_v24 = vmax.f32 %v4197_v56, %v4201_v30  ;;  %v4437_v38 = vrot.slane %v4435_v10, 1  ;;  %v4444_v59 = vrot.slane %v4442_v34, 1  ;;  %v4396_v56 = vld [vmem:[#allocation3 + $0x8] sm:$0x3] }
 0x356   : > { %v4362_v2 = vpack.c.b16 %v4352_v48, %v4352_v48  ;;  %v4216_v63 = vmax.f32 %v4196_v18, %v4200_v42  ;;  %v4218_v25 = vmax.f32 %v4198_v19, %v4202_v5  ;;  %v10281_v53 = vpack.c.bf16 %v4215_v60, %v4215_v60  ;;  %v10741_v39 = vld [vmem:[#allocation3 + $0x8] ss:$0 sps:$4 sm:$0x66]   ;;  %v12557_v44 = vld [vmem:[#allocation3 + $0x4] ss:$0 sps:$4 sm:$0x66]  }
 0x357   : > { %v10283_v21 = vpack.c.bf16 %v4217_v24, %v4217_v24  ;;  %v4440_v61 = vshrl.u32 %v10736_v57, 16  ;;  %v4449_v54 = vshll.u32 %v10737_v62, 16  ;;  %v4438_v10 = vor.u32 %v4437_v38, %v4433_v9  ;;  %v10758_v9 = vld [vmem:[#allocation3 + $0x4] ss:$0 sps:$4 sm:$0x77]  }
 0x358   : > { %v4378_v27 = vsel %vm12510_vm8, %v4362_v2, %v4377_v23  ;;  %v10282_v22 = vpack.c.bf16 %v4216_v63, %v4216_v63  ;;  %v10284_v7 = vpack.c.bf16 %v4218_v25, %v4218_v25  ;;  %v4328_v29 = vunpack.c.l.b16 %v10281_v53  ;;  %v4385_v42 = vld [vmem:[#allocation3 + $0x8] sm:$0x3] }
 0x359   : > { %4379 = vst [vmem:[#allocation3 + $0xc] sm:$0x7] %v4378_v27  ;;  %v4330_v52 = vunpack.c.l.b16 %v10283_v21  ;;  %v4445_v32 = vor.u32 %v4444_v59, %v4440_v61  ;;  %v4568_v16 = vshll.u32 %v12546_v43, 16  ;;  %v4451_v15 = vrot.slane %v4449_v54, 1 }
 0x35a   : > { %v4329_v4 = vunpack.c.l.b16 %v10282_v22  ;;  %v4331_v13 = vunpack.c.l.b16 %v10284_v7  ;;  %v4353_v18 = vrot.slane %v4328_v29, 7  ;;  %v4600_v6 = vcombine.low %v4383_v35, %v4438_v10  ;;  %v10763_v24 = vld [vmem:[#allocation3 + $0x8] ss:$0 sps:$4 sm:$0x66]  }
 0x35b   : > { %v4356_v31 = vrot.slane %v4330_v52, 5  ;;  %v4472_v36 = vrot.slane %v10739_v3, 1  ;;  %v4447_v49 = vshrl.u32 %v10737_v62, 16  ;;  %v4641_v26 = vcombine.low %v4384_v47, %v4445_v32  ;;  %v10769_v62 = vld [vmem:[#allocation3 + $0x8] ss:$0 sps:$4 sm:$0x77]  }
 0x35c   : > { %v4354_v14 = vrot.slane %v4329_v4, 6  ;;  %v4358_v57 = vrot.slane %v4331_v13, 4  ;;  %v4473_v45 = vrot.slane %v10740_v11, 1  ;;  %v4498_v46 = vshll.u32 %v10759_v8, 16 }
 0x35d   : > { %v4566_v17 = vshrl.u32 %v12546_v43, 16  ;;  %v4452_v33 = vor.u32 %v4451_v15, %v4447_v49  ;;  %v4570_v0 = vrot.slane %v4568_v16, 1  ;;  %v4601_v30 = vcombine.low %v4472_v36, %v4395_v37  ;;  %v12568_v37 = vld [vmem:[#allocation3 + $0x14] sm:$0x3] }
 0x35e   : > { %v4355_v20 = vsel %vm2465_vm9, %v4354_v14, %v4353_v18  ;;  %v4642_v34 = vcombine.low %v4473_v45, %v4396_v56  ;;  %v4608_v5 = vrot.slane %v4600_v6, %v11628_v58  ;;  %v4649_v60 = vrot.slane %v4641_v26, %v11628_v58 }
 0x35f   : > { %v4357_v1 = vsel %vm2468_vm10, %v4356_v31, %v4355_v20  ;;  %v4474_v48 = vrot.slane %v10741_v39, 1  ;;  %v4491_v23 = vshll.u32 %v10758_v9, 16  ;;  %v4500_v63 = vrot.slane %v4498_v46, 1 }
 0x360   : > { %v4359_v55 = vsel %vm2471_vm11, %v4358_v57, %v4357_v1  ;;  %v10738_v19 = vld [vmem:[#allocation3 + $0xc] ss:$0 sps:$4 sm:$0x77]   ;;  %v4682_v25 = vcombine.low %v4385_v42, %v4452_v33  ;;  %v4656_v53 = vrot.slane %v4642_v34, %v11628_v58  ;;  %v4496_v21 = vshrl.u32 %v10759_v8, 16  ;;  %v4408_v34 = vld [vmem:[#allocation3 + $0x8] sm:$0x3] }
 0x361   : > { %v4363_v51 = vpack.c.b16 %v4359_v55, %v4359_v55  ;;  %v4456_v59 = vshll.u32 %v10738_v19, 16  ;;  %v4397_v2 = vld [vmem:[#allocation3 + $0xc] sm:$0x3]  ;;  %v12564_v61 = vor.u32 %v4570_v0, %v4566_v17  ;;  %v4454_v54 = vshrl.u32 %v10738_v19, 16 }
 0x362   : > { %v10760_v43 = vld [vmem:[#allocation3 + $0xc] ss:$0 sps:$4 sm:$0x77]   ;;  %v4615_v7 = vrot.slane %v4601_v30, %v11628_v58  ;;  %v4547_v29 = vshll.u32 %v10769_v62, 16  ;;  %v9701_v52 = vcombine.low %v4608_v5, %v4649_v60  ;;  %v4489_v41 = vshrl.u32 %v10758_v9, 16 }
 0x363   : > { %v4381_v38 = vsel %vm12510_vm8, %v4363_v51, %v4380_v40  ;;  %v4458_v27 = vrot.slane %v4456_v59, 1  ;;  %v10742_v22 = vld [vmem:[#allocation3 + $0xc] ss:$0 sps:$4 sm:$0x66]   ;;  %v4493_v10 = vrot.slane %v4491_v23, 1  ;;  %v4505_v3 = vshll.u32 %v10760_v43, 16 }
 0x364   : > { %4382 = vst [vmem:[#allocation3 + $0x10] sm:$0x7] %v4381_v38  ;;  %v10770_v4 = vld [vmem:[#allocation3 + $0xc] ss:$0 sps:$4 sm:$0x77]   ;;  %v4501_v35 = vor.u32 %v4500_v63, %v4496_v21  ;;  %v4528_v32 = vrot.slane %v12557_v44, 1  ;;  %v4683_v31 = vcombine.low %v4474_v48, %v4397_v2  ;;  %v9702_v47 = vcombine.low %v4615_v7, %v4656_v53 }
 0x365   : > { %v4459_v13 = vor.u32 %v4458_v27, %v4454_v54  ;;  %v4549_v11 = vrot.slane %v4547_v29, 1  ;;  %v4386_v16 = vld [vmem:[#allocation3 + $0xc] sm:$0x3]  ;;  %v4529_v8 = vrot.slane %v10763_v24, 1  ;;  %v4554_v18 = vshll.u32 %v10770_v4, 16 }
 0x366   : > { %v4475_v57 = vrot.slane %v10742_v22, 1  ;;  %v4507_v15 = vrot.slane %v4505_v3, 1  ;;  %v4545_v6 = vshrl.u32 %v10769_v62, 16  ;;  %v4494_v56 = vor.u32 %v4493_v10, %v4489_v41  ;;  %v10764_v9 = vld [vmem:[#allocation3 + $0xc] ss:$0 sps:$4 sm:$0x66]  }
 0x367   : > { %v4723_v14 = vcombine.low %v4386_v16, %v4459_v13  ;;  %v4503_v36 = vshrl.u32 %v10760_v43, 16  ;;  %v4552_v20 = vshrl.u32 %v10770_v4, 16  ;;  %v4556_v49 = vrot.slane %v4554_v18, 1  ;;  %v4409_v42 = vld [vmem:[#allocation3 + $0xc] sm:$0x3] }
 0x368   : > { %v4690_v26 = vrot.slane %v4682_v25, %v11628_v58  ;;  %v4658_v1 = vcombine.low %v4501_v35, %v4529_v8  ;;  %v4550_v40 = vor.u32 %v4549_v11, %v4545_v6  ;;  %v4930_v46 = vrot.slane %v9701_v52, %v11628_v58  ;;  %v10743_v27 = vld [vmem:[%s13983_s5 + $0x270] ss:$8 sps:$4 sm:$0xff]   ;;  %v10751_v52 = vld [vmem:[%s13983_s5 + $0x264] ss:$8 sps:$4 sm:$0xff]  }
 0x369   : > { %v4731_v39 = vrot.slane %v4723_v14, %v11628_v58  ;;  %v4557_v0 = vor.u32 %v4556_v49, %v4552_v20  ;;  %v4741_v51 = vcombine.low %v12568_v37, %v12564_v61  ;;  %v4697_v30 = vrot.slane %v4683_v31, %v11628_v58  ;;  %v10746_v11 = vld [vmem:[%s13983_s5 + $0x370] ss:$8 sps:$4 sm:$0xff]   ;;  %v10754_v8 = vld [vmem:[%s13983_s5 + $0x364] ss:$8 sps:$4 sm:$0xff]   ;;  %v10757_v37 = vld [vmem:[%s13983_s5 + $0x254] ss:$8 sps:$4 sm:$0xff]  }
 0x36a   : > { %v4937_v44 = vrot.slane %v9702_v47, %v11628_v58  ;;  %v4508_v62 = vor.u32 %v4507_v15, %v4503_v36  ;;  %v4530_v48 = vrot.slane %v10764_v9, 1  ;;  %v4617_v23 = vcombine.low %v4494_v56, %v4528_v32  ;;  %v10749_v47 = vld [vmem:[%s13983_s5 + $0x260] ss:$8 sps:$4 sm:$0xff]  }
 0x36b   : > { %v4398_v45 = vld [vmem:[#allocation3 + $0x10] sm:$0x3]  ;;  %v9703_v19 = vcombine.low %v4690_v26, %v4731_v39  ;;  %v4666_v59 = vrot.slane %v4658_v1, %v11628_v58  ;;  %v4618_v2 = vcombine.low %v4408_v34, %v4550_v40  ;;  %v4659_v63 = vcombine.low %v4409_v42, %v4557_v0  ;;  %v10755_v39 = vld [vmem:[%s13983_s5 + $0x250] ss:$8 sps:$4 sm:$0xff]  }
 0x36c   : > { %v4724_v17 = vcombine.low %v4475_v57, %v4398_v45  ;;  %v10761_v55 = vld [vmem:[#allocation3 + $0x10] ss:$0 sps:$4 sm:$0x77]   ;;  %v4699_v7 = vcombine.low %v4508_v62, %v4530_v48  ;;  %v4625_v4 = vrot.slane %v4617_v23, %v11628_v58  ;;  %v4755_v15 = vrot.slane %v4741_v51, %v11628_v58  ;;  %v10768_v45 = vld [vmem:[%s13983_s5 + $0x354] ss:$8 sps:$4 sm:$0xff]  }
 0x36d   : > { %v10765_v33 = vld [vmem:[#allocation3 + $0x10] ss:$0 sps:$4 sm:$0x66]   ;;  %v4512_v60 = vshll.u32 %v10761_v55, 16  ;;  %v4944_v38 = vrot.slane %v9703_v19, %v11628_v58  ;;  %v4510_v53 = vshrl.u32 %v10761_v55, 16  ;;  %v4673_v13 = vrot.slane %v4659_v63, %v11628_v58 }
 0x36e   : > { %v4738_v5 = vrot.slane %v4724_v17, %v11628_v58  ;;  %v10771_v24 = vld [vmem:[#allocation3 + $0x10] ss:$0 sps:$4 sm:$0x77]   ;;  %v4531_v22 = vrot.slane %v10765_v33, 1  ;;  %v9705_v18 = vcombine.low %v4625_v4, %v4666_v59  ;;  %v4632_v57 = vrot.slane %v4618_v2, %v11628_v58  ;;  %v10775_v17 = vld [vmem:[%s13983_s5 + $0x244] ss:$8 sps:$4 sm:$0xff]  }
 0x36f   : > { %v4514_v43 = vrot.slane %v4512_v60, 1  ;;  %v4561_v21 = vshll.u32 %v10771_v24, 16  ;;  %v4952_v61 = vcombine.low %v4930_v46, %v4944_v38  ;;  %v4953_v54 = vcombine.high %v4930_v46, %v4944_v38  ;;  %v4410_v14 = vld [vmem:[#allocation3 + $0x10] sm:$0x3]  ;;  %v10766_v33 = vld [vmem:[%s13983_s5 + $0x350] ss:$8 sps:$4 sm:$0xff]  }
 0x370   : > { %v9704_v25 = vcombine.low %v4697_v30, %v4738_v5  ;;  %v4559_v10 = vshrl.u32 %v10771_v24, 16  ;;  %v4707_v6 = vrot.slane %v4699_v7, %v11628_v58  ;;  %v10752_v9 = vld [vmem:[%s13983_s5 + $0x360] ss:$8 sps:$4 sm:$0xff]   ;;  %v9706_v26 = vcombine.low %v4632_v57, %v4673_v13  ;;  %v10778_v19 = vld [vmem:[%s13983_s5 + $0x344] ss:$8 sps:$4 sm:$0xff]  }
 0x371   : > { %v4515_v41 = vor.u32 %v4514_v43, %v4510_v53  ;;  %v4563_v3 = vrot.slane %v4561_v21, 1  ;;  %5770 = vmatprep.mubr.bf16.mxu1 %v4953_v54  ;;  %v12616_v1 = vrot.slane %v9705_v18, %v11628_v58  ;;  %v10773_v51 = vld [vmem:[%s13983_s5 + $0x240] ss:$8 sps:$4 sm:$0xff]   ;;  %v10779_v42 = vld [vmem:[%s13983_s5 + $0x230] ss:$8 sps:$4 sm:$0xff]  }
 0x372   : > { %v4951_v29 = vrot.slane %v9704_v25, %v11628_v58  ;;  %5771 = vmatmul.mubr.bf16.vlgmr.msra.gmra.mxu1 %v4952_v61  ;;  %v12630_v34 = vrot.slane %v9706_v26, %v11628_v58  ;;  %v10776_v62 = vld [vmem:[%s13983_s5 + $0x340] ss:$8 sps:$4 sm:$0xff]   ;;  %v10784_v5 = vld [vmem:[%s13983_s5 + $0x334] ss:$8 sps:$4 sm:$0xff]   ;;  %v10787_v60 = vld [vmem:[%s13983_s5 + $0x224] ss:$8 sps:$4 sm:$0xff]  }
 0x373   : > { %v4740_v16 = vcombine.low %v4515_v41, %v4531_v22  ;;  %v4564_v31 = vor.u32 %v4563_v3, %v4559_v10  ;;  %5825 = vmatpush1.bf16.msra.mxu1 %v10743_v27  ;;  %v10782_v48 = vld [vmem:[%s13983_s5 + $0x330] ss:$8 sps:$4 sm:$0xff]   ;;  %v10785_v23 = vld [vmem:[%s13983_s5 + $0x220] ss:$8 sps:$4 sm:$0xff]   ;;  %v10790_v24 = vld [vmem:[%s13983_s5 + $0x324] ss:$8 sps:$4 sm:$0xff]  }
 0x374   : > { %v4954_v35 = vcombine.low %v4937_v44, %v4951_v29  ;;  %v4955_v32 = vcombine.high %v4937_v44, %v4951_v29  ;;  %5826 = vmatprep.subr.bf16.mxu1 %v10751_v52  ;;  %v10781_v44 = vld [vmem:[%s13983_s5 + $0x234] ss:$8 sps:$4 sm:$0xff]   ;;  %v10788_v59 = vld [vmem:[%s13983_s5 + $0x320] ss:$8 sps:$4 sm:$0xff]   ;;  %v10791_v2 = vld [vmem:[%s13983_s5 + $0x210] ss:$8 sps:$4 sm:$0xff]  }
 0x375   : > { %v4748_v56 = vrot.slane %v4740_v16, %v11628_v58  ;;  %v4700_v36 = vcombine.low %v4410_v14, %v4564_v31  ;;  %v10793_v38 = vld [vmem:[%s13983_s5 + $0x214] ss:$8 sps:$4 sm:$0xff]   ;;  %v10799_v25 = vld [vmem:[%s13983_s5 + $0x204] ss:$8 sps:$4 sm:$0xff]   ;;  %v10794_v53 = vld [vmem:[%s13983_s5 + $0x310] ss:$8 sps:$4 sm:$0xff]  }
 0x376   : > { %5813 = vmatprep.mubr.bf16.mxu0 %v4955_v32  ;;  %v10796_v63 = vld [vmem:[%s13983_s5 + $0x314] ss:$8 sps:$4 sm:$0xff]   ;;  %v10797_v43 = vld [vmem:[%s13983_s5 + $0x200] ss:$8 sps:$4 sm:$0xff]   ;;  %v10802_v21 = vld [vmem:[%s13983_s5 + $0x304] ss:$8 sps:$4 sm:$0xff]  }
 0x377   : > { %5814 = vmatmul.mubr.bf16.vlgmr.msra.gmra.mxu0 %v4954_v35  ;;  %v9707_v20 = vcombine.low %v4707_v6, %v4748_v56  ;;  %v4714_v49 = vrot.slane %v4700_v36, %v11628_v58  ;;  %5827 = vmatpush1.bf16.msra.mxu1 %v10749_v47  ;;  %v10805_v61 = vld [vmem:[%s13983_s5 + $0x2f4] ss:$8 sps:$4 sm:$0xff]   ;;  %v10800_v54 = vld [vmem:[%s13983_s5 + $0x300] ss:$8 sps:$4 sm:$0xff]   ;;  %v10803_v27 = vld [vmem:[%s13983_s5 + $0x2f0] ss:$8 sps:$4 sm:$0xff]  }
 0x378   : > { %5868 = vmatpush1.bf16.msra.mxu0 %v10746_v11  ;;  %5828 = vmatprep.subr.bf16.mxu1 %v10757_v37  ;;  %v10808_v22 = vld [vmem:[%s13983_s5 + $0x3f4] ss:$8 sps:$4 sm:$0xff]   ;;  %v10811_v7 = vld [vmem:[%s13983_s5 + $0x2e4] ss:$8 sps:$4 sm:$0xff]   ;;  %v10806_v29 = vld [vmem:[%s13983_s5 + $0x3f0] ss:$8 sps:$4 sm:$0xff]  }
 0x379   : > { %5869 = vmatprep.subr.bf16.mxu0 %v10754_v8  ;;  %v12619_v40 = vrot.slane %v9707_v20, %v11628_v58  ;;  %v9708_v46 = vcombine.low %v4714_v49, %v4755_v15  ;;  %v10809_v52 = vld [vmem:[%s13983_s5 + $0x2e0] ss:$8 sps:$4 sm:$0xff]   ;;  %v10814_v41 = vld [vmem:[%s13983_s5 + $0x3e4] ss:$8 sps:$4 sm:$0xff]   ;;  %v10817_v10 = vld [vmem:[%s13983_s5 + $0x2d4] ss:$8 sps:$4 sm:$0xff]  }
 0x37a   : > { %v10812_v3 = vld [vmem:[%s13983_s5 + $0x3e0] ss:$8 sps:$4 sm:$0xff]   ;;  %v10815_v4 = vld [vmem:[%s13983_s5 + $0x2d0] ss:$8 sps:$4 sm:$0xff]   ;;  %v10820_v13 = vld [vmem:[%s13983_s5 + $0x3d4] ss:$8 sps:$4 sm:$0xff]  }
 0x37b   : > { %v4989_v55 = vcombine.high %v12616_v1, %v12619_v40  ;;  %v12633_v0 = vrot.slane %v9708_v46, %v11628_v58  ;;  %5829 = vmatpush1.bf16.msra.mxu1 %v10755_v39  ;;  %v10823_v35 = vld [vmem:[%s13983_s5 + $0x2c4] ss:$8 sps:$4 sm:$0xff]   ;;  %v10818_v32 = vld [vmem:[%s13983_s5 + $0x3d0] ss:$8 sps:$4 sm:$0xff]   ;;  %v10821_v11 = vld [vmem:[%s13983_s5 + $0x2c0] ss:$8 sps:$4 sm:$0xff]  }
 0x37c   : > { %5870 = vmatpush1.bf16.msra.mxu0 %v10752_v9  ;;  %5830 = vmatprep.subr.bf16.mxu1 %v10775_v17  ;;  %v10826_v16 = vld [vmem:[%s13983_s5 + $0x3c4] ss:$8 sps:$4 sm:$0xff]   ;;  %v10829_v31 = vld [vmem:[%s13983_s5 + $0x2b4] ss:$8 sps:$4 sm:$0xff]   ;;  %v10824_v47 = vld [vmem:[%s13983_s5 + $0x3c0] ss:$8 sps:$4 sm:$0xff]  }
 0x37d   : > { %5871 = vmatprep.subr.bf16.mxu0 %v10768_v45  ;;  %5856 = vmatprep.mubr.bf16.mxu1 %v4989_v55  ;;  %v4991_v30 = vcombine.high %v12630_v34, %v12633_v0  ;;  %v10827_v8 = vld [vmem:[%s13983_s5 + $0x2b0] ss:$8 sps:$4 sm:$0xff]   ;;  %v10832_v18 = vld [vmem:[%s13983_s5 + $0x3b4] ss:$8 sps:$4 sm:$0xff]   ;;  %v10835_v14 = vld [vmem:[%s13983_s5 + $0x2a4] ss:$8 sps:$4 sm:$0xff]   ;;  %v4988_v55 = vcombine.low %v12616_v1, %v12619_v40 }
 0x37e   : > { %v10830_v57 = vld [vmem:[%s13983_s5 + $0x3b0] ss:$8 sps:$4 sm:$0xff]   ;;  %v10833_v15 = vld [vmem:[%s13983_s5 + $0x2a0] ss:$8 sps:$4 sm:$0xff]   ;;  %v10838_v37 = vld [vmem:[%s13983_s5 + $0x3a4] ss:$8 sps:$4 sm:$0xff]  }
 0x37f   : > { %5899 = vmatprep.mubr.bf16.mxu0 %v4991_v30  ;;  %5831 = vmatpush1.bf16.msra.mxu1 %v10773_v51  ;;  %v10841_v6 = vld [vmem:[%s13983_s5 + $0x294] ss:$8 sps:$4 sm:$0xff]   ;;  %v10836_v56 = vld [vmem:[%s13983_s5 + $0x3a0] ss:$8 sps:$4 sm:$0xff]   ;;  %v10839_v36 = vld [vmem:[%s13983_s5 + $0x290] ss:$8 sps:$4 sm:$0xff]   ;;  %v4990_v51 = vcombine.low %v12630_v34, %v12633_v0 }
 0x380   : > { %5872 = vmatpush1.bf16.msra.mxu0 %v10766_v33  ;;  %5832 = vmatprep.subr.bf16.mxu1 %v10781_v44  ;;  %v10844_v9 = vld [vmem:[%s13983_s5 + $0x394] ss:$8 sps:$4 sm:$0xff]   ;;  %v10847_v20 = vld [vmem:[%s13983_s5 + $0x284] ss:$8 sps:$4 sm:$0xff]   ;;  %v10842_v49 = vld [vmem:[%s13983_s5 + $0x390] ss:$8 sps:$4 sm:$0xff]  }
 0x381   : > { %5873 = vmatprep.subr.bf16.mxu0 %v10778_v19  ;;  %v10845_v26 = vld [vmem:[%s13983_s5 + $0x280] ss:$8 sps:$4 sm:$0xff]   ;;  %v10850_v39 = vld [vmem:[%s13983_s5 + $0x384] ss:$8 sps:$4 sm:$0xff]   ;;  %v10853_v45 = vld [vmem:[%s13983_s5 + $0x474] ss:$8 sps:$4 sm:$0xff]  }
 0x382   : > { %v10848_v46 = vld [vmem:[%s13983_s5 + $0x380] ss:$8 sps:$4 sm:$0xff]   ;;  %v10851_v17 = vld [vmem:[%s13983_s5 + $0x470] ss:$8 sps:$4 sm:$0xff]   ;;  %v10856_v33 = vld [vmem:[%s13983_s5 + $0x464] ss:$8 sps:$4 sm:$0xff]  }
 0x383   : > { %5833 = vmatpush1.bf16.msra.mxu1 %v10779_v42  ;;  %v10854_v19 = vld [vmem:[%s13983_s5 + $0x460] ss:$8 sps:$4 sm:$0xff]   ;;  %v10859_v1 = vld [vmem:[%s13983_s5 + $0x454] ss:$8 sps:$4 sm:$0xff]   ;;  %v10857_v40 = vld [vmem:[%s13983_s5 + $0x450] ss:$8 sps:$4 sm:$0xff]  }
 0x384   : > { %5874 = vmatpush1.bf16.msra.mxu0 %v10776_v62  ;;  %5834 = vmatprep.subr.bf16.mxu1 %v10787_v60  ;;  %v10862_v34 = vld [vmem:[%s13983_s5 + $0x444] ss:$8 sps:$4 sm:$0xff]   ;;  %v10865_v30 = vld [vmem:[%s13983_s5 + $0x434] ss:$8 sps:$4 sm:$0xff]   ;;  %v10863_v42 = vld [vmem:[%s13983_s5 + $0x430] ss:$8 sps:$4 sm:$0xff]  }
 0x385   : > { %5875 = vmatprep.subr.bf16.mxu0 %v10784_v5  ;;  %v10878_v0 = vld [vmem:[#allocation3 + $0x14] ss:$0 sps:$4 sm:$0x66]   ;;  %v10877_v44 = vld [vmem:[#allocation3 + $0x10] ss:$0 sps:$4 sm:$0x66]  }
 0x386   : > { %v10876_v62 = vld [vmem:[#allocation3 + $0xc] ss:$0 sps:$4 sm:$0x66]   ;;  %v4587_v5 = vrot.slane %v10878_v0, 1  ;;  %v10868_v60 = vld [vmem:[%s13983_s5 + $0x424] ss:$8 sps:$4 sm:$0xff]  }
 0x387   : > { %5835 = vmatpush1.bf16.msra.mxu1 %v10785_v23  ;;  %v4586_v23 = vrot.slane %v10877_v44, 1  ;;  %vm6097_vm11 = vsmask.f32 2304  ;;  %v10918_v0 = vld [vmem:[%s13985_s7 + $0x110] ss:$8 sps:$4 sm:$0xff]  }
 0x388   : > { %5876 = vmatpush1.bf16.msra.mxu0 %v10782_v48  ;;  %5836 = vmatprep.subr.bf16.mxu1 %v10793_v38  ;;  %v10875_v48 = vld [vmem:[#allocation3 + $0x8] ss:$0 sps:$4 sm:$0x66]   ;;  %v10866_v38 = vld [vmem:[%s13983_s5 + $0x420] ss:$8 sps:$4 sm:$0xff]   ;;  %vm12850_vm13 = vmand %vm2465_vm9, %vm6097_vm11 }
 0x389   : > { %5877 = vmatprep.subr.bf16.mxu0 %v10790_v24  ;;  %v4585_v24 = vrot.slane %v10876_v62, 1  ;;  %vm6099_vm1 = vmor %vm12850_vm13, %vm12221_vm4  ;;  %v10926_v44 = vld [vmem:[%s13985_s7 + $0x104] ss:$8 sps:$4 sm:$0xff]   ;;  %v10929_v62 = vld [vmem:[%s13985_s7 + $0xf4] ss:$8 sps:$4 sm:$0xff]   ;;  %vm6228_vm4 = vcmask 1043458  }
 0x38a   : > { %vm6226_vm10 = vsmask.f32 1282  ;;  %vm13094_vm11 = vmand %vm6228_vm4, %vm6229_vm7 }
 0x38b   : > { %5837 = vmatpush1.bf16.msra.mxu1 %v10791_v2  ;;  %v4584_v2 = vrot.slane %v10875_v48, 1  ;;  %v10935_v48 = vld [vmem:[%s13985_s7 + $0xe4] ss:$8 sps:$4 sm:$0xff]   ;;  %vm13090_vm8 = vmand %vm605_vm0, %vm6226_vm10 }
 0x38c   : > { %5878 = vmatpush1.bf16.msra.mxu0 %v10788_v59  ;;  %5838 = vmatprep.subr.bf16.mxu1 %v10799_v25  ;;  %v10871_v59 = vld [vmem:[%s13983_s5 + $0x414] ss:$8 sps:$4 sm:$0xff]   ;;  %v4763_v25 = vrot.slane %v4587_v5, %v11628_v58  ;;  %v10927_v5 = vld [vmem:[%s13985_s7 + $0xf0] ss:$8 sps:$4 sm:$0xff]   ;;  %vm6231_vm0 = vmor %vm13094_vm11, %vm13090_vm8 }
 0x38d   : > { %5879 = vmatprep.subr.bf16.mxu0 %v10796_v63  ;;  %v4722_v63 = vrot.slane %v4586_v23, %v11628_v58  ;;  %v10930_v23 = vld [vmem:[%s13985_s7 + $0x1f0] ss:$8 sps:$4 sm:$0xff]  }
 0x38f   : > { %5839 = vmatpush1.bf16.msra.mxu1 %v10797_v43  ;;  %v10869_v43 = vld [vmem:[%s13983_s5 + $0x410] ss:$8 sps:$4 sm:$0xff]  }
 0x390   : > { %5880 = vmatpush1.bf16.msra.mxu0 %v10794_v53  ;;  %5840 = vmatprep.subr.bf16.mxu1 %v10805_v61  ;;  %v4681_v53 = vrot.slane %v4585_v24, %v11628_v58  ;;  %v4640_v61 = vrot.slane %v4584_v2, %v11628_v58  ;;  %v10933_v24 = vld [vmem:[%s13985_s7 + $0xe0] ss:$8 sps:$4 sm:$0xff]  }
 0x391   : > { %5881 = vmatprep.subr.bf16.mxu0 %v10802_v21  ;;  %v10874_v21 = vld [vmem:[%s13983_s5 + $0x404] ss:$8 sps:$4 sm:$0xff]   ;;  %v10936_v2 = vld [vmem:[%s13985_s7 + $0x1e0] ss:$8 sps:$4 sm:$0xff]  }
 0x393   : > { %5841 = vmatpush2.bf16.msra.mxu1 %v10803_v27  ;;  %v4992_v27 = vcombine.low %v4640_v61, %v4681_v53  ;;  %v10947_v53 = vld [vmem:[%s13985_s7 + $0xc4] ss:$8 sps:$4 sm:$0xff]  }
 0x394   : > { %5882 = vmatpush1.bf16.msra.mxu0 %v10800_v54  ;;  %5842 = vmatprep.subr.bf16.mxu1 %v10811_v7  ;;  %v4993_v54 = vcombine.low %v4722_v63, %v4763_v25  ;;  %v10939_v63 = vld [vmem:[%s13985_s7 + $0xd0] ss:$8 sps:$4 sm:$0xff]   ;;  %v10944_v25 = vld [vmem:[%s13985_s7 + $0x1d4] ss:$8 sps:$4 sm:$0xff]   ;;  %v10950_v61 = vld [vmem:[%s13985_s7 + $0x1c4] ss:$8 sps:$4 sm:$0xff]  }
 0x395   : > { %5883 = vmatprep.subr.bf16.mxu0 %v10808_v22  ;;  %v10872_v22 = vld [vmem:[%s13983_s5 + $0x400] ss:$8 sps:$4 sm:$0xff]  }
 0x396   : > { %v5007_v7 = vrot.slane %v4993_v54, %v11628_v58  ;;  %v10953_v54 = vld [vmem:[%s13985_s7 + $0xb4] ss:$8 sps:$4 sm:$0xff]  }
 0x397   : > { %5843 = vmatpush2.bf16.msra.mxu1 %v10809_v52 }
 0x398   : > { %5884 = vmatpush2.bf16.msra.mxu0 %v10806_v29  ;;  %5844 = vmatprep.subr.bf16.mxu1 %v10817_v10  ;;  %v5000_v29 = vrot.slane %v4992_v27, %v11628_v58  ;;  %v10948_v27 = vld [vmem:[%s13985_s7 + $0x1c0] ss:$8 sps:$4 sm:$0xff]   ;;  %v10962_v10 = vld [vmem:[%s13985_s7 + $0x1a4] ss:$8 sps:$4 sm:$0xff]  }
 0x399   : > { %5885 = vmatprep.subr.bf16.mxu0 %v10814_v41  ;;  %v6100_v41 = vld [vmem:[#allocation4 + $0x4] sm:$0x5] }
 0x39a   : > { %v5008_v52 = vcombine.low %v5000_v29, %v5007_v7  ;;  %v10956_v7 = vld [vmem:[%s13985_s7 + $0x1b4] ss:$8 sps:$4 sm:$0xff]   ;;  %v10959_v29 = vld [vmem:[%s13985_s7 + $0xa4] ss:$8 sps:$4 sm:$0xff]  }
 0x39b   : > { %5845 = vmatpush2.bf16.msra.mxu1 %v10815_v4  ;;  %v6113_v4 = vld [vmem:[#allocation4 + $0x4] sm:$0xa] }
 0x39c   : > { %5886 = vmatpush2.bf16.msra.mxu0 %v10812_v3  ;;  %5846 = vmatprep.subr.bf16.mxu1 %v10823_v35  ;;  %v6101_v3 = vsel %vm6099_vm1, 0, %v6100_v41  ;;  %v10879_v35 = vld [vmem:[%s13985_s7 + $0x70] ss:$8 sps:$4 sm:$0xff]   ;;  %v10957_v41 = vld [vmem:[%s13985_s7 + $0xa0] ss:$8 sps:$4 sm:$0xff]  }
 0x39d   : > { %5887 = vmatprep.subr.bf16.mxu0 %v10820_v13  ;;  %6102 = vst [vmem:[#allocation4 + $0x4] sm:$0x5] %v6101_v3  ;;  %v6114_v13 = vsel %vm6112_vm6, 0, %v6113_v4  ;;  %v10965_v3 = vld [vmem:[%s13985_s7 + $0x94] ss:$8 sps:$4 sm:$0xff]  }
 0x39e   : > { %6115 = vst [vmem:[#allocation4 + $0x4] sm:$0xa] %v6114_v13  ;;  %v10960_v4 = vld [vmem:[%s13985_s7 + $0x1a0] ss:$8 sps:$4 sm:$0xff]   ;;  %v10963_v13 = vld [vmem:[%s13985_s7 + $0x90] ss:$8 sps:$4 sm:$0xff]  }
 0x39f   : > { %5847 = vmatpush2.bf16.msra.mxu1 %v10821_v11 }
 0x3a0   : > { %5888 = vmatpush2.bf16.msra.mxu0 %v10818_v32  ;;  %5848 = vmatprep.subr.bf16.mxu1 %v10829_v31  ;;  %v6103_v32 = vld [vmem:[#allocation4 + $0x8] sm:$0x5] }
 0x3a1   : > { %5889 = vmatprep.subr.bf16.mxu0 %v10826_v16  ;;  %v6104_v11 = vsel %vm6099_vm1, 0, %v6103_v32  ;;  %v6116_v16 = vld [vmem:[#allocation4 + $0x8] sm:$0xa] }
 0x3a2   : > { %6105 = vst [vmem:[#allocation4 + $0x8] sm:$0x5] %v6104_v11  ;;  %v6117_v31 = vsel %vm6112_vm6, 0, %v6116_v16  ;;  %v10966_v32 = vld [vmem:[%s13985_s7 + $0x190] ss:$8 sps:$4 sm:$0xff]  }
 0x3a3   : > { %5849 = vmatpush2.bf16.msra.mxu1 %v10827_v8  ;;  %6118 = vst [vmem:[#allocation4 + $0x8] sm:$0xa] %v6117_v31  ;;  %v10884_v8 = vld [vmem:[%s13985_s7 + $0x174] ss:$8 sps:$4 sm:$0xff]   ;;  %v10969_v11 = vld [vmem:[%s13985_s7 + $0x80] ss:$8 sps:$4 sm:$0xff]  }
 0x3a4   : > { %5890 = vmatpush2.bf16.msra.mxu0 %v10824_v47  ;;  %5850 = vmatprep.subr.bf16.mxu1 %v10835_v14  ;;  %v10882_v47 = vld [vmem:[%s13985_s7 + $0x170] ss:$8 sps:$4 sm:$0xff]   ;;  %v10887_v14 = vld [vmem:[%s13985_s7 + $0x64] ss:$8 sps:$4 sm:$0xff]   ;;  %v10977_v31 = vld [vmem:[%s13985_s7 + $0x274] ss:$8 sps:$4 sm:$0xff]  }
 0x3a5   : > { %5891 = vmatprep.subr.bf16.mxu0 %v10832_v18  ;;  %v10885_v18 = vld [vmem:[%s13985_s7 + $0x60] ss:$8 sps:$4 sm:$0xff]   ;;  %v10974_v16 = vld [vmem:[%s13985_s7 + $0x184] ss:$8 sps:$4 sm:$0xff]  }
 0x3a7   : > { %5851 = vmatpush2.bf16.msra.mxu1 %v10833_v15  ;;  %v10893_v15 = vld [vmem:[%s13985_s7 + $0x54] ss:$8 sps:$4 sm:$0xff]  }
 0x3a8   : > { %5892 = vmatpush2.bf16.msra.mxu0 %v10830_v57  ;;  %5852 = vmatprep.subr.bf16.mxu1 %v10841_v6  ;;  %v10890_v57 = vld [vmem:[%s13985_s7 + $0x164] ss:$8 sps:$4 sm:$0xff]   ;;  %v10891_v6 = vld [vmem:[%s13985_s7 + $0x50] ss:$8 sps:$4 sm:$0xff]  }
 0x3a9   : > { %5893 = vmatprep.subr.bf16.mxu0 %v10838_v37  ;;  %v10888_v37 = vld [vmem:[%s13985_s7 + $0x160] ss:$8 sps:$4 sm:$0xff]  }
 0x3ab   : > { %5853 = vmatpush2.bf16.msra.mxu1 %v10839_v36  ;;  %v10899_v36 = vld [vmem:[%s13985_s7 + $0x44] ss:$8 sps:$4 sm:$0xff]  }
 0x3ac   : > { %5894 = vmatpush2.bf16.msra.mxu0 %v10836_v56  ;;  %5854 = vmatprep.subr.bf16.mxu1 %v10847_v20  ;;  %v10896_v56 = vld [vmem:[%s13985_s7 + $0x154] ss:$8 sps:$4 sm:$0xff]   ;;  %v10897_v20 = vld [vmem:[%s13985_s7 + $0x40] ss:$8 sps:$4 sm:$0xff]  }
 0x3ad   : > { %5895 = vmatprep.subr.bf16.mxu0 %v10844_v9  ;;  %v10894_v9 = vld [vmem:[%s13985_s7 + $0x150] ss:$8 sps:$4 sm:$0xff]  }
 0x3af   : > { %5855 = vmatpush2.bf16.msra.mxu1 %v10845_v26  ;;  %v10905_v26 = vld [vmem:[%s13985_s7 + $0x34] ss:$8 sps:$4 sm:$0xff]  }
 0x3b0   : > { %5896 = vmatpush2.bf16.msra.mxu0 %v10842_v49  ;;  %5910 = vmatprep.subr.bf16.mxu1 %v10853_v45  ;;  %v10902_v49 = vld [vmem:[%s13985_s7 + $0x144] ss:$8 sps:$4 sm:$0xff]   ;;  %v10903_v45 = vld [vmem:[%s13985_s7 + $0x30] ss:$8 sps:$4 sm:$0xff]  }
 0x3b1   : > { %5897 = vmatprep.subr.bf16.mxu0 %v10850_v39  ;;  %v10900_v39 = vld [vmem:[%s13985_s7 + $0x140] ss:$8 sps:$4 sm:$0xff]  }
 0x3b2   : > { %5857 = vmatmul.mubr.bf16.vlgmr.msra.gmra.mxu1 %v4988_v55  ;;  %v10906_v55 = vld [vmem:[%s13985_s7 + $0x130] ss:$8 sps:$4 sm:$0xff]  }
 0x3b3   : > { %5911 = vmatpush1.bf16.msra.mxu1 %v10851_v17  ;;  %5942 = vmatprep.mubr.bf16.mxu1 %v11394_v28  ;;  %v10860_v28 = vld [vmem:[%s13983_s5 + $0x440] ss:$8 sps:$4 sm:$0xff]   ;;  %v10911_v17 = vld [vmem:[%s13985_s7 + $0x24] ss:$8 sps:$4 sm:$0xff]  }
 0x3b4   : > { %5898 = vmatpush2.bf16.msra.mxu0 %v10848_v46  ;;  %5912 = vmatprep.subr.bf16.mxu1 %v10856_v33  ;;  %v10908_v46 = vld [vmem:[%s13985_s7 + $0x134] ss:$8 sps:$4 sm:$0xff]   ;;  %v10909_v33 = vld [vmem:[%s13985_s7 + $0x20] ss:$8 sps:$4 sm:$0xff]  }
 0x3b5   : > { %8622 = vmatprep.subr.bf16.mxu0 %v10881_v12  ;;  %v10971_v12 = vld [vmem:[%s13985_s7 + $0x84] ss:$8 sps:$4 sm:$0xff]  }
 0x3b7   : > { %5900 = vmatmul.mubr.bf16.vlgmr.msra.gmra.mxu0 %v4990_v51  ;;  %5913 = vmatpush1.bf16.msra.mxu1 %v10854_v19  ;;  %v10914_v51 = vld [vmem:[%s13985_s7 + $0x124] ss:$8 sps:$4 sm:$0xff]   ;;  %v10917_v19 = vld [vmem:[%s13985_s7 + $0x14] ss:$8 sps:$4 sm:$0xff]  }
 0x3b8   : > { %5914 = vmatprep.subr.bf16.mxu1 %v10859_v1  ;;  %8623 = vmatpush1.bf16.msra.mxu0 %v10879_v35  ;;  %v10912_v1 = vld [vmem:[%s13985_s7 + $0x120] ss:$8 sps:$4 sm:$0xff]   ;;  %v10968_v35 = vld [vmem:[%s13985_s7 + $0x194] ss:$8 sps:$4 sm:$0xff]  }
 0x3b9   : > { %8624 = vmatprep.subr.bf16.mxu0 %v10887_v14 }
 0x3bb   : > { %5915 = vmatpush1.bf16.msra.mxu1 %v10857_v40  ;;  %v10915_v40 = vld [vmem:[%s13985_s7 + $0x10] ss:$8 sps:$4 sm:$0xff]  }
 0x3bc   : > { %5916 = vmatprep.subr.bf16.mxu1 %v10862_v34  ;;  %8625 = vmatpush1.bf16.msra.mxu0 %v10885_v18  ;;  %v10920_v34 = vld [vmem:[%s13985_s7 + $0x114] ss:$8 sps:$4 sm:$0xff]  }
 0x3bd   : > { %8626 = vmatprep.subr.bf16.mxu0 %v10893_v15  ;;  %v10980_v18 = vld [vmem:[%s13985_s7 + $0x374] ss:$8 sps:$4 sm:$0xff]  }
 0x3bf   : > { %5917 = vmatpush1.bf16.msra.mxu1 %v10860_v28  ;;  %v10923_v28 = vld [vmem:[%s13985_s7 + $0x4] ss:$8 sps:$4 sm:$0xff]  }
 0x3c0   : > { %5918 = vmatprep.subr.bf16.mxu1 %v10865_v30  ;;  %8627 = vmatpush1.bf16.msra.mxu0 %v10891_v6  ;;  %v10921_v30 = vld [vmem:[%s13985_s7] ss:$8 sps:$4 sm:$0xff]   ;;  %v13058_v6 = vsub.s32 0, %v11617_v50 }
 0x3c1   : > { %8628 = vmatprep.subr.bf16.mxu0 %v10899_v36  ;;  %v4916_v36 = vsub.s32 1, %v11617_v50 }
 0x3c3   : > { %5919 = vmatpush1.bf16.msra.mxu1 %v10863_v42  ;;  %v10924_v42 = vld [vmem:[%s13985_s7 + $0x100] ss:$8 sps:$4 sm:$0xff]  }
 0x3c4   : > { %5920 = vmatprep.subr.bf16.mxu1 %v10868_v60  ;;  %8629 = vmatpush1.bf16.msra.mxu0 %v10897_v20  ;;  %v10932_v60 = vld [vmem:[%s13985_s7 + $0x1f4] ss:$8 sps:$4 sm:$0xff]  }
 0x3c5   : > { %8630 = vmatprep.subr.bf16.mxu0 %v10905_v26 }
 0x3c7   : > { %5921 = vmatpush1.bf16.msra.mxu1 %v10866_v38  ;;  %v10938_v38 = vld [vmem:[%s13985_s7 + $0x1e4] ss:$8 sps:$4 sm:$0xff]  }
 0x3c8   : > { %5922 = vmatprep.subr.bf16.mxu1 %v10871_v59  ;;  %8631 = vmatpush1.bf16.msra.mxu0 %v10903_v45  ;;  %v10941_v59 = vld [vmem:[%s13985_s7 + $0xd4] ss:$8 sps:$4 sm:$0xff]  }
 0x3c9   : > { %8632 = vmatprep.subr.bf16.mxu0 %v10911_v17 }
 0x3cb   : > { %5923 = vmatpush1.bf16.msra.mxu1 %v10869_v43  ;;  %v10942_v43 = vld [vmem:[%s13985_s7 + $0x1d0] ss:$8 sps:$4 sm:$0xff]  }
 0x3cc   : > { %5924 = vmatprep.subr.bf16.mxu1 %v10874_v21  ;;  %8633 = vmatpush1.bf16.msra.mxu0 %v10909_v33  ;;  %v10945_v21 = vld [vmem:[%s13985_s7 + $0xc0] ss:$8 sps:$4 sm:$0xff]  }
 0x3cd   : > { %8634 = vmatprep.subr.bf16.mxu0 %v10917_v19 }
 0x3cf   : > { %5925 = vmatpush1.bf16.msra.mxu1 %v10872_v22  ;;  %v10951_v22 = vld [vmem:[%s13985_s7 + $0xb0] ss:$8 sps:$4 sm:$0xff]  }
 0x3d0   : > { %8663 = vmatprep.subr.bf16.mxu1 %v10884_v8  ;;  %8635 = vmatpush1.bf16.msra.mxu0 %v10915_v40  ;;  %v10972_v8 = vld [vmem:[%s13985_s7 + $0x180] ss:$8 sps:$4 sm:$0xff]  }
 0x3d1   : > { %8636 = vmatprep.subr.bf16.mxu0 %v10923_v28 }
 0x3d2   : > { %5943 = vmatmul.mubr.bf16.vlgmr.msra.gmra.mxu1 %v5008_v52  ;;  %v10954_v52 = vld [vmem:[%s13985_s7 + $0x1b0] ss:$8 sps:$4 sm:$0xff]  }
 0x3d3   : > { %8664 = vmatpush1.bf16.msra.mxu1 %v10882_v47 }
 0x3d4   : > { %8665 = vmatprep.subr.bf16.mxu1 %v10890_v57  ;;  %8637 = vmatpush1.bf16.msra.mxu0 %v10921_v30 }
 0x3d5   : > { %8638 = vmatprep.subr.bf16.mxu0 %v10929_v62 }
 0x3d7   : > { %8666 = vmatpush1.bf16.msra.mxu1 %v10888_v37 }
 0x3d8   : > { %8667 = vmatprep.subr.bf16.mxu1 %v10896_v56  ;;  %8639 = vmatpush2.bf16.msra.mxu0 %v10927_v5  ;;  %v4908_v56 = vld [vmem:[%s13984_s6] sm:$0x3] }
 0x3d9   : > { %8640 = vmatprep.subr.bf16.mxu0 %v10935_v48 }
 0x3db   : > { %8668 = vmatpush1.bf16.msra.mxu1 %v10894_v9 }
 0x3dc   : > { %8669 = vmatprep.subr.bf16.mxu1 %v10902_v49  ;;  %8641 = vmatpush2.bf16.msra.mxu0 %v10933_v24  ;;  %v4913_v49 = vrot.slane %v4908_v56, %v13058_v6 }
 0x3dd   : > { %8642 = vmatprep.subr.bf16.mxu0 %v10941_v59 }
 0x3df   : > { %8670 = vmatpush1.bf16.msra.mxu1 %v10900_v39  ;;  %v4917_v39 = vrot.slane %v4908_v56, %v4916_v36 }
 0x3e0   : > { %8671 = vmatprep.subr.bf16.mxu1 %v10908_v46  ;;  %8643 = vmatpush2.bf16.msra.mxu0 %v10939_v63 }
 0x3e1   : > { %8644 = vmatprep.subr.bf16.mxu0 %v10947_v53 }
 0x3e3   : > { %8672 = vmatpush1.bf16.msra.mxu1 %v10906_v55 }
 0x3e4   : > { %8673 = vmatprep.subr.bf16.mxu1 %v10914_v51  ;;  %8645 = vmatpush2.bf16.msra.mxu0 %v10945_v21 }
 0x3e5   : > { %8646 = vmatprep.subr.bf16.mxu0 %v10953_v54 }
 0x3e7   : > { %8674 = vmatpush1.bf16.msra.mxu1 %v10912_v1 }
 0x3e8   : > { %8675 = vmatprep.subr.bf16.mxu1 %v10920_v34  ;;  %8647 = vmatpush2.bf16.msra.mxu0 %v10951_v22 }
 0x3e9   : > { %8648 = vmatprep.subr.bf16.mxu0 %v10959_v29 }
 0x3eb   : > { %8676 = vmatpush1.bf16.msra.mxu1 %v10918_v0 }
 0x3ec   : > { %8677 = vmatprep.subr.bf16.mxu1 %v10926_v44  ;;  %8649 = vmatpush2.bf16.msra.mxu0 %v10957_v41 }
 0x3ed   : > { %8650 = vmatprep.subr.bf16.mxu0 %v10965_v3 }
 0x3ef   : > { %8678 = vmatpush1.bf16.msra.mxu1 %v10924_v42 }
 0x3f0   : > { %8679 = vmatprep.subr.bf16.mxu1 %v10932_v60  ;;  %8651 = vmatpush2.bf16.msra.mxu0 %v10963_v13 }
 0x3f1   : > { %8652 = vmatprep.subr.bf16.mxu0 %v10971_v12 }
 0x3f3   : > { %8680 = vmatpush2.bf16.msra.mxu1 %v10930_v23 }
 0x3f4   : > { %8681 = vmatprep.subr.bf16.mxu1 %v10938_v38  ;;  %8653 = vmatpush2.bf16.msra.mxu0 %v10969_v11  ;;  %v13070_v11 = vsub.s32 2, %v11617_v50 }
 0x3f5   : > { %8704 = vmatprep.subr.bf16.mxu0 %v10977_v31 }
 0x3f7   : > { %8682 = vmatpush2.bf16.msra.mxu1 %v10936_v2 }
 0x3f8   : > { %8683 = vmatprep.subr.bf16.mxu1 %v10944_v25 }
 0x3fb   : > { %8684 = vmatpush2.bf16.msra.mxu1 %v10942_v43 }
 0x3fc   : > { %8685 = vmatprep.subr.bf16.mxu1 %v10950_v61 }
 0x3ff   : > { %8686 = vmatpush2.bf16.msra.mxu1 %v10948_v27 }
 0x400   : > { %8687 = vmatprep.subr.bf16.mxu1 %v10956_v7 }
 0x403   : > { %8688 = vmatpush2.bf16.msra.mxu1 %v10954_v52 }
 0x404   : > { %8689 = vmatprep.subr.bf16.mxu1 %v10962_v10 }
 0x407   : > { %8690 = vmatpush2.bf16.msra.mxu1 %v10960_v4 }
 0x408   : > { %8691 = vmatprep.subr.bf16.mxu1 %v10968_v35 }
 0x40b   : > { %8692 = vmatpush2.bf16.msra.mxu1 %v10966_v32 }
 0x40c   : > { %8693 = vmatprep.subr.bf16.mxu1 %v10974_v16 }
 0x40f   : > { %8694 = vmatpush2.bf16.msra.mxu1 %v10972_v8 }
 0x410   : > { %8745 = vmatprep.subr.bf16.mxu1 %v10980_v18 }
 0x432   : > { %v5772_v47 = vpop.f32.mrf.mxu1 }
 0x433   : > { %v5773_v46 = vadd.f32 %v5772_v47, %v4913_v49 }
 0x434   : > { %v5774_v57 = vpop.f32.mrf.mxu1 }
 0x435   : > { %v5775_v33 = vadd.f32 %v5774_v57, %v4917_v39 }
 0x436   : > { %v5776_v37 = vpop.f32.mrf.mxu1 }
 0x437   : > { %v5815_v14 = vpop.f32.mrf.mxu0  ;;  %v5777_v19 = vadd.f32 %v5776_v37, %v4913_v49 }
 0x438   : > { %v5778_v20 = vpop.f32.mrf.mxu1  ;;  %v5816_v51 = vadd.f32 %v5815_v14, %v5773_v46 }
 0x439   : > { %v5817_v15 = vpop.f32.mrf.mxu0  ;;  %v5779_v28 = vadd.f32 %v5778_v20, %v4917_v39 }
 0x43a   : > { %v5818_v34 = vadd.f32 %v5817_v15, %v5775_v33 }
 0x43b   : > { %v5819_v9 = vpop.f32.mrf.mxu0 }
 0x43c   : > { %v5820_v44 = vadd.f32 %v5819_v9, %v5777_v19 }
 0x43d   : > { %v5821_v45 = vpop.f32.mrf.mxu0 }
 0x43e   : > { %v5822_v5 = vadd.f32 %v5821_v45, %v5779_v28 }
 0x472   : > { %v5858_v26 = vpop.f32.mrf.mxu1 }
 0x473   : > { %v5859_v0 = vadd.f32 %v5858_v26, %v5816_v51 }
 0x474   : > { %v5860_v55 = vpop.f32.mrf.mxu1 }
 0x475   : > { %v5861_v30 = vadd.f32 %v5860_v55, %v5818_v34 }
 0x476   : > { %v5862_v40 = vpop.f32.mrf.mxu1 }
 0x477   : > { %v5901_v17 = vpop.f32.mrf.mxu0  ;;  %v5863_v48 = vadd.f32 %v5862_v40, %v5820_v44 }
 0x478   : > { %v5864_v42 = vpop.f32.mrf.mxu1  ;;  %v5902_v60 = vadd.f32 %v5901_v17, %v5859_v0 }
 0x479   : > { %v5903_v1 = vpop.f32.mrf.mxu0  ;;  %v5865_v38 = vadd.f32 %v5864_v42, %v5822_v5 }
 0x47a   : > { %v5904_v24 = vadd.f32 %v5903_v1, %v5861_v30 }
 0x47b   : > { %v5905_v62 = vpop.f32.mrf.mxu0 }
 0x47c   : > { %v5906_v53 = vadd.f32 %v5905_v62, %v5863_v48 }
 0x47d   : > { %v5907_v2 = vpop.f32.mrf.mxu0 }
 0x47e   : > { %v5908_v21 = vadd.f32 %v5907_v2, %v5865_v38 }
 0x492   : > { %v5944_v23 = vpop.f32.mrf.mxu1 }
 0x493   : > { %v5945_v59 = vadd.f32 %v5944_v23, %v5902_v60 }
 0x494   : > { %v5946_v63 = vpop.f32.mrf.mxu1 }
 0x495   : > { %v5947_v25 = vadd.f32 %v5946_v63, %v5904_v24  ;;  %v5953_v61 = vmax.f32 %v5945_v59, 0.0 }
 0x496   : > { %v5948_v43 = vpop.f32.mrf.mxu1 }
 0x497   : > { %v5954_v54 = vmax.f32 %v5947_v25, 0.0  ;;  %v5949_v27 = vadd.f32 %v5948_v43, %v5906_v53  ;;  %v9867_v53 = vld.sshfl [vmem:[#allocation4] sm:$0x33 pattern:$0x76325410] }
 0x498   : > { %v5950_v22 = vpop.f32.mrf.mxu1 }
 0x499   : > { %v5961_v7 = vcombine.low %v5953_v61, %v5954_v54  ;;  %v5962_v29 = vcombine.high %v5953_v61, %v5954_v54  ;;  %v5951_v52 = vadd.f32 %v5950_v22, %v5908_v21  ;;  %v5955_v4 = vmax.f32 %v5949_v27, 0.0 }
 0x49b   : > { %v5969_v41 = vrot.slane %v5961_v7, %v11628_v58  ;;  %v5976_v10 = vrot.slane %v5962_v29, %v11628_v58  ;;  %v5956_v3 = vmax.f32 %v5951_v52, 0.0  ;;  %v6284_v7 = vcombine.high %v9867_v53, %v9867_v53 }
 0x49d   : > { %v5977_v13 = vcombine.high %v5969_v41, %v5969_v41  ;;  %v5978_v35 = vcombine.high %v5976_v10, %v5976_v10  ;;  %v9853_v12 = vrot.slane %v5969_v41, 9  ;;  %v9855_v32 = vrot.slane %v5976_v10, 9 }
 0x49e   : > { %v5979_v16 = vcombine.low %v5955_v4, %v5956_v3  ;;  %v5980_v31 = vcombine.high %v5955_v4, %v5956_v3 }
 0x49f   : > { %v9854_v47 = vrot.slane %v5977_v13, 9  ;;  %v9856_v8 = vrot.slane %v5978_v35, 9  ;;  %v6029_v18 = vmax.f32 %v5969_v41, %v9853_v12  ;;  %v6031_v14 = vmax.f32 %v5976_v10, %v9855_v32 }
 0x4a0   : > { %v5987_v57 = vrot.slane %v5979_v16, %v11628_v58  ;;  %v5994_v15 = vrot.slane %v5980_v31, %v11628_v58  ;;  %v6296_v31 = vshll.u32 %v9867_v53, 16 }
 0x4a1   : > { %v6030_v37 = vmax.f32 %v5977_v13, %v9854_v47  ;;  %v6032_v56 = vmax.f32 %v5978_v35, %v9856_v8  ;;  %v6037_v9 = vmax.f32 %v6029_v18, %v6031_v14  ;;  %v6232_v8 = vld [vmem:[#allocation4 + $0x4] sm:$0xf] }
 0x4a2   : > { %v5995_v20 = vcombine.high %v5987_v57, %v5987_v57  ;;  %v5996_v49 = vcombine.high %v5994_v15, %v5994_v15  ;;  %v9857_v26 = vrot.slane %v5987_v57, 9  ;;  %v9859_v39 = vrot.slane %v5994_v15, 9 }
 0x4a3   : > { %v6038_v45 = vmax.f32 %v6030_v37, %v6032_v56  ;;  %v6048_v46 = vrot.slane %v6037_v9, %v13058_v6  ;;  %v6052_v17 = vrot.slane %v6037_v9, %v13070_v11  ;;  %v9869_v37 = vld.sshfl [vmem:[#allocation4] sm:$0x22 pattern:$0x76325410] }
 0x4a4   : > { %v9858_v55 = vrot.slane %v5995_v20, 9  ;;  %v9860_v33 = vrot.slane %v5996_v49, 9  ;;  %v6033_v51 = vmax.f32 %v5987_v57, %v9857_v26  ;;  %v6035_v19 = vmax.f32 %v5994_v15, %v9859_v39 }
 0x4a5   : > { %v6056_v1 = vrot.slane %v6038_v45, %v13058_v6  ;;  %v6060_v40 = vrot.slane %v6038_v45, %v13070_v11  ;;  %v9861_v34 = vpack.c.bf16 %v6052_v17, %v6048_v46  ;;  %v6303_v57 = vshll.u32 %v6284_v7, 16 }
 0x4a6   : > { %v6034_v28 = vmax.f32 %v5995_v20, %v9858_v55  ;;  %v6036_v0 = vmax.f32 %v5996_v49, %v9860_v33  ;;  %v6039_v30 = vmax.f32 %v6033_v51, %v6035_v19  ;;  %v6294_v26 = vshrl.u32 %v9867_v53, 16  ;;  %v9865_v33 = vld.sshfl [vmem:[#allocation4] sm:$0x11 pattern:$0x76325410] }
 0x4a7   : > { %v6134_v44 = vrot.slane %v9861_v34, %v11628_v58  ;;  %v9862_v62 = vpack.c.bf16 %v6060_v40, %v6056_v1  ;;  %v6298_v39 = vrot.slane %v6296_v31, 1  ;;  %v6301_v45 = vshrl.u32 %v6284_v7, 16 }
 0x4a8   : > { %v6040_v42 = vmax.f32 %v6034_v28, %v6036_v0  ;;  %v6064_v5 = vrot.slane %v6039_v30, %v13058_v6  ;;  %v6068_v60 = vrot.slane %v6039_v30, %v13070_v11  ;;  %v6305_v51 = vrot.slane %v6303_v57, 1  ;;  %v6235_v28 = vld [vmem:[#allocation4 + $0x8] sm:$0xf] }
 0x4a9   : > { %v6142_v48 = vrot.slane %v9862_v62, %v11628_v58  ;;  %v6165_v23 = vrot.slane %v6134_v44, %v11628_v58  ;;  %v11397_v1 = vmov 1966171168   ;;  %v6330_v34 = vcombine.high %v9869_v37, %v9869_v37 }
 0x4aa   : > { %v6072_v24 = vrot.slane %v6040_v42, %v13058_v6  ;;  %v6076_v38 = vrot.slane %v6040_v42, %v13070_v11  ;;  %v9863_v59 = vpack.c.bf16 %v6068_v60, %v6064_v5  ;;  %v6520_v40 = vunpack.c.l.s4 %v11397_v1 }
 0x4ab   : > { %v6172_v2 = vrot.slane %v6142_v48, %v11628_v58  ;;  %v6187_v63 = vunpack.c.l.b16 %v6165_v23  ;;  %v6188_v25 = vunpack.c.h.b16 %v6165_v23  ;;  %v6266_v30 = vcombine.high %v9865_v33, %v9865_v33 }
 0x4ac   : > { %v6150_v43 = vrot.slane %v9863_v59, %v11628_v58  ;;  %v9864_v21 = vpack.c.bf16 %v6076_v38, %v6072_v24  ;;  %v6299_v44 = vor.u32 %v6298_v39, %v6294_v26  ;;  %v6306_v62 = vor.u32 %v6305_v51, %v6301_v45 }
 0x4ad   : > { %v6189_v61 = vunpack.c.l.b16 %v6172_v2  ;;  %v6190_v54 = vunpack.c.h.b16 %v6172_v2  ;;  %v6195_v52 = vrot.slane %v6187_v63, 7  ;;  %v6198_v10 = vrot.slane %v6188_v25, 7 }
 0x4ae   : > { %v6158_v27 = vrot.slane %v9864_v21, %v11628_v58  ;;  %v6179_v22 = vrot.slane %v6150_v43, %v11628_v58  ;;  %v6521_v5 = vunpack.c.0.s8 %v6520_v40  ;;  %v6339_v60 = vrot.slane %v9869_v37, 1 }
 0x4af   : > { %v6196_v41 = vrot.slane %v6189_v61, 6  ;;  %v6199_v3 = vrot.slane %v6190_v54, 6  ;;  %v6340_v48 = vrot.slane %v6330_v34, 1  ;;  %v6515_v23 = vcombine.low %v9865_v33, %v6266_v30 }
 0x4b0   : > { %v6186_v13 = vrot.slane %v6158_v27, %v11628_v58  ;;  %v6191_v35 = vunpack.c.l.b16 %v6179_v22  ;;  %v6192_v12 = vunpack.c.h.b16 %v6179_v22  ;;  %v6516_v38 = vcombine.low %v6299_v44, %v6306_v62 }
 0x4b1   : > { %v6197_v32 = vsel %vm2465_vm9, %v6196_v41, %v6195_v52  ;;  %v6200_v16 = vsel %vm2465_vm9, %v6199_v3, %v6198_v10  ;;  %v13120_v63 = vsub.s32 %v6521_v5, %v11617_v50  ;;  %v6517_v25 = vcombine.low %v6339_v60, %v6340_v48 }
 0x4b2   : > { %v6207_v47 = vpack.c.b16 %v6200_v16, %v6197_v32  ;;  %v6193_v18 = vunpack.c.l.b16 %v6186_v13  ;;  %v6194_v14 = vunpack.c.h.b16 %v6186_v13  ;;  %v6201_v15 = vrot.slane %v6191_v35, 7 }
 0x4b3   : > { %v6204_v20 = vrot.slane %v6192_v12, 7  ;;  %v6525_v61 = vrot.slane %v6515_v23, %v13120_v63  ;;  %v6532_v52 = vrot.slane %v6516_v38, %v13120_v63  ;;  %v6539_v13 = vrot.slane %v6517_v25, %v13120_v63 }
 0x4b4   : > { %v6215_v56 = vrot.slane %v6207_v47, %v11628_v58  ;;  %v6202_v9 = vrot.slane %v6193_v18, 6  ;;  %v6205_v49 = vrot.slane %v6194_v14, 6 }
 0x4b6   : > { %v6233_v46 = vsel %vm6231_vm0, %v6215_v56, %v6232_v8  ;;  %v6203_v17 = vsel %vm2465_vm9, %v6202_v9, %v6201_v15  ;;  %v6206_v55 = vsel %vm2465_vm9, %v6205_v49, %v6204_v20  ;;  %v6547_v15 = vcombine.low %v6525_v61, %v6532_v52  ;;  %v10992_v52 = vld [vmem:[%s13985_s7 + $0x354] ss:$8 sps:$4 sm:$0xff]  }
 0x4b7   : > { %6234 = vst [vmem:[#allocation4 + $0x4] sm:$0xf] %v6233_v46  ;;  %v6208_v19 = vpack.c.b16 %v6206_v55, %v6203_v17 }
 0x4b8   : > { %v6555_v33 = vrot.slane %v6547_v15, %v13120_v63  ;;  %v11016_v15 = vld [vmem:[%s13985_s7 + $0x314] ss:$8 sps:$4 sm:$0xff]  }
 0x4b9   : > { %v6222_v0 = vrot.slane %v6208_v19, %v11628_v58 }
 0x4bb   : > { %v6236_v42 = vsel %vm6231_vm0, %v6222_v0, %v6235_v28 }
 0x4bc   : > { %6237 = vst [vmem:[#allocation4 + $0x8] sm:$0xf] %v6236_v42 }
 0x4be   : > { %v9866_v24 = vld.sshfl [vmem:[#allocation4 + $0x4] sm:$0x11 pattern:$0x76325410] }
 0x4bf   : > { %v9868_v59 = vld.sshfl [vmem:[#allocation4 + $0x4] sm:$0x33 pattern:$0x76325410]  ;;  %v6274_v2 = vcombine.high %v9866_v24, %v9866_v24 }
 0x4c0   : > { %v6292_v53 = vcombine.high %v9868_v59, %v9868_v59  ;;  %v6310_v43 = vshll.u32 %v9868_v59, 16  ;;  %v9870_v21 = vld.sshfl [vmem:[#allocation4 + $0x4] sm:$0x22 pattern:$0x76325410]  ;;  %v6308_v22 = vshrl.u32 %v9868_v59, 16 }
 0x4c1   : > { %v6628_v54 = vcombine.low %v9866_v24, %v6274_v2  ;;  %v6338_v27 = vcombine.high %v9870_v21, %v9870_v21  ;;  %v6341_v3 = vrot.slane %v9870_v21, 1  ;;  %v10975_v2 = vld [vmem:[%s13985_s7 + $0x270] ss:$8 sps:$4 sm:$0xff]   ;;  %v10983_v21 = vld [vmem:[%s13985_s7 + $0x264] ss:$8 sps:$4 sm:$0xff]  }
 0x4c2   : > { %v6312_v7 = vrot.slane %v6310_v43, 1  ;;  %v6317_v29 = vshll.u32 %v6292_v53, 16  ;;  %v6315_v35 = vshrl.u32 %v6292_v53, 16  ;;  %v10978_v43 = vld [vmem:[%s13985_s7 + $0x370] ss:$8 sps:$4 sm:$0xff]  }
 0x4c3   : > { %v6638_v41 = vrot.slane %v6628_v54, %v13120_v63  ;;  %v9872_v10 = vld.sshfl [vmem:[#allocation4 + $0x8] sm:$0x11 pattern:$0x76325410]  ;;  %v6342_v4 = vrot.slane %v6338_v27, 1 }
 0x4c4   : > { %v6319_v12 = vrot.slane %v6317_v29, 1  ;;  %v6360_v32 = vcombine.high %v9872_v10, %v9872_v10  ;;  %v9874_v16 = vld.sshfl [vmem:[#allocation4 + $0x8] sm:$0x33 pattern:$0x76325410]  ;;  %v6313_v8 = vor.u32 %v6312_v7, %v6308_v22 }
 0x4c5   : > { %v6630_v31 = vcombine.low %v6341_v3, %v6342_v4  ;;  %v6378_v47 = vcombine.high %v9874_v16, %v9874_v16  ;;  %v6396_v57 = vshll.u32 %v9874_v16, 16  ;;  %v6548_v37 = vcombine.low %v6539_v13, %v6638_v41  ;;  %v10986_v54 = vld [vmem:[%s13985_s7 + $0x364] ss:$8 sps:$4 sm:$0xff]   ;;  %v10981_v27 = vld [vmem:[%s13985_s7 + $0x260] ss:$8 sps:$4 sm:$0xff]  }
 0x4c6   : > { %v6320_v18 = vor.u32 %v6319_v12, %v6315_v35  ;;  %v6631_v14 = vcombine.low %v9872_v10, %v6360_v32  ;;  %v6394_v39 = vshrl.u32 %v9874_v16, 16  ;;  %v10989_v7 = vld [vmem:[%s13985_s7 + $0x254] ss:$8 sps:$4 sm:$0xff]   ;;  %v10984_v29 = vld [vmem:[%s13985_s7 + $0x360] ss:$8 sps:$4 sm:$0xff]  }
 0x4c7   : > { %v6403_v56 = vshll.u32 %v6378_v47, 16  ;;  %v13127_v20 = vrot.slane %v6630_v31, %v13120_v63  ;;  %v6398_v26 = vrot.slane %v6396_v57, 1  ;;  %v6401_v45 = vshrl.u32 %v6378_v47, 16  ;;  %v10995_v10 = vld [vmem:[%s13985_s7 + $0x244] ss:$8 sps:$4 sm:$0xff]  }
 0x4c8   : > { %v6629_v9 = vcombine.low %v6313_v8, %v6320_v18  ;;  %v13130_v49 = vrot.slane %v6631_v14, %v13120_v63  ;;  %v6562_v40 = vrot.slane %v6548_v37, %v13120_v63  ;;  %v10990_v3 = vld [vmem:[%s13985_s7 + $0x350] ss:$8 sps:$4 sm:$0xff]   ;;  %v10998_v4 = vld [vmem:[%s13985_s7 + $0x344] ss:$8 sps:$4 sm:$0xff]   ;;  %v10993_v13 = vld [vmem:[%s13985_s7 + $0x240] ss:$8 sps:$4 sm:$0xff]  }
 0x4c9   : > { %v6405_v46 = vrot.slane %v6403_v56, 1  ;;  %v6399_v51 = vor.u32 %v6398_v26, %v6394_v39  ;;  %v11001_v35 = vld [vmem:[%s13985_s7 + $0x234] ss:$8 sps:$4 sm:$0xff]   ;;  %v10996_v12 = vld [vmem:[%s13985_s7 + $0x340] ss:$8 sps:$4 sm:$0xff]  }
 0x4ca   : > { %v13133_v17 = vrot.slane %v6629_v9, %v13120_v63  ;;  %v6661_v55 = vcombine.low %v13127_v20, %v13130_v49  ;;  %v11004_v32 = vld [vmem:[%s13985_s7 + $0x334] ss:$8 sps:$4 sm:$0xff]   ;;  %v10999_v16 = vld [vmem:[%s13985_s7 + $0x230] ss:$8 sps:$4 sm:$0xff]   ;;  %v11007_v31 = vld [vmem:[%s13985_s7 + $0x224] ss:$8 sps:$4 sm:$0xff]  }
 0x4cb   : > { %v6406_v19 = vor.u32 %v6405_v46, %v6401_v45  ;;  %v11002_v47 = vld [vmem:[%s13985_s7 + $0x330] ss:$8 sps:$4 sm:$0xff]   ;;  %v11010_v8 = vld [vmem:[%s13985_s7 + $0x324] ss:$8 sps:$4 sm:$0xff]   ;;  %v11005_v18 = vld [vmem:[%s13985_s7 + $0x220] ss:$8 sps:$4 sm:$0xff]  }
 0x4cc   : > { %v6660_v1 = vcombine.low %v6638_v41, %v13133_v17  ;;  %v6675_v34 = vrot.slane %v6661_v55, %v13120_v63  ;;  %v6596_v28 = vcombine.low %v13133_v17, %v13127_v20  ;;  %v10987_v41 = vld [vmem:[%s13985_s7 + $0x250] ss:$8 sps:$4 sm:$0xff]   ;;  %v11013_v14 = vld [vmem:[%s13985_s7 + $0x214] ss:$8 sps:$4 sm:$0xff]   ;;  %v11008_v57 = vld [vmem:[%s13985_s7 + $0x320] ss:$8 sps:$4 sm:$0xff]  }
 0x4cd   : > { %v6677_v0 = vcombine.low %v6399_v51, %v6406_v19  ;;  %v11011_v37 = vld [vmem:[%s13985_s7 + $0x210] ss:$8 sps:$4 sm:$0xff]   ;;  %v11019_v56 = vld [vmem:[%s13985_s7 + $0x204] ss:$8 sps:$4 sm:$0xff]   ;;  %v11017_v45 = vld [vmem:[%s13985_s7 + $0x200] ss:$8 sps:$4 sm:$0xff]  }
 0x4ce   : > { %v6668_v30 = vrot.slane %v6660_v1, %v13120_v63  ;;  %v9884_v44 = vcombine.low %v6562_v40, %v6675_v34  ;;  %v11014_v9 = vld [vmem:[%s13985_s7 + $0x310] ss:$8 sps:$4 sm:$0xff]   ;;  %v11022_v26 = vld [vmem:[%s13985_s7 + $0x304] ss:$8 sps:$4 sm:$0xff]   ;;  %v11025_v46 = vld [vmem:[%s13985_s7 + $0x2f4] ss:$8 sps:$4 sm:$0xff]  }
 0x4cf   : > { %v13145_v62 = vrot.slane %v6677_v0, %v13120_v63  ;;  %v9876_v39 = vld.sshfl [vmem:[#allocation4 + $0x8] sm:$0x22 pattern:$0x76325410]  ;;  %v11020_v55 = vld [vmem:[%s13985_s7 + $0x300] ss:$8 sps:$4 sm:$0xff]  }
 0x4d0   : > { %v9883_v42 = vcombine.low %v6555_v33, %v6668_v30  ;;  %v13148_v5 = vrot.slane %v9884_v44, %v13120_v63  ;;  %v6424_v33 = vcombine.high %v9876_v39, %v9876_v39  ;;  %v11028_v51 = vld [vmem:[%s13985_s7 + $0x3f4] ss:$8 sps:$4 sm:$0xff]   ;;  %v11023_v19 = vld [vmem:[%s13985_s7 + $0x2f0] ss:$8 sps:$4 sm:$0xff]   ;;  %v11031_v1 = vld [vmem:[%s13985_s7 + $0x2e4] ss:$8 sps:$4 sm:$0xff]  }
 0x4d1   : > { %v6597_v60 = vcombine.low %v13130_v49, %v13145_v62  ;;  %v11026_v40 = vld [vmem:[%s13985_s7 + $0x3f0] ss:$8 sps:$4 sm:$0xff]   ;;  %v11034_v0 = vld [vmem:[%s13985_s7 + $0x3e4] ss:$8 sps:$4 sm:$0xff]   ;;  %v11029_v30 = vld [vmem:[%s13985_s7 + $0x2e0] ss:$8 sps:$4 sm:$0xff]  }
 0x4d2   : > { %v7049_v48 = vrot.slane %v9883_v42, %v13120_v63  ;;  %v7058_v23 = vcombine.high %v13148_v5, %v13148_v5  ;;  %v6428_v34 = vrot.slane %v6424_v33, 1  ;;  %v6427_v44 = vrot.slane %v9876_v39, 1  ;;  %v11037_v42 = vld [vmem:[%s13985_s7 + $0x2d4] ss:$8 sps:$4 sm:$0xff]   ;;  %v11056_v20 = vld [vmem:[%s13985_s7 + $0x3a0] ss:$8 sps:$4 sm:$0xff]  }
 0x4d3   : > { %v11064_v17 = vld [vmem:[%s13985_s7 + $0x394] ss:$8 sps:$4 sm:$0xff]   ;;  %v11149_v49 = vld [vmem:[%s13985_s7 + $0x4a0] ss:$8 sps:$4 sm:$0xff]  }
 0x4d4   : > { %v7057_v24 = vcombine.high %v7049_v48, %v7049_v48  ;;  %v7065_v38 = vrot.slane %v7049_v48, %v13120_v63  ;;  %v7086_v25 = vrot.slane %v7058_v23, %v13120_v63  ;;  %v11032_v48 = vld [vmem:[%s13985_s7 + $0x3e0] ss:$8 sps:$4 sm:$0xff]   ;;  %v6678_v23 = vcombine.low %v6427_v44, %v6428_v34  ;;  %v11088_v33 = vld [vmem:[%s13985_s7 + $0x554] ss:$8 sps:$4 sm:$0xff]  }
 0x4d5   : > { %v11089_v34 = vld [vmem:[%s13985_s7 + $0x440] ss:$8 sps:$4 sm:$0xff]   ;;  %v11100_v44 = vld [vmem:[%s13985_s7 + $0x534] ss:$8 sps:$4 sm:$0xff]  }
 0x4d6   : > { %v7079_v59 = vrot.slane %v7057_v24, %v13120_v63  ;;  %v7087_v61 = vcombine.high %v7065_v38, %v7065_v38  ;;  %v7090_v22 = vcombine.high %v7086_v25, %v7086_v25  ;;  %v11040_v24 = vld [vmem:[%s13985_s7 + $0x3d4] ss:$8 sps:$4 sm:$0xff]  }
 0x4d8   : > { %8654 = vmatprep.mubr.bf16.mxu0 %v7079_v59  ;;  %v7089_v53 = vcombine.high %v7079_v59, %v7079_v59  ;;  %v11043_v59 = vld [vmem:[%s13985_s7 + $0x2c4] ss:$8 sps:$4 sm:$0xff]  }
 0x4d9   : > { %8655 = vmatmul.mubr.bf16.vlgmr.msra.gmra.mxu0 %v7065_v38  ;;  %v11035_v38 = vld [vmem:[%s13985_s7 + $0x2d0] ss:$8 sps:$4 sm:$0xff]  }
 0x4da   : > { %8705 = vmatpush1.bf16.msra.mxu0 %v10975_v2  ;;  %8695 = vmatprep.mubr.bf16.mxu1 %v7089_v53  ;;  %v11038_v2 = vld [vmem:[%s13985_s7 + $0x3d0] ss:$8 sps:$4 sm:$0xff]   ;;  %v11046_v53 = vld [vmem:[%s13985_s7 + $0x3c4] ss:$8 sps:$4 sm:$0xff]  }
 0x4db   : > { %8736 = vmatprep.mubr.bf16.mxu0 %v7086_v25  ;;  %8696 = vmatmul.mubr.bf16.vlgmr.msra.gmra.mxu1 %v7087_v61  ;;  %v13288_v25 = vrot.slane %v6678_v23, %v13120_v63  ;;  %v11049_v61 = vld [vmem:[%s13985_s7 + $0x2b4] ss:$8 sps:$4 sm:$0xff]  }
 0x4dc   : > { %8746 = vmatpush1.bf16.msra.mxu1 %v10978_v43  ;;  %8706 = vmatprep.subr.bf16.mxu0 %v10983_v21  ;;  %v11041_v43 = vld [vmem:[%s13985_s7 + $0x2c0] ss:$8 sps:$4 sm:$0xff]   ;;  %v9880_v23 = vld.sshfl [vmem:[#allocation4 + $0xc] sm:$0x33 pattern:$0x76325410] }
 0x4dd   : > { %8777 = vmatprep.mubr.bf16.mxu1 %v7090_v22  ;;  %8747 = vmatprep.subr.bf16.mxu1 %v10986_v54  ;;  %v6709_v21 = vcombine.low %v13145_v62, %v13288_v25  ;;  %v11044_v54 = vld [vmem:[%s13985_s7 + $0x3c0] ss:$8 sps:$4 sm:$0xff]   ;;  %v11047_v22 = vld [vmem:[%s13985_s7 + $0x2b0] ss:$8 sps:$4 sm:$0xff]  }
 0x4de   : > { %8707 = vmatpush1.bf16.msra.mxu0 %v10981_v27  ;;  %v11052_v27 = vld [vmem:[%s13985_s7 + $0x3b4] ss:$8 sps:$4 sm:$0xff]  }
 0x4df   : > { %8708 = vmatprep.subr.bf16.mxu0 %v10989_v7  ;;  %v6717_v7 = vrot.slane %v6709_v21, %v13120_v63  ;;  %v11112_v21 = vld [vmem:[%s13985_s7 + $0x514] ss:$8 sps:$4 sm:$0xff]  }
 0x4e0   : > { %8748 = vmatpush1.bf16.msra.mxu1 %v10984_v29  ;;  %v11055_v29 = vld [vmem:[%s13985_s7 + $0x2a4] ss:$8 sps:$4 sm:$0xff]  }
 0x4e1   : > { %8749 = vmatprep.subr.bf16.mxu1 %v10992_v52  ;;  %v11050_v52 = vld [vmem:[%s13985_s7 + $0x3b0] ss:$8 sps:$4 sm:$0xff]  }
 0x4e2   : > { %8709 = vmatpush1.bf16.msra.mxu0 %v10987_v41  ;;  %v6604_v41 = vrot.slane %v6596_v28, %v13120_v63  ;;  %v11059_v28 = vld [vmem:[%s13985_s7 + $0x290] ss:$8 sps:$4 sm:$0xff]  }
 0x4e3   : > { %8710 = vmatprep.subr.bf16.mxu0 %v10995_v10  ;;  %v11058_v10 = vld [vmem:[%s13985_s7 + $0x3a4] ss:$8 sps:$4 sm:$0xff]  }
 0x4e4   : > { %8750 = vmatpush1.bf16.msra.mxu1 %v10990_v3  ;;  %v11053_v3 = vld [vmem:[%s13985_s7 + $0x2a0] ss:$8 sps:$4 sm:$0xff]  }
 0x4e5   : > { %8751 = vmatprep.subr.bf16.mxu1 %v10998_v4  ;;  %v9885_v4 = vcombine.low %v6604_v41, %v6717_v7  ;;  %v11110_v7 = vld [vmem:[%s13985_s7 + $0x510] ss:$8 sps:$4 sm:$0xff]   ;;  %v6480_v41 = vshrl.u32 %v9880_v23, 16 }
 0x4e6   : > { %8711 = vmatpush1.bf16.msra.mxu0 %v10993_v13  ;;  %v11061_v13 = vld [vmem:[%s13985_s7 + $0x294] ss:$8 sps:$4 sm:$0xff]  }
 0x4e7   : > { %8712 = vmatprep.subr.bf16.mxu0 %v11001_v35  ;;  %v13340_v35 = vrot.slane %v9885_v4, %v13120_v63 }
 0x4e8   : > { %8752 = vmatpush1.bf16.msra.mxu1 %v10996_v12  ;;  %v11067_v12 = vld [vmem:[%s13985_s7 + $0x284] ss:$8 sps:$4 sm:$0xff]  }
 0x4e9   : > { %8753 = vmatprep.subr.bf16.mxu1 %v11004_v32  ;;  %v11062_v32 = vld [vmem:[%s13985_s7 + $0x390] ss:$8 sps:$4 sm:$0xff]  }
 0x4ea   : > { %8713 = vmatpush1.bf16.msra.mxu0 %v10999_v16  ;;  %v11070_v16 = vld [vmem:[%s13985_s7 + $0x384] ss:$8 sps:$4 sm:$0xff]  }
 0x4eb   : > { %8714 = vmatprep.subr.bf16.mxu0 %v11007_v31  ;;  %v11065_v31 = vld [vmem:[%s13985_s7 + $0x280] ss:$8 sps:$4 sm:$0xff]  }
 0x4ec   : > { %8754 = vmatpush1.bf16.msra.mxu1 %v11002_v47  ;;  %v7107_v47 = vcombine.high %v13340_v35, %v13340_v35 }
 0x4ed   : > { %8755 = vmatprep.subr.bf16.mxu1 %v11010_v8  ;;  %v11073_v8 = vld [vmem:[%s13985_s7 + $0x474] ss:$8 sps:$4 sm:$0xff]  }
 0x4ee   : > { %8715 = vmatpush1.bf16.msra.mxu0 %v11005_v18  ;;  %v11068_v18 = vld [vmem:[%s13985_s7 + $0x380] ss:$8 sps:$4 sm:$0xff]  }
 0x4ef   : > { %8716 = vmatprep.subr.bf16.mxu0 %v11013_v14  ;;  %v7072_v14 = vrot.slane %v13148_v5, %v13120_v63  ;;  %v11074_v5 = vld [vmem:[%s13985_s7 + $0x570] ss:$8 sps:$4 sm:$0xff]  }
 0x4f0   : > { %8756 = vmatpush1.bf16.msra.mxu1 %v11008_v57  ;;  %v11076_v57 = vld [vmem:[%s13985_s7 + $0x574] ss:$8 sps:$4 sm:$0xff]  }
 0x4f1   : > { %8757 = vmatprep.subr.bf16.mxu1 %v11016_v15  ;;  %v11071_v15 = vld [vmem:[%s13985_s7 + $0x470] ss:$8 sps:$4 sm:$0xff]  }
 0x4f2   : > { %8717 = vmatpush1.bf16.msra.mxu0 %v11011_v37  ;;  %v7129_v37 = vrot.slane %v7107_v47, %v13120_v63  ;;  %v11127_v47 = vld [vmem:[%s13985_s7 + $0x4e4] ss:$8 sps:$4 sm:$0xff]  }
 0x4f3   : > { %8718 = vmatprep.subr.bf16.mxu0 %v11019_v56  ;;  %v11079_v56 = vld [vmem:[%s13985_s7 + $0x464] ss:$8 sps:$4 sm:$0xff]  }
 0x4f4   : > { %8758 = vmatpush1.bf16.msra.mxu1 %v11014_v9  ;;  %v7088_v9 = vcombine.high %v7072_v14, %v7072_v14  ;;  %v7139_v39 = vcombine.high %v7129_v37, %v7129_v37 }
 0x4f5   : > { %8759 = vmatprep.subr.bf16.mxu1 %v11022_v26  ;;  %v11082_v26 = vld [vmem:[%s13985_s7 + $0x564] ss:$8 sps:$4 sm:$0xff]  }
 0x4f6   : > { %8719 = vmatpush1.bf16.msra.mxu0 %v11017_v45  ;;  %v11077_v45 = vld [vmem:[%s13985_s7 + $0x460] ss:$8 sps:$4 sm:$0xff]  }
 0x4f7   : > { %8720 = vmatprep.subr.bf16.mxu0 %v11025_v46  ;;  %v11085_v46 = vld [vmem:[%s13985_s7 + $0x454] ss:$8 sps:$4 sm:$0xff]  }
 0x4f8   : > { %8760 = vmatpush1.bf16.msra.mxu1 %v11020_v55  ;;  %v11080_v55 = vld [vmem:[%s13985_s7 + $0x560] ss:$8 sps:$4 sm:$0xff]  }
 0x4f9   : > { %8761 = vmatprep.subr.bf16.mxu1 %v11028_v51  ;;  %v11083_v51 = vld [vmem:[%s13985_s7 + $0x450] ss:$8 sps:$4 sm:$0xff]  }
 0x4fa   : > { %8721 = vmatpush2.bf16.msra.mxu0 %v11023_v19  ;;  %v11091_v19 = vld [vmem:[%s13985_s7 + $0x444] ss:$8 sps:$4 sm:$0xff]  }
 0x4fb   : > { %8722 = vmatprep.subr.bf16.mxu0 %v11031_v1  ;;  %v11086_v1 = vld [vmem:[%s13985_s7 + $0x550] ss:$8 sps:$4 sm:$0xff]  }
 0x4fc   : > { %8762 = vmatpush2.bf16.msra.mxu1 %v11026_v40  ;;  %v11094_v40 = vld [vmem:[%s13985_s7 + $0x544] ss:$8 sps:$4 sm:$0xff]  }
 0x4fd   : > { %8763 = vmatprep.subr.bf16.mxu1 %v11034_v0  ;;  %v11097_v0 = vld [vmem:[%s13985_s7 + $0x434] ss:$8 sps:$4 sm:$0xff]  }
 0x4fe   : > { %8723 = vmatpush2.bf16.msra.mxu0 %v11029_v30  ;;  %v11092_v30 = vld [vmem:[%s13985_s7 + $0x540] ss:$8 sps:$4 sm:$0xff]  }
 0x4ff   : > { %8724 = vmatprep.subr.bf16.mxu0 %v11037_v42  ;;  %v11095_v42 = vld [vmem:[%s13985_s7 + $0x430] ss:$8 sps:$4 sm:$0xff]  }
 0x500   : > { %8764 = vmatpush2.bf16.msra.mxu1 %v11032_v48  ;;  %v11103_v48 = vld [vmem:[%s13985_s7 + $0x424] ss:$8 sps:$4 sm:$0xff]  }
 0x501   : > { %8765 = vmatprep.subr.bf16.mxu1 %v11040_v24  ;;  %v11098_v24 = vld [vmem:[%s13985_s7 + $0x530] ss:$8 sps:$4 sm:$0xff]  }
 0x502   : > { %8725 = vmatpush2.bf16.msra.mxu0 %v11035_v38  ;;  %v11106_v38 = vld [vmem:[%s13985_s7 + $0x524] ss:$8 sps:$4 sm:$0xff]  }
 0x503   : > { %8726 = vmatprep.subr.bf16.mxu0 %v11043_v59  ;;  %v11101_v59 = vld [vmem:[%s13985_s7 + $0x420] ss:$8 sps:$4 sm:$0xff]  }
 0x504   : > { %8766 = vmatpush2.bf16.msra.mxu1 %v11038_v2  ;;  %v6464_v2 = vcombine.high %v9880_v23, %v9880_v23 }
 0x505   : > { %8767 = vmatprep.subr.bf16.mxu1 %v11046_v53  ;;  %v11109_v53 = vld [vmem:[%s13985_s7 + $0x414] ss:$8 sps:$4 sm:$0xff]  }
 0x506   : > { %8727 = vmatpush2.bf16.msra.mxu0 %v11041_v43  ;;  %v11104_v43 = vld [vmem:[%s13985_s7 + $0x520] ss:$8 sps:$4 sm:$0xff]  }
 0x507   : > { %8728 = vmatprep.subr.bf16.mxu0 %v11049_v61  ;;  %v11107_v61 = vld [vmem:[%s13985_s7 + $0x410] ss:$8 sps:$4 sm:$0xff]  }
 0x508   : > { %8768 = vmatpush2.bf16.msra.mxu1 %v11044_v54  ;;  %v6482_v54 = vshll.u32 %v9880_v23, 16  ;;  %v11152_v23 = vld [vmem:[%s13985_s7 + $0x5a0] ss:$8 sps:$4 sm:$0xff]  }
 0x509   : > { %8769 = vmatprep.subr.bf16.mxu1 %v11052_v27  ;;  %v6489_v27 = vshll.u32 %v6464_v2, 16 }
 0x50a   : > { %8729 = vmatpush2.bf16.msra.mxu0 %v11047_v22  ;;  %v11115_v22 = vld [vmem:[%s13985_s7 + $0x404] ss:$8 sps:$4 sm:$0xff]  }
 0x50b   : > { %8730 = vmatprep.subr.bf16.mxu0 %v11055_v29  ;;  %v11118_v29 = vld [vmem:[%s13985_s7 + $0x504] ss:$8 sps:$4 sm:$0xff]   ;;  %v6491_v4 = vrot.slane %v6489_v27, 1  ;;  %v11164_v27 = vld [vmem:[%s13985_s7 + $0x580] ss:$8 sps:$4 sm:$0xff]  }
 0x50c   : > { %8770 = vmatpush2.bf16.msra.mxu1 %v11050_v52  ;;  %v11113_v52 = vld [vmem:[%s13985_s7 + $0x400] ss:$8 sps:$4 sm:$0xff]  }
 0x50d   : > { %8771 = vmatprep.subr.bf16.mxu1 %v11058_v10  ;;  %v6484_v10 = vrot.slane %v6482_v54, 1  ;;  %v11169_v54 = vld [vmem:[%s13985_s7 + $0x674] ss:$8 sps:$4 sm:$0xff]  }
 0x50e   : > { %8731 = vmatpush2.bf16.msra.mxu0 %v11053_v3  ;;  %v6487_v3 = vshrl.u32 %v6464_v2, 16  ;;  %v11163_v2 = vld [vmem:[%s13985_s7 + $0x484] ss:$8 sps:$4 sm:$0xff]  }
 0x50f   : > { %8732 = vmatprep.subr.bf16.mxu0 %v11061_v13  ;;  %v11121_v13 = vld [vmem:[%s13985_s7 + $0x4f4] ss:$8 sps:$4 sm:$0xff]  }
 0x510   : > { %8772 = vmatpush2.bf16.msra.mxu1 %v11056_v20  ;;  %v9878_v20 = vld.sshfl [vmem:[#allocation4 + $0xc] sm:$0x11 pattern:$0x76325410] }
 0x511   : > { %8773 = vmatprep.subr.bf16.mxu1 %v11064_v17  ;;  %v11116_v17 = vld [vmem:[%s13985_s7 + $0x500] ss:$8 sps:$4 sm:$0xff]  }
 0x512   : > { %8733 = vmatpush2.bf16.msra.mxu0 %v11059_v28  ;;  %v11124_v28 = vld [vmem:[%s13985_s7 + $0x5f4] ss:$8 sps:$4 sm:$0xff]  }
 0x513   : > { %8734 = vmatprep.subr.bf16.mxu0 %v11067_v12  ;;  %v11119_v12 = vld [vmem:[%s13985_s7 + $0x4f0] ss:$8 sps:$4 sm:$0xff]  }
 0x514   : > { %8774 = vmatpush2.bf16.msra.mxu1 %v11062_v32  ;;  %v6446_v32 = vcombine.high %v9878_v20, %v9878_v20 }
 0x515   : > { %8775 = vmatprep.subr.bf16.mxu1 %v11070_v16  ;;  %v6485_v16 = vor.u32 %v6484_v10, %v6480_v41  ;;  %v11175_v41 = vld [vmem:[%s13985_s7 + $0x664] ss:$8 sps:$4 sm:$0xff]  }
 0x516   : > { %8735 = vmatpush2.bf16.msra.mxu0 %v11065_v31  ;;  %v6492_v31 = vor.u32 %v6491_v4, %v6487_v3  ;;  %v11178_v3 = vld [vmem:[%s13985_s7 + $0x764] ss:$8 sps:$4 sm:$0xff]  }
 0x517   : > { %8786 = vmatprep.subr.bf16.mxu0 %v11073_v8  ;;  %v11122_v8 = vld [vmem:[%s13985_s7 + $0x5f0] ss:$8 sps:$4 sm:$0xff]  }
 0x518   : > { %8776 = vmatpush2.bf16.msra.mxu1 %v11068_v18  ;;  %v11130_v18 = vld [vmem:[%s13985_s7 + $0x5e4] ss:$8 sps:$4 sm:$0xff]  }
 0x519   : > { %8737 = vmatmul.mubr.bf16.vlgmr.msra.gmra.mxu0 %v7072_v14  ;;  %8827 = vmatprep.subr.bf16.mxu1 %v11076_v57  ;;  %v11125_v14 = vld [vmem:[%s13985_s7 + $0x4e0] ss:$8 sps:$4 sm:$0xff]   ;;  %v6679_v57 = vcombine.low %v9878_v20, %v6446_v32  ;;  %v11181_v20 = vld [vmem:[%s13985_s7 + $0x654] ss:$8 sps:$4 sm:$0xff]   ;;  %v11187_v32 = vld [vmem:[%s13985_s7 + $0x644] ss:$8 sps:$4 sm:$0xff]  }
 0x51a   : > { %8787 = vmatpush1.bf16.msra.mxu0 %v11071_v15  ;;  %8818 = vmatprep.mubr.bf16.mxu0 %v7129_v37  ;;  %v6680_v15 = vcombine.low %v6485_v16, %v6492_v31  ;;  %v11133_v37 = vld [vmem:[%s13985_s7 + $0x4d4] ss:$8 sps:$4 sm:$0xff]   ;;  %v11182_v16 = vld [vmem:[%s13985_s7 + $0x750] ss:$8 sps:$4 sm:$0xff]   ;;  %v11190_v31 = vld [vmem:[%s13985_s7 + $0x744] ss:$8 sps:$4 sm:$0xff]  }
 0x51b   : > { %8778 = vmatmul.mubr.bf16.vlgmr.msra.gmra.mxu1 %v7088_v9  ;;  %8788 = vmatprep.subr.bf16.mxu0 %v11079_v56  ;;  %v11128_v56 = vld [vmem:[%s13985_s7 + $0x5e0] ss:$8 sps:$4 sm:$0xff]   ;;  %v11131_v9 = vld [vmem:[%s13985_s7 + $0x4d0] ss:$8 sps:$4 sm:$0xff]  }
 0x51c   : > { %8828 = vmatpush1.bf16.msra.mxu1 %v11074_v5  ;;  %8859 = vmatprep.mubr.bf16.mxu1 %v7139_v39  ;;  %v11136_v5 = vld [vmem:[%s13985_s7 + $0x5d4] ss:$8 sps:$4 sm:$0xff]   ;;  %v6708_v39 = vrot.slane %v6680_v15, %v13120_v63  ;;  %v11199_v15 = vld [vmem:[%s13985_s7 + $0x624] ss:$8 sps:$4 sm:$0xff]  }
 0x51d   : > { %8829 = vmatprep.subr.bf16.mxu1 %v11082_v26  ;;  %v6701_v26 = vrot.slane %v6679_v57, %v13120_v63  ;;  %v11191_v57 = vld [vmem:[%s13985_s7 + $0x630] ss:$8 sps:$4 sm:$0xff]  }
 0x51e   : > { %8789 = vmatpush1.bf16.msra.mxu0 %v11077_v45  ;;  %v11139_v45 = vld [vmem:[%s13985_s7 + $0x4c4] ss:$8 sps:$4 sm:$0xff]  }
 0x51f   : > { %8790 = vmatprep.subr.bf16.mxu0 %v11085_v46  ;;  %v11134_v46 = vld [vmem:[%s13985_s7 + $0x5d0] ss:$8 sps:$4 sm:$0xff]  }
 0x520   : > { %8830 = vmatpush1.bf16.msra.mxu1 %v11080_v55  ;;  %v11142_v55 = vld [vmem:[%s13985_s7 + $0x5c4] ss:$8 sps:$4 sm:$0xff]  }
 0x521   : > { %8831 = vmatprep.subr.bf16.mxu1 %v11088_v33  ;;  %v11137_v33 = vld [vmem:[%s13985_s7 + $0x4c0] ss:$8 sps:$4 sm:$0xff]  }
 0x522   : > { %8791 = vmatpush1.bf16.msra.mxu0 %v11083_v51  ;;  %v6710_v51 = vcombine.low %v6701_v26, %v6708_v39  ;;  %v11200_v26 = vld [vmem:[%s13985_s7 + $0x720] ss:$8 sps:$4 sm:$0xff]   ;;  %v11208_v39 = vld [vmem:[%s13985_s7 + $0x714] ss:$8 sps:$4 sm:$0xff]  }
 0x523   : > { %8792 = vmatprep.subr.bf16.mxu0 %v11091_v19  ;;  %v11145_v19 = vld [vmem:[%s13985_s7 + $0x4b4] ss:$8 sps:$4 sm:$0xff]  }
 0x524   : > { %8832 = vmatpush1.bf16.msra.mxu1 %v11086_v1  ;;  %v11140_v1 = vld [vmem:[%s13985_s7 + $0x5c0] ss:$8 sps:$4 sm:$0xff]  }
 0x525   : > { %8833 = vmatprep.subr.bf16.mxu1 %v11094_v40  ;;  %v11148_v40 = vld [vmem:[%s13985_s7 + $0x5b4] ss:$8 sps:$4 sm:$0xff]  }
 0x526   : > { %8793 = vmatpush1.bf16.msra.mxu0 %v11089_v34  ;;  %v11143_v34 = vld [vmem:[%s13985_s7 + $0x4b0] ss:$8 sps:$4 sm:$0xff]  }
 0x527   : > { %8794 = vmatprep.subr.bf16.mxu0 %v11097_v0  ;;  %v6611_v0 = vrot.slane %v6597_v60, %v13120_v63  ;;  %v11157_v60 = vld [vmem:[%s13985_s7 + $0x494] ss:$8 sps:$4 sm:$0xff]  }
 0x528   : > { %8834 = vmatpush1.bf16.msra.mxu1 %v11092_v30  ;;  %v6724_v30 = vrot.slane %v6710_v51, %v13120_v63  ;;  %v11209_v51 = vld [vmem:[%s13985_s7 + $0x600] ss:$8 sps:$4 sm:$0xff]  }
 0x529   : > { %8835 = vmatprep.subr.bf16.mxu1 %v11100_v44  ;;  %v11151_v44 = vld [vmem:[%s13985_s7 + $0x4a4] ss:$8 sps:$4 sm:$0xff]  }
 0x52a   : > { %8795 = vmatpush1.bf16.msra.mxu0 %v11095_v42  ;;  %v11146_v42 = vld [vmem:[%s13985_s7 + $0x5b0] ss:$8 sps:$4 sm:$0xff]   ;;  %v9886_v62 = vcombine.low %v6611_v0, %v6724_v30  ;;  %v11223_v30 = vld [vmem:[%s13985_s7 + $0x6e4] ss:$8 sps:$4 sm:$0xff]  }
 0x52b   : > { %8796 = vmatprep.subr.bf16.mxu0 %v11103_v48  ;;  %v11154_v48 = vld [vmem:[%s13985_s7 + $0x5a4] ss:$8 sps:$4 sm:$0xff]   ;;  %v11215_v0 = vld [vmem:[%s13985_s7 + $0x6f0] ss:$8 sps:$4 sm:$0xff]  }
 0x52c   : > { %8836 = vmatpush1.bf16.msra.mxu1 %v11098_v24  ;;  %v11160_v24 = vld [vmem:[%s13985_s7 + $0x594] ss:$8 sps:$4 sm:$0xff]  }
 0x52d   : > { %8837 = vmatprep.subr.bf16.mxu1 %v11106_v38  ;;  %v11155_v38 = vld [vmem:[%s13985_s7 + $0x490] ss:$8 sps:$4 sm:$0xff]  }
 0x52e   : > { %8797 = vmatpush1.bf16.msra.mxu0 %v11101_v59  ;;  %v13547_v59 = vrot.slane %v9886_v62, %v13120_v63  ;;  %v11229_v62 = vld [vmem:[%s13985_s7 + $0x6d4] ss:$8 sps:$4 sm:$0xff]  }
 0x52f   : > { %8798 = vmatprep.subr.bf16.mxu0 %v11109_v53  ;;  %v11158_v53 = vld [vmem:[%s13985_s7 + $0x590] ss:$8 sps:$4 sm:$0xff]  }
 0x530   : > { %8838 = vmatpush1.bf16.msra.mxu1 %v11104_v43  ;;  %v11166_v43 = vld [vmem:[%s13985_s7 + $0x584] ss:$8 sps:$4 sm:$0xff]  }
 0x531   : > { %8839 = vmatprep.subr.bf16.mxu1 %v11112_v21  ;;  %v11161_v21 = vld [vmem:[%s13985_s7 + $0x480] ss:$8 sps:$4 sm:$0xff]  }
 0x532   : > { %8799 = vmatpush1.bf16.msra.mxu0 %v11107_v61  ;;  %v7108_v61 = vcombine.high %v13547_v59, %v13547_v59 }
 0x533   : > { %8800 = vmatprep.subr.bf16.mxu0 %v11115_v22  ;;  %v7115_v22 = vrot.slane %v13340_v35, %v13120_v63  ;;  %v11170_v35 = vld [vmem:[%s13985_s7 + $0x770] ss:$8 sps:$4 sm:$0xff]  }
 0x534   : > { %8840 = vmatpush1.bf16.msra.mxu1 %v11110_v7  ;;  %v11172_v7 = vld [vmem:[%s13985_s7 + $0x774] ss:$8 sps:$4 sm:$0xff]  }
 0x535   : > { %8841 = vmatprep.subr.bf16.mxu1 %v11118_v29  ;;  %v11167_v29 = vld [vmem:[%s13985_s7 + $0x670] ss:$8 sps:$4 sm:$0xff]   ;;  %v7137_v10 = vcombine.high %v7115_v22, %v7115_v22 }
 0x536   : > { %8801 = vmatpush1.bf16.msra.mxu0 %v11113_v52  ;;  %v7136_v52 = vrot.slane %v7108_v61, %v13120_v63  ;;  %v11238_v61 = vld [vmem:[%s13985_s7 + $0x7c4] ss:$8 sps:$4 sm:$0xff]  }
 0x537   : > { %8802 = vmatprep.subr.bf16.mxu0 %v11121_v13  ;;  %v11173_v13 = vld [vmem:[%s13985_s7 + $0x660] ss:$8 sps:$4 sm:$0xff]  }
 0x538   : > { %8842 = vmatpush1.bf16.msra.mxu1 %v11116_v17  ;;  %v7140_v4 = vcombine.high %v7136_v52, %v7136_v52  ;;  %v11176_v17 = vld [vmem:[%s13985_s7 + $0x760] ss:$8 sps:$4 sm:$0xff]  }
 0x539   : > { %8843 = vmatprep.subr.bf16.mxu1 %v11124_v28  ;;  %v11184_v28 = vld [vmem:[%s13985_s7 + $0x754] ss:$8 sps:$4 sm:$0xff]  }
 0x53a   : > { %8803 = vmatpush2.bf16.msra.mxu0 %v11119_v12  ;;  %v11179_v12 = vld [vmem:[%s13985_s7 + $0x650] ss:$8 sps:$4 sm:$0xff]  }
 0x53b   : > { %8804 = vmatprep.subr.bf16.mxu0 %v11127_v47  ;;  %v11185_v47 = vld [vmem:[%s13985_s7 + $0x640] ss:$8 sps:$4 sm:$0xff]  }
 0x53c   : > { %8844 = vmatpush2.bf16.msra.mxu1 %v11122_v8  ;;  %v11193_v8 = vld [vmem:[%s13985_s7 + $0x634] ss:$8 sps:$4 sm:$0xff]  }
 0x53d   : > { %8845 = vmatprep.subr.bf16.mxu1 %v11130_v18  ;;  %v11188_v18 = vld [vmem:[%s13985_s7 + $0x740] ss:$8 sps:$4 sm:$0xff]  }
 0x53e   : > { %8805 = vmatpush2.bf16.msra.mxu0 %v11125_v14  ;;  %v11196_v14 = vld [vmem:[%s13985_s7 + $0x734] ss:$8 sps:$4 sm:$0xff]  }
 0x53f   : > { %8806 = vmatprep.subr.bf16.mxu0 %v11133_v37  ;;  %v11194_v37 = vld [vmem:[%s13985_s7 + $0x730] ss:$8 sps:$4 sm:$0xff]  }
 0x540   : > { %8846 = vmatpush2.bf16.msra.mxu1 %v11128_v56  ;;  %v11202_v56 = vld [vmem:[%s13985_s7 + $0x724] ss:$8 sps:$4 sm:$0xff]  }
 0x541   : > { %8847 = vmatprep.subr.bf16.mxu1 %v11136_v5  ;;  %v11197_v5 = vld [vmem:[%s13985_s7 + $0x620] ss:$8 sps:$4 sm:$0xff]  }
 0x542   : > { %8807 = vmatpush2.bf16.msra.mxu0 %v11131_v9  ;;  %v11205_v9 = vld [vmem:[%s13985_s7 + $0x614] ss:$8 sps:$4 sm:$0xff]  }
 0x543   : > { %8808 = vmatprep.subr.bf16.mxu0 %v11139_v45  ;;  %v11203_v45 = vld [vmem:[%s13985_s7 + $0x610] ss:$8 sps:$4 sm:$0xff]  }
 0x544   : > { %8848 = vmatpush2.bf16.msra.mxu1 %v11134_v46  ;;  %v11211_v46 = vld [vmem:[%s13985_s7 + $0x604] ss:$8 sps:$4 sm:$0xff]  }
 0x545   : > { %8849 = vmatprep.subr.bf16.mxu1 %v11142_v55  ;;  %v11206_v55 = vld [vmem:[%s13985_s7 + $0x710] ss:$8 sps:$4 sm:$0xff]  }
 0x546   : > { %8809 = vmatpush2.bf16.msra.mxu0 %v11137_v33  ;;  %v11214_v33 = vld [vmem:[%s13985_s7 + $0x704] ss:$8 sps:$4 sm:$0xff]  }
 0x547   : > { %8810 = vmatprep.subr.bf16.mxu0 %v11145_v19  ;;  %v11217_v19 = vld [vmem:[%s13985_s7 + $0x6f4] ss:$8 sps:$4 sm:$0xff]  }
 0x548   : > { %8850 = vmatpush2.bf16.msra.mxu1 %v11140_v1  ;;  %v11212_v1 = vld [vmem:[%s13985_s7 + $0x700] ss:$8 sps:$4 sm:$0xff]  }
 0x549   : > { %8851 = vmatprep.subr.bf16.mxu1 %v11148_v40  ;;  %v11220_v40 = vld [vmem:[%s13985_s7 + $0x7f4] ss:$8 sps:$4 sm:$0xff]  }
 0x54a   : > { %8811 = vmatpush2.bf16.msra.mxu0 %v11143_v34  ;;  %v9882_v34 = vld.sshfl [vmem:[#allocation4 + $0xc] sm:$0x22 pattern:$0x76325410] }
 0x54b   : > { %8812 = vmatprep.subr.bf16.mxu0 %v11151_v44  ;;  %v11218_v44 = vld [vmem:[%s13985_s7 + $0x7f0] ss:$8 sps:$4 sm:$0xff]  }
 0x54c   : > { %8852 = vmatpush2.bf16.msra.mxu1 %v11146_v42  ;;  %v6510_v42 = vcombine.high %v9882_v34, %v9882_v34 }
 0x54d   : > { %8853 = vmatprep.subr.bf16.mxu1 %v11154_v48  ;;  %v11226_v48 = vld [vmem:[%s13985_s7 + $0x7e4] ss:$8 sps:$4 sm:$0xff]  }
 0x54e   : > { %8813 = vmatpush2.bf16.msra.mxu0 %v11149_v49  ;;  %v11221_v49 = vld [vmem:[%s13985_s7 + $0x6e0] ss:$8 sps:$4 sm:$0xff]  }
 0x54f   : > { %8814 = vmatprep.subr.bf16.mxu0 %v11157_v60  ;;  %v11224_v60 = vld [vmem:[%s13985_s7 + $0x7e0] ss:$8 sps:$4 sm:$0xff]  }
 0x550   : > { %8854 = vmatpush2.bf16.msra.mxu1 %v11152_v23  ;;  %v6513_v23 = vrot.slane %v9882_v34, 1 }
 0x551   : > { %8855 = vmatprep.subr.bf16.mxu1 %v11160_v24  ;;  %v6514_v24 = vrot.slane %v6510_v42, 1  ;;  %v11274_v42 = vld [vmem:[%s13985_s7 + $0x844] ss:$8 sps:$4 sm:$0xff]  }
 0x552   : > { %8815 = vmatpush2.bf16.msra.mxu0 %v11155_v38  ;;  %v11232_v38 = vld [vmem:[%s13985_s7 + $0x7d4] ss:$8 sps:$4 sm:$0xff]  }
 0x553   : > { %8816 = vmatprep.subr.bf16.mxu0 %v11163_v2  ;;  %v11227_v2 = vld [vmem:[%s13985_s7 + $0x6d0] ss:$8 sps:$4 sm:$0xff]  }
 0x554   : > { %8856 = vmatpush2.bf16.msra.mxu1 %v11158_v53  ;;  %v11235_v53 = vld [vmem:[%s13985_s7 + $0x6c4] ss:$8 sps:$4 sm:$0xff]  }
 0x555   : > { %8857 = vmatprep.subr.bf16.mxu1 %v11166_v43  ;;  %v11230_v43 = vld [vmem:[%s13985_s7 + $0x7d0] ss:$8 sps:$4 sm:$0xff]  }
 0x556   : > { %8817 = vmatpush2.bf16.msra.mxu0 %v11161_v21  ;;  %v6726_v21 = vcombine.low %v6513_v23, %v6514_v24  ;;  %v11280_v23 = vld [vmem:[%s13985_s7 + $0x824] ss:$8 sps:$4 sm:$0xff]   ;;  %v11278_v24 = vld [vmem:[%s13985_s7 + $0x820] ss:$8 sps:$4 sm:$0xff]  }
 0x557   : > { %8868 = vmatprep.subr.bf16.mxu0 %v11169_v54  ;;  %v11233_v54 = vld [vmem:[%s13985_s7 + $0x6c0] ss:$8 sps:$4 sm:$0xff]  }
 0x558   : > { %8858 = vmatpush2.bf16.msra.mxu1 %v11164_v27  ;;  %v11241_v27 = vld [vmem:[%s13985_s7 + $0x6b4] ss:$8 sps:$4 sm:$0xff]  }
 0x559   : > { %8819 = vmatmul.mubr.bf16.vlgmr.msra.gmra.mxu0 %v7115_v22  ;;  %8909 = vmatprep.subr.bf16.mxu1 %v11172_v7  ;;  %v11236_v22 = vld [vmem:[%s13985_s7 + $0x7c0] ss:$8 sps:$4 sm:$0xff]   ;;  %v6733_v7 = vrot.slane %v6726_v21, %v13120_v63  ;;  %v11289_v21 = vld [vmem:[%s13985_s7 + $0x8f4] ss:$8 sps:$4 sm:$0xff]  }
 0x55a   : > { %8869 = vmatpush1.bf16.msra.mxu0 %v11167_v29  ;;  %8900 = vmatprep.mubr.bf16.mxu0 %v7136_v52  ;;  %v11244_v29 = vld [vmem:[%s13985_s7 + $0x7b4] ss:$8 sps:$4 sm:$0xff]   ;;  %v11239_v52 = vld [vmem:[%s13985_s7 + $0x6b0] ss:$8 sps:$4 sm:$0xff]  }
 0x55b   : > { %8860 = vmatmul.mubr.bf16.vlgmr.msra.gmra.mxu1 %v7137_v10  ;;  %8870 = vmatprep.subr.bf16.mxu0 %v11175_v41  ;;  %v11247_v41 = vld [vmem:[%s13985_s7 + $0x6a4] ss:$8 sps:$4 sm:$0xff]   ;;  %v6627_v10 = vrot.slane %v13288_v25, %v13120_v63  ;;  %v11248_v25 = vld [vmem:[%s13985_s7 + $0x7a0] ss:$8 sps:$4 sm:$0xff]  }
 0x55c   : > { %8910 = vmatpush1.bf16.msra.mxu1 %v11170_v35  ;;  %8941 = vmatprep.mubr.bf16.mxu1 %v7140_v4  ;;  %v11242_v35 = vld [vmem:[%s13985_s7 + $0x7b0] ss:$8 sps:$4 sm:$0xff]   ;;  %v11250_v4 = vld [vmem:[%s13985_s7 + $0x7a4] ss:$8 sps:$4 sm:$0xff]  }
 0x55d   : > { %8911 = vmatprep.subr.bf16.mxu1 %v11178_v3  ;;  %v6740_v3 = vrot.slane %v6733_v7, %v13120_v63  ;;  %v11293_v7 = vld [vmem:[%s13985_s7 + $0x8d0] ss:$8 sps:$4 sm:$0xff]  }
 0x55e   : > { %8871 = vmatpush1.bf16.msra.mxu0 %v11173_v13  ;;  %v11245_v13 = vld [vmem:[%s13985_s7 + $0x6a0] ss:$8 sps:$4 sm:$0xff]  }
 0x55f   : > { %8872 = vmatprep.subr.bf16.mxu0 %v11181_v20  ;;  %v11253_v20 = vld [vmem:[%s13985_s7 + $0x694] ss:$8 sps:$4 sm:$0xff]  }
 0x560   : > { %8912 = vmatpush1.bf16.msra.mxu1 %v11176_v17  ;;  %v7141_v17 = vcombine.low %v6627_v10, %v6740_v3  ;;  %v11304_v10 = vld [vmem:[%s13985_s7 + $0x8a4] ss:$8 sps:$4 sm:$0xff]   ;;  %v11302_v3 = vld [vmem:[%s13985_s7 + $0x8a0] ss:$8 sps:$4 sm:$0xff]  }
 0x561   : > { %8913 = vmatprep.subr.bf16.mxu1 %v11184_v28  ;;  %v11256_v28 = vld [vmem:[%s13985_s7 + $0x794] ss:$8 sps:$4 sm:$0xff]  }
 0x562   : > { %8873 = vmatpush1.bf16.msra.mxu0 %v11179_v12  ;;  %v11251_v12 = vld [vmem:[%s13985_s7 + $0x690] ss:$8 sps:$4 sm:$0xff]  }
 0x563   : > { %8874 = vmatprep.subr.bf16.mxu0 %v11187_v32  ;;  %v11259_v32 = vld [vmem:[%s13985_s7 + $0x684] ss:$8 sps:$4 sm:$0xff]  }
 0x564   : > { %8914 = vmatpush1.bf16.msra.mxu1 %v11182_v16  ;;  %v11254_v16 = vld [vmem:[%s13985_s7 + $0x790] ss:$8 sps:$4 sm:$0xff]  }
 0x565   : > { %8915 = vmatprep.subr.bf16.mxu1 %v11190_v31  ;;  %v13757_v31 = vrot.slane %v7141_v17, %v13120_v63 }
 0x566   : > { %8875 = vmatpush1.bf16.msra.mxu0 %v11185_v47  ;;  %v11262_v47 = vld [vmem:[%s13985_s7 + $0x784] ss:$8 sps:$4 sm:$0xff]  }
 0x567   : > { %8876 = vmatprep.subr.bf16.mxu0 %v11193_v8  ;;  %v11257_v8 = vld [vmem:[%s13985_s7 + $0x680] ss:$8 sps:$4 sm:$0xff]   ;;  %v7156_v17 = vrot.slane %v13757_v31, %v13120_v63 }
 0x568   : > { %8916 = vmatpush1.bf16.msra.mxu1 %v11188_v18  ;;  %v11265_v18 = vld [vmem:[%s13985_s7 + $0x874] ss:$8 sps:$4 sm:$0xff]  }
 0x569   : > { %8917 = vmatprep.subr.bf16.mxu1 %v11196_v14  ;;  %v7029_v14 = vld [vmem:[%s13986_s8] sm:$0x3] }
 0x56a   : > { %8877 = vmatpush1.bf16.msra.mxu0 %v11191_v57  ;;  %v11260_v57 = vld [vmem:[%s13985_s7 + $0x780] ss:$8 sps:$4 sm:$0xff]  }
 0x56b   : > { %8878 = vmatprep.subr.bf16.mxu0 %v11199_v15  ;;  %v7149_v15 = vcombine.high %v13757_v31, %v13757_v31  ;;  %v11313_v31 = vld [vmem:[%s13987_s9 + $0x70] sm:$0xff]  }
 0x56c   : > { %8918 = vmatpush1.bf16.msra.mxu1 %v11194_v37  ;;  %v7122_v37 = vrot.slane %v13547_v59, %v13120_v63 }
 0x56d   : > { %8919 = vmatprep.subr.bf16.mxu1 %v11202_v56  ;;  %v11263_v56 = vld [vmem:[%s13985_s7 + $0x870] ss:$8 sps:$4 sm:$0xff]  }
 0x56e   : > { %8879 = vmatpush1.bf16.msra.mxu0 %v11197_v5  ;;  %v7034_v5 = vrot.slane %v7029_v14, %v13058_v6 }
 0x56f   : > { %8880 = vmatprep.subr.bf16.mxu0 %v11205_v9  ;;  %v11268_v9 = vld [vmem:[%s13985_s7 + $0x864] ss:$8 sps:$4 sm:$0xff]  }
 0x570   : > { %8920 = vmatpush1.bf16.msra.mxu1 %v11200_v26  ;;  %v7163_v26 = vrot.slane %v7149_v15, %v13120_v63  ;;  %v11312_v63 = vld [vmem:[%s13987_s9 + $0x38] sm:$0xff]  }
 0x571   : > { %8921 = vmatprep.subr.bf16.mxu1 %v11208_v39  ;;  %v7038_v39 = vrot.slane %v7029_v14, %v4916_v36 }
 0x572   : > { %8881 = vmatpush1.bf16.msra.mxu0 %v11203_v45  ;;  %v7138_v45 = vcombine.high %v7122_v37, %v7122_v37 }
 0x573   : > { %8882 = vmatprep.subr.bf16.mxu0 %v11211_v46 }
 0x574   : > { %8922 = vmatpush1.bf16.msra.mxu1 %v11206_v55  ;;  %v11266_v55 = vld [vmem:[%s13985_s7 + $0x860] ss:$8 sps:$4 sm:$0xff]  }
 0x575   : > { %8923 = vmatprep.subr.bf16.mxu1 %v11214_v33 }
 0x576   : > { %8883 = vmatpush1.bf16.msra.mxu0 %v11209_v51 }
 0x577   : > { %8884 = vmatprep.subr.bf16.mxu0 %v11217_v19  ;;  %v11271_v19 = vld [vmem:[%s13985_s7 + $0x854] ss:$8 sps:$4 sm:$0xff]  }
 0x578   : > { %8924 = vmatpush1.bf16.msra.mxu1 %v11212_v1 }
 0x579   : > { %8925 = vmatprep.subr.bf16.mxu1 %v11220_v40 }
 0x57a   : > { %8885 = vmatpush2.bf16.msra.mxu0 %v11215_v0  ;;  %v11269_v0 = vld [vmem:[%s13985_s7 + $0x850] ss:$8 sps:$4 sm:$0xff]  }
 0x57b   : > { %8886 = vmatprep.subr.bf16.mxu0 %v11223_v30 }
 0x57c   : > { %8926 = vmatpush2.bf16.msra.mxu1 %v11218_v44 }
 0x57d   : > { %8927 = vmatprep.subr.bf16.mxu1 %v11226_v48 }
 0x57e   : > { %8887 = vmatpush2.bf16.msra.mxu0 %v11221_v49  ;;  %v11272_v49 = vld [vmem:[%s13985_s7 + $0x840] ss:$8 sps:$4 sm:$0xff]  }
 0x57f   : > { %8888 = vmatprep.subr.bf16.mxu0 %v11229_v62  ;;  %v11277_v62 = vld [vmem:[%s13985_s7 + $0x834] ss:$8 sps:$4 sm:$0xff]  }
 0x580   : > { %8928 = vmatpush2.bf16.msra.mxu1 %v11224_v60  ;;  %v11275_v60 = vld [vmem:[%s13985_s7 + $0x830] ss:$8 sps:$4 sm:$0xff]  }
 0x581   : > { %8929 = vmatprep.subr.bf16.mxu1 %v11232_v38  ;;  %v11283_v38 = vld [vmem:[%s13985_s7 + $0x814] ss:$8 sps:$4 sm:$0xff]  }
 0x582   : > { %8889 = vmatpush2.bf16.msra.mxu0 %v11227_v2  ;;  %v11281_v2 = vld [vmem:[%s13985_s7 + $0x810] ss:$8 sps:$4 sm:$0xff]  }
 0x583   : > { %8890 = vmatprep.subr.bf16.mxu0 %v11235_v53  ;;  %v11286_v53 = vld [vmem:[%s13985_s7 + $0x804] ss:$8 sps:$4 sm:$0xff]  }
 0x584   : > { %8930 = vmatpush2.bf16.msra.mxu1 %v11230_v43  ;;  %v11284_v43 = vld [vmem:[%s13985_s7 + $0x800] ss:$8 sps:$4 sm:$0xff]  }
 0x585   : > { %8931 = vmatprep.subr.bf16.mxu1 %v11238_v61  ;;  %v11287_v61 = vld [vmem:[%s13985_s7 + $0x8f0] ss:$8 sps:$4 sm:$0xff]  }
 0x586   : > { %8891 = vmatpush2.bf16.msra.mxu0 %v11233_v54  ;;  %v11292_v54 = vld [vmem:[%s13985_s7 + $0x8e4] ss:$8 sps:$4 sm:$0xff]  }
 0x587   : > { %8892 = vmatprep.subr.bf16.mxu0 %v11241_v27  ;;  %v11290_v27 = vld [vmem:[%s13985_s7 + $0x8e0] ss:$8 sps:$4 sm:$0xff]  }
 0x588   : > { %8932 = vmatpush2.bf16.msra.mxu1 %v11236_v22  ;;  %v11295_v22 = vld [vmem:[%s13985_s7 + $0x8d4] ss:$8 sps:$4 sm:$0xff]  }
 0x589   : > { %8933 = vmatprep.subr.bf16.mxu1 %v11244_v29  ;;  %v11298_v29 = vld [vmem:[%s13985_s7 + $0x8c4] ss:$8 sps:$4 sm:$0xff]  }
 0x58a   : > { %8893 = vmatpush2.bf16.msra.mxu0 %v11239_v52  ;;  %v11296_v52 = vld [vmem:[%s13985_s7 + $0x8c0] ss:$8 sps:$4 sm:$0xff]  }
 0x58b   : > { %8894 = vmatprep.subr.bf16.mxu0 %v11247_v41  ;;  %v11301_v41 = vld [vmem:[%s13985_s7 + $0x8b4] ss:$8 sps:$4 sm:$0xff]  }
 0x58c   : > { %8934 = vmatpush2.bf16.msra.mxu1 %v11242_v35  ;;  %v11299_v35 = vld [vmem:[%s13985_s7 + $0x8b0] ss:$8 sps:$4 sm:$0xff]  }
 0x58d   : > { %8935 = vmatprep.subr.bf16.mxu1 %v11250_v4  ;;  %v11307_v4 = vld [vmem:[%s13985_s7 + $0x894] ss:$8 sps:$4 sm:$0xff]  }
 0x58e   : > { %8895 = vmatpush2.bf16.msra.mxu0 %v11245_v13  ;;  %v11305_v13 = vld [vmem:[%s13985_s7 + $0x890] ss:$8 sps:$4 sm:$0xff]  }
 0x58f   : > { %8896 = vmatprep.subr.bf16.mxu0 %v11253_v20  ;;  %v11310_v20 = vld [vmem:[%s13985_s7 + $0x884] ss:$8 sps:$4 sm:$0xff]  }
 0x590   : > { %8936 = vmatpush2.bf16.msra.mxu1 %v11248_v25  ;;  %v11308_v25 = vld [vmem:[%s13985_s7 + $0x880] ss:$8 sps:$4 sm:$0xff]  }
 0x591   : > { %8937 = vmatprep.subr.bf16.mxu1 %v11256_v28 }
 0x592   : > { %8897 = vmatpush2.bf16.msra.mxu0 %v11251_v12 }
 0x593   : > { %8898 = vmatprep.subr.bf16.mxu0 %v11259_v32 }
 0x594   : > { %8938 = vmatpush2.bf16.msra.mxu1 %v11254_v16 }
 0x595   : > { %8939 = vmatprep.subr.bf16.mxu1 %v11262_v47 }
 0x596   : > { %8899 = vmatpush2.bf16.msra.mxu0 %v11257_v8 }
 0x597   : > { %8950 = vmatprep.subr.bf16.mxu0 %v11265_v18 }
 0x598   : > { %8940 = vmatpush2.bf16.msra.mxu1 %v11260_v57 }
 0x599   : > { %8901 = vmatmul.mubr.bf16.vlgmr.msra.gmra.mxu0 %v7122_v37  ;;  %v8656_v59 = vpop.f32.mrf.mxu0 }
 0x59a   : > { %v8657_v46 = vadd.f32 %v8656_v59, %v7034_v5  ;;  %8951 = vmatpush1.bf16.msra.mxu0 %v11263_v56  ;;  %8982 = vmatprep.mubr.bf16.mxu0 %v7163_v26  ;;  %v11311_v5 = vld [vmem:[%s13987_s9 + $0x78] sm:$0xff]  }
 0x59b   : > { %8942 = vmatmul.mubr.bf16.vlgmr.msra.gmra.mxu1 %v7138_v45  ;;  %v8658_v33 = vpop.f32.mrf.mxu0  ;;  %v8697_v51 = vpop.f32.mrf.mxu1  ;;  %8952 = vmatprep.subr.bf16.mxu0 %v11268_v9  ;;  %v11314_v9 = vld [vmem:[%s13987_s9 + $0x30] sm:$0xff]  }
 0x59c   : > { %v8659_v50 = vadd.f32 %v8658_v33, %v7038_v39  ;;  %v13794_v36 = vadd.f32 %v8697_v51, %v8657_v46  ;;  %10396 = vmatprep.subr.bf16.mxu1 %v11311_v5  ;;  %v11315_v33 = vld [vmem:[%s13987_s9 + $0x68] sm:$0xff]  }
 0x59d   : > { %v8660_v1 = vpop.f32.mrf.mxu0  ;;  %v8699_v40 = vpop.f32.mrf.mxu1  ;;  %10397 = vmatpush3.bf16.msra.mxu1 %v11312_v63  ;;  %v11316_v51 = vld [vmem:[%s13987_s9 + $0x28] sm:$0xff]  }
 0x59e   : > { %v13796_v34 = vadd.f32 %v8699_v40, %v8659_v50  ;;  %8953 = vmatpush1.bf16.msra.mxu0 %v11266_v55  ;;  %10398 = vmatprep.subr.bf16.mxu1 %v11313_v31 }
 0x59f   : > { %v8661_v30 = vpop.f32.mrf.mxu0  ;;  %v8701_v44 = vpop.f32.mrf.mxu1  ;;  %8954 = vmatprep.subr.bf16.mxu0 %v11271_v19 }
 0x5a0   : > { %v11318_v30 = vld [vmem:[%s13987_s9 + $0x20] sm:$0xff]   ;;  %v11319_v44 = vld [vmem:[%s13987_s9 + $0x58] sm:$0xff]  }
 0x5a1   : > { %v8702_v48 = vpop.f32.mrf.mxu1  ;;  %10399 = vmatpush3.bf16.msra.mxu1 %v11314_v9 }
 0x5a2   : > { %8955 = vmatpush1.bf16.msra.mxu0 %v11269_v0  ;;  %10400 = vmatprep.subr.bf16.mxu1 %v11315_v33  ;;  %v11317_v0 = vld [vmem:[%s13987_s9 + $0x60] sm:$0xff]   ;;  %v11321_v48 = vld [vmem:[%s13987_s9 + $0x50] sm:$0xff]  }
 0x5a3   : > { %8956 = vmatprep.subr.bf16.mxu0 %v11274_v42  ;;  %v11320_v42 = vld [vmem:[%s13987_s9 + $0x18] sm:$0xff]  }
 0x5a5   : > { %10401 = vmatpush3.bf16.msra.mxu1 %v11316_v51 }
 0x5a6   : > { %8957 = vmatpush1.bf16.msra.mxu0 %v11272_v49  ;;  %10402 = vmatprep.subr.bf16.mxu1 %v11317_v0  ;;  %v11322_v49 = vld [vmem:[%s13987_s9 + $0x10] sm:$0xff]  }
 0x5a7   : > { %8958 = vmatprep.subr.bf16.mxu0 %v11277_v62  ;;  %v11323_v62 = vld [vmem:[%s13987_s9 + $0x48] sm:$0xff]  }
 0x5a9   : > { %10403 = vmatpush3.bf16.msra.mxu1 %v11318_v30 }
 0x5aa   : > { %8959 = vmatpush1.bf16.msra.mxu0 %v11275_v60  ;;  %10404 = vmatprep.subr.bf16.mxu1 %v11319_v44  ;;  %v11324_v60 = vld [vmem:[%s13987_s9 + $0x8] sm:$0xff]  }
 0x5ab   : > { %8960 = vmatprep.subr.bf16.mxu0 %v11280_v23  ;;  %v11325_v23 = vld [vmem:[%s13987_s9 + $0x40] sm:$0xff]  }
 0x5ad   : > { %10405 = vmatpush3.bf16.msra.mxu1 %v11320_v42 }
 0x5ae   : > { %8961 = vmatpush1.bf16.msra.mxu0 %v11278_v24  ;;  %10406 = vmatprep.subr.bf16.mxu1 %v11321_v48  ;;  %v11326_v24 = vld [vmem:[%s13987_s9] sm:$0xff]  }
 0x5af   : > { %8962 = vmatprep.subr.bf16.mxu0 %v11283_v38 }
 0x5b1   : > { %10407 = vmatpush3.bf16.msra.mxu1 %v11322_v49 }
 0x5b2   : > { %8963 = vmatpush1.bf16.msra.mxu0 %v11281_v2  ;;  %10408 = vmatprep.subr.bf16.mxu1 %v11323_v62 }
 0x5b3   : > { %8964 = vmatprep.subr.bf16.mxu0 %v11286_v53 }
 0x5b5   : > { %10409 = vmatpush3.bf16.msra.mxu1 %v11324_v60 }
 0x5b6   : > { %8965 = vmatpush1.bf16.msra.mxu0 %v11284_v43  ;;  %10410 = vmatprep.subr.bf16.mxu1 %v11325_v23 }
 0x5b7   : > { %8966 = vmatprep.subr.bf16.mxu0 %v11289_v21 }
 0x5b9   : > { %10411 = vmatpush3.bf16.msra.mxu1 %v11326_v24 }
 0x5ba   : > { %8967 = vmatpush2.bf16.msra.mxu0 %v11287_v61 }
 0x5bb   : > { %8968 = vmatprep.subr.bf16.mxu0 %v11292_v54 }
 0x5be   : > { %8969 = vmatpush2.bf16.msra.mxu0 %v11290_v27 }
 0x5bf   : > { %8970 = vmatprep.subr.bf16.mxu0 %v11295_v22 }
 0x5c2   : > { %8971 = vmatpush2.bf16.msra.mxu0 %v11293_v7 }
 0x5c3   : > { %8972 = vmatprep.subr.bf16.mxu0 %v11298_v29 }
 0x5c6   : > { %8973 = vmatpush2.bf16.msra.mxu0 %v11296_v52 }
 0x5c7   : > { %8974 = vmatprep.subr.bf16.mxu0 %v11301_v41 }
 0x5ca   : > { %8975 = vmatpush2.bf16.msra.mxu0 %v11299_v35 }
 0x5cb   : > { %8976 = vmatprep.subr.bf16.mxu0 %v11304_v10 }
 0x5ce   : > { %8977 = vmatpush2.bf16.msra.mxu0 %v11302_v3 }
 0x5cf   : > { %8978 = vmatprep.subr.bf16.mxu0 %v11307_v4 }
 0x5d2   : > { %8979 = vmatpush2.bf16.msra.mxu0 %v11305_v13 }
 0x5d3   : > { %8980 = vmatprep.subr.bf16.mxu0 %v11310_v20 }
 0x5d6   : > { %8981 = vmatpush2.bf16.msra.mxu0 %v11308_v25 }
 0x5d9   : > { %v8738_v28 = vpop.f32.mrf.mxu0  ;;  %8983 = vmatmul.mubr.bf16.vlgmr.msra.gmra.mxu0 %v7156_v17 }
 0x5da   : > { %v8739_v12 = vadd.f32 %v8738_v28, %v13794_v36 }
 0x5db   : > { %v8740_v32 = vpop.f32.mrf.mxu0  ;;  %v8779_v16 = vpop.f32.mrf.mxu1 }
 0x5dc   : > { %v8741_v47 = vadd.f32 %v8740_v32, %v13796_v34  ;;  %v8780_v8 = vadd.f32 %v8779_v16, %v8739_v12 }
 0x5dd   : > { %v8742_v18 = vpop.f32.mrf.mxu0  ;;  %v8781_v14 = vpop.f32.mrf.mxu1 }
 0x5de   : > { %v8782_v57 = vadd.f32 %v8781_v14, %v8741_v47 }
 0x5df   : > { %v8743_v15 = vpop.f32.mrf.mxu0  ;;  %v8783_v37 = vpop.f32.mrf.mxu1 }
 0x5e1   : > { %v8784_v56 = vpop.f32.mrf.mxu1 }
 0x619   : > { %v8820_v26 = vpop.f32.mrf.mxu0 }
 0x61a   : > { %v8821_v39 = vadd.f32 %v8820_v26, %v8780_v8 }
 0x61b   : > { %v8822_v59 = vpop.f32.mrf.mxu0  ;;  %v8861_v45 = vpop.f32.mrf.mxu1 }
 0x61c   : > { %v8823_v46 = vadd.f32 %v8822_v59, %v8782_v57  ;;  %v8862_v55 = vadd.f32 %v8861_v45, %v8821_v39 }
 0x61d   : > { %v8824_v19 = vpop.f32.mrf.mxu0  ;;  %v8863_v50 = vpop.f32.mrf.mxu1 }
 0x61e   : > { %v8864_v36 = vadd.f32 %v8863_v50, %v8823_v46 }
 0x61f   : > { %v8825_v1 = vpop.f32.mrf.mxu0  ;;  %v8865_v40 = vpop.f32.mrf.mxu1 }
 0x621   : > { %v8866_v34 = vpop.f32.mrf.mxu1 }
 0x659   : > { %v8902_v38 = vpop.f32.mrf.mxu0 }
 0x65a   : > { %v8903_v22 = vadd.f32 %v8902_v38, %v8862_v55 }
 0x65b   : > { %v8904_v2 = vpop.f32.mrf.mxu0  ;;  %v8943_v53 = vpop.f32.mrf.mxu1 }
 0x65c   : > { %v8905_v7 = vadd.f32 %v8904_v2, %v8864_v36  ;;  %v8944_v29 = vadd.f32 %v8943_v53, %v8903_v22 }
 0x65d   : > { %v8906_v43 = vpop.f32.mrf.mxu0  ;;  %v8945_v21 = vpop.f32.mrf.mxu1 }
 0x65e   : > { %v8946_v41 = vadd.f32 %v8945_v21, %v8905_v7 }
 0x65f   : > { %v8907_v61 = vpop.f32.mrf.mxu0  ;;  %v8947_v54 = vpop.f32.mrf.mxu1 }
 0x661   : > { %v8948_v27 = vpop.f32.mrf.mxu1 }
 0x699   : > { %v8984_v52 = vpop.f32.mrf.mxu0 }
 0x69a   : > { %v8985_v35 = vadd.f32 %v8984_v52, %v8944_v29 }
 0x69b   : > { %v8986_v10 = vpop.f32.mrf.mxu0 }
 0x69c   : > { %v8987_v3 = vadd.f32 %v8986_v10, %v8946_v41  ;;  %v8991_v13 = vmax.f32 %v8985_v35, 0.0 }
 0x69d   : > { %v8988_v4 = vpop.f32.mrf.mxu0 }
 0x69e   : > { %v8992_v20 = vmax.f32 %v8987_v3, 0.0 }
 0x69f   : > { %v8989_v25 = vpop.f32.mrf.mxu0 }
 0x6a0   : > { %v8995_v17 = vcombine.low %v8991_v13, %v8992_v20 }
 0x6a2   : > { %v9002_v28 = vrot.slane %v8995_v17, %v11628_v58  ;;  %v9060_v58 = vld [vmem:[%s13988_s10] sm:$0x1] }
 0x6a4   : > { %v9003_v12 = vcombine.high %v9002_v28, %v9002_v28  ;;  %v10175_v32 = vrot.slane %v9002_v28, 9 }
 0x6a6   : > { %v10176_v16 = vrot.slane %v9003_v12, 9  ;;  %v9012_v47 = vmax.f32 %v9002_v28, %v10175_v32 }
 0x6a8   : > { %v9013_v8 = vmax.f32 %v9003_v12, %v10176_v16 }
 0x6aa   : > { %v9014_v18 = vmax.f32 %v9012_v47, %v9013_v8 }
 0x6ac   : > { %v9023_v14 = vrot.slane %v9014_v18, %v13070_v11  ;;  %v9019_v57 = vrot.slane %v9014_v18, %v13058_v6 }
 0x6ae   : > { %v9027_v15 = vpack.c.bf16 %v9023_v14, %v9023_v14  ;;  %v9026_v37 = vpack.c.bf16 %v9019_v57, %v9019_v57 }
 0x6b0   : > { %9189 = vmatprep.mubr.bf16.mxu1 %v9027_v15 }
 0x6b1   : > { %9190 = vmatmul.mubr.bf16.vlgmr.msra.gmra.mxu1 %v9026_v37 }
 0x771   : > { %v10412_v56 = vpop.f32.mrf.mxu1 }
 0x773   : > { %v10413_v5 = vpop.f32.mrf.mxu1 }
 0x774   : > { %v10414_v63 = vadd.f32 %v10413_v5, %v10412_v56 }
 0x775   : > { %v10415_v31 = vpop.f32.mrf.mxu1 }
 0x776   : > { %v9192_v11 = vadd.f32 %v10414_v63, %v9060_v58 }
 0x777   : > { %v10416_v6 = vpop.f32.mrf.mxu1 }
 0x778   : > { %9197 = vst.msk [vmem:[%s378_s14] sm:$0x1] %vm2148_vm2, %v9192_v11 }
 0x779   : > { %11345 = shalt.err (!%p11342_p3)
}
 0x77a   : > { %s11346_s13 = scalar_lea.hbm %s13942_s22, 16  ;;  %s11350_s15 = scalar_lea.hbm %s13989_s11, 32 }
 0x77b   : > { %p11347_p4 = scmp.ne.s32.totalorder %s13942_s22, %s11346_s13  ;;  %p11351_p9 = scmp.lt.s32.totalorder %s13942_s22, %s13989_s11 }
 0x77c   : > { %p11352_p10 = scmp.lt.s32.totalorder %s11350_s15, %s11346_s13 }
 0x77d   : > { %p11348_p7 = pnand %p11347_p4, %p11497_p5 }
 0x77e   : > { %p11353_p11 = por %p11352_p10, %p11351_p9 }
 0x77f   : > { %p11349_p8 = pneg %p11348_p7 }
 0x781   : > { %p11354_p12 = pnand %p11353_p11, %p11349_p8 }
 0x783   : > { %11357 = shalt.err (!%p11354_p12)
}
 0x784   : > { %10481 = dma.vmem_to_hbm [thread:$0]  (%p11497_p5), %s9212_s0, 16, %s13942_s22, %s9199_s24  }
 0x785 PF: > { %p10487_p13 = scmp.ge.s32.totalorder %s11392_s20, 2  ;;  %s9223_s25 = sand.u32 1, %s11380_s17  }
 0x786   : > { %s9224_s29 = scalar_lea.sflag [#allocation6], %s9223_s25 }
 0x787   : > { %p10484_p0 = pnand %p10487_p13, %p11501_p6 }
 0x789   : > { %p10485_p1 = pneg %p10484_p0 }
 0x78b   : > { %11375 = dma.done.wait (%p10485_p1), %s9224_s29, 16  }
 0x78c   : > { %11377 = vsyncadd (%p10485_p1), %s9224_s29, 4294967280  ;;  %p21_p2 = scmp.ge.s32.totalorder %s11484_s23, 4   ;;  %s14012_s17 = smov %s11384_s18 }
 0x78d   : > { %s14013_s18 = smov %s11388_s19  ;;  %s14014_s19 = smov %s11495_s26 }
 0x78e   : > { %s14015_s20 = smov %s11484_s23  ;;  %23 = sbr.rel (!%p21_p2) target bundleno = 5 (0x5), region = 108 }
 0x793   :  { %9228 = vsyncpa [#allocation6], 1 }
 0x794   :  { %9230 = vsyncpa [#allocation6 + $0x1], 1 }

</bundles_post_ra>
